<compile_context>
chip_gen: v5e
topology: v5e:2x2
jax: 0.10.0
libtpu: 0.0.40
codegen_flags: <defaults>
</compile_context>

<pallas_src>
import jax
import jax.numpy as jnp
from jax.experimental import pallas as pl
from jax.experimental.pallas import tpu as pltpu


# ----------------------------------------------------------------------------
# Fused gather + mask kernel.
#   idx_ref: (1, 1, T) int32  flat source index per range-view pixel, -1 = masked
#   src_ref: (1, C, S)        camera features for this batch: channels x (Hc*Wc)
#   out_ref: (1, C, T)        projected (and masked) features
# ----------------------------------------------------------------------------
def _gather_mask_kernel(idx_ref, src_ref, out_ref):
    idx = idx_ref[0]                      # (1, T) int32
    src = src_ref[0].astype(jnp.float32)  # (C, S)
    S = src.shape[1]
    T = idx.shape[1]

    # One-hot selection matrix (exact 0/1 values in bf16); idx == -1 never
    # matches the iota, so masked pixels produce an all-zero column -> output 0.
    eq = jax.lax.broadcasted_iota(jnp.int32, (S, T), 0) == idx
    onehot = eq.astype(jnp.float32).astype(jnp.bfloat16)          # (S, T)

    # Exact f32 gather on the MXU: 3-term bf16 split of the source
    # (hi + mid + lo == src exactly for normal-range f32).
    hi16 = src.astype(jnp.bfloat16)
    r1 = src - hi16.astype(jnp.float32)
    mid16 = r1.astype(jnp.bfloat16)
    lo16 = (r1 - mid16.astype(jnp.float32)).astype(jnp.bfloat16)

    acc = jnp.dot(hi16, onehot, preferred_element_type=jnp.float32)
    acc += jnp.dot(mid16, onehot, preferred_element_type=jnp.float32)
    acc += jnp.dot(lo16, onehot, preferred_element_type=jnp.float32)

    out_ref[0] = acc.astype(out_ref.dtype)


# ----------------------------------------------------------------------------
# ImageRescale.forward
# ----------------------------------------------------------------------------
def image_rescale(image_features, c2l_proj_ind, scale, *, max_tile_pixels=1024):
    B, C, Hc, Wc = image_features.shape
    _, _, Hr, Wr = c2l_proj_ind.shape
    S = Hc * Wc
    P = Hr * Wr

    # Index / mask computation on the tiny (B, 2, Hr, Wr) tensor (glue).
    # torch.round == jnp.round (round-half-to-even).
    sc = jnp.asarray(scale, jnp.float32).reshape(1, 2, 1, 1)
    ind = jnp.round(c2l_proj_ind.astype(jnp.float32) / sc).astype(jnp.int32)
    ih, iw = ind[:, 0], ind[:, 1]                                  # (B, Hr, Wr)
    mask = (ih >= 0) & (ih < Hc) & (iw >= 0) & (iw < Wc)
    flat = jnp.where(mask, ih * Wc + iw, -1).reshape(B, 1, P)      # -1 => zeroed

    # NCHW stays put: only a free reshape; pixels land on the lane axis.
    src = image_features.reshape(B, C, S)

    # Tile the range-view pixel axis; pad (the tiny index tensor) if needed.
    if P <= max_tile_pixels:
        T, Pp = P, P
    else:
        T = max(128, (max_tile_pixels // 128) * 128)
        Pp = pl.cdiv(P, T) * T
        flat = jnp.pad(flat, ((0, 0), (0, 0), (0, Pp - P)), constant_values=-1)

    out = pl.pallas_call(
        _gather_mask_kernel,
        out_shape=jax.ShapeDtypeStruct((B, C, Pp), image_features.dtype),
        grid=(B, Pp // T),
        in_specs=[
            pl.BlockSpec((1, 1, T), lambda b, t: (b, 0, t)),   # flat indices
            pl.BlockSpec((1, C, S), lambda b, t: (b, 0, 0)),   # per-batch source
        ],
        out_specs=pl.BlockSpec((1, C, T), lambda b, t: (b, 0, t)),
        compiler_params=pltpu.CompilerParams(
            dimension_semantics=("parallel", "parallel")),
    )(flat, src)

    return out[:, :, :P].reshape(B, C, Hr, Wr)


# ----------------------------------------------------------------------------
# Pure-JAX reference (independent of the kernel) for validation.
# ----------------------------------------------------------------------------
def image_rescale_ref(image_features, c2l_proj_ind, scale):
    B, C, Hc, Wc = image_features.shape
    _, _, Hr, Wr = c2l_proj_ind.shape
    sc = jnp.asarray(scale, jnp.float32).reshape(1, 2, 1, 1)
    ind = jnp.round(c2l_proj_ind.astype(jnp.float32) / sc).astype(jnp.int32)
    ih, iw = ind[:, 0], ind[:, 1]
    mask = (ih >= 0) & (ih < Hc) & (iw >= 0) & (iw < Wc)
    flat = jnp.clip(ih, 0, Hc - 1) * Wc + jnp.clip(iw, 0, Wc - 1)
    g = jnp.take_along_axis(image_features.reshape(B, C, Hc * Wc),
                            flat.reshape(B, 1, Hr * Wr), axis=2)
    g = g * mask.reshape(B, 1, Hr * Wr).astype(g.dtype)
    return g.reshape(B, C, Hr, Wr)


if __name__ == "__main__":
    key = jax.random.PRNGKey(0)
    k1, k2 = jax.random.split(key)

    B, C = 2, 128            # feature channels (lane-dense demo size)
    Hc, Wc = 16, 16          # camera feature grid (image / 8)
    Hr, Wr = 8, 64           # range-view grid
    scale = (8.0, 8.0)

    image_features = jax.random.normal(k1, (B, C, Hc, Wc), jnp.float32)
    # Projected (row, col) coordinates in full-image pixels; round(x/8) lands
    # partly inside and partly outside the 16x16 camera feature grid so the
    # bounds mask is exercised on both sides.
    c2l_proj_ind = jax.random.randint(
        k2, (B, 2, Hr, Wr), -16, 8 * Hc + 16).astype(jnp.float32)

    out = image_rescale(image_features, c2l_proj_ind, scale)
    jax.block_until_ready(out)

    ref = image_rescale_ref(image_features, c2l_proj_ind, scale)
    assert out.shape == (B, C, Hr, Wr)
    assert jnp.allclose(out, ref, atol=1e-5, rtol=1e-5), \
        float(jnp.max(jnp.abs(out - ref)))
    print("KERNEL_OK")
</pallas_src>

<mosaic_0001>
module attributes {stable_mosaic.version = 11 : i64} {
  func.func @_gather_mask_kernel(%arg0: i32, %arg1: i32, %arg2: memref<1x1x512xi32, #tpu.memory_space<vmem>>, %arg3: memref<1x128x256xf32, #tpu.memory_space<vmem>>, %arg4: memref<1x128x512xf32, #tpu.memory_space<vmem>>) attributes {dimension_semantics = [#tpu.dimension_semantics<parallel>, #tpu.dimension_semantics<parallel>], iteration_bounds = array<i64: 2, 1>, scalar_prefetch = 0 : i64, scratch_operands = 0 : i64, tpu.core_type = #tpu.core_type<tc>, window_params = [{transform_indices = @transform_0, window_bounds = array<i64: 1, 1, 512>}, {transform_indices = @transform_1, window_bounds = array<i64: 1, 128, 256>}, {transform_indices = @transform_2, window_bounds = array<i64: 1, 128, 512>}]} {
    %c0 = arith.constant 0 : index
    %c0_0 = arith.constant 0 : index
    %c0_1 = arith.constant 0 : index
    %0 = vector.load %arg2[%c0, %c0_0, %c0_1] : memref<1x1x512xi32, #tpu.memory_space<vmem>>, vector<1x1x512xi32>
    %1 = vector.shape_cast %0 : vector<1x1x512xi32> to vector<1x512xi32>
    %c0_2 = arith.constant 0 : index
    %c0_3 = arith.constant 0 : index
    %c0_4 = arith.constant 0 : index
    %2 = vector.load %arg3[%c0_2, %c0_3, %c0_4] : memref<1x128x256xf32, #tpu.memory_space<vmem>>, vector<1x128x256xf32>
    %3 = vector.shape_cast %2 : vector<1x128x256xf32> to vector<128x256xf32>
    %4 = tpu.iota {dimensions = array<i32: 0>} : vector<256x512xi32>
    %5 = vector.broadcast %1 : vector<1x512xi32> to vector<256x512xi32>
    %6 = arith.cmpi eq, %4, %5 : vector<256x512xi32>
    %7 = arith.extui %6 : vector<256x512xi1> to vector<256x512xi32>
    %8 = arith.sitofp %7 : vector<256x512xi32> to vector<256x512xf32>
    %9 = arith.truncf %8 : vector<256x512xf32> to vector<256x512xbf16>
    %10 = arith.truncf %3 : vector<128x256xf32> to vector<128x256xbf16>
    %11 = arith.extf %10 : vector<128x256xbf16> to vector<128x256xf32>
    %12 = arith.subf %3, %11 : vector<128x256xf32>
    %13 = arith.truncf %12 : vector<128x256xf32> to vector<128x256xbf16>
    %14 = arith.extf %13 : vector<128x256xbf16> to vector<128x256xf32>
    %15 = arith.subf %12, %14 : vector<128x256xf32>
    %16 = arith.truncf %15 : vector<128x256xf32> to vector<128x256xbf16>
    %cst = arith.constant dense<0.000000e+00> : vector<128x512xf32>
    %17 = tpu.matmul %10, %9, %cst {dimension_numbers = #tpu.dot_dimension_numbers<[1], [0], [0], [1], [0, 0, 1, 1], [], []>} : vector<128x256xbf16>, vector<256x512xbf16>, vector<128x512xf32> -> vector<128x512xf32>
    %cst_5 = arith.constant dense<0.000000e+00> : vector<128x512xf32>
    %18 = tpu.matmul %13, %9, %cst_5 {dimension_numbers = #tpu.dot_dimension_numbers<[1], [0], [0], [1], [0, 0, 1, 1], [], []>} : vector<128x256xbf16>, vector<256x512xbf16>, vector<128x512xf32> -> vector<128x512xf32>
    %19 = arith.addf %17, %18 : vector<128x512xf32>
    %cst_6 = arith.constant dense<0.000000e+00> : vector<128x512xf32>
    %20 = tpu.matmul %16, %9, %cst_6 {dimension_numbers = #tpu.dot_dimension_numbers<[1], [0], [0], [1], [0, 0, 1, 1], [], []>} : vector<128x256xbf16>, vector<256x512xbf16>, vector<128x512xf32> -> vector<128x512xf32>
    %21 = arith.addf %19, %20 : vector<128x512xf32>
    %c0_7 = arith.constant 0 : index
    %c0_8 = arith.constant 0 : index
    %c0_9 = arith.constant 0 : index
    %22 = vector.load %arg4[%c0_7, %c0_8, %c0_9] : memref<1x128x512xf32, #tpu.memory_space<vmem>>, vector<1x128x512xf32>
    %23 = vector.shape_cast %22 : vector<1x128x512xf32> to vector<128x512xf32>
    %24 = vector.shape_cast %21 : vector<128x512xf32> to vector<1x128x512xf32>
    tpu.vector_store %arg4[%c0_7, %c0_8, %c0_9], %24 {strides = array<i32>} : memref<1x128x512xf32, #tpu.memory_space<vmem>>, vector<1x128x512xf32>,
    return
  }
  func.func @transform_0(%arg0: i32, %arg1: i32) -> (i32, i32, i32) {
    %c0_i32 = arith.constant 0 : i32
    %c0_i32_0 = arith.constant 0 : i32
    return %arg0, %c0_i32, %arg1 : i32, i32, i32
  }
  func.func @transform_1(%arg0: i32, %arg1: i32) -> (i32, i32, i32) {
    %c0_i32 = arith.constant 0 : i32
    %c0_i32_0 = arith.constant 0 : i32
    %c0_i32_1 = arith.constant 0 : i32
    return %arg0, %c0_i32, %c0_i32_0 : i32, i32, i32
  }
  func.func @transform_2(%arg0: i32, %arg1: i32) -> (i32, i32, i32) {
    %c0_i32 = arith.constant 0 : i32
    %c0_i32_0 = arith.constant 0 : i32
    return %arg0, %c0_i32, %arg1 : i32, i32, i32
  }
}

</mosaic_0001>

<bundles_post_ra>
// kernel: tpu_custom_call.1
= control target key start
LH: loop header
LB: loop body
LE: loop exit
PB: predicated region body
PF: predicated region fallthrough
CT: control target
= control target key end

     0   :  { %7 = vsyncpa [#allocation3], 0  ;;  %s5920_s0 = inlined_call_operand.hbm [shape: s32[2,1,512], index: 0, kind: input, shape index: {}]   ;;  %s5921_s1 = inlined_call_operand.hbm [shape: f32[2,128,256], index: 1, kind: input, shape index: {}]   ;;  %s5922_s2 = inlined_call_operand.hbm [shape: f32[2,128,512], index: 2, kind: output, shape index: {}]  }
   0x1   :  { %9 = vsyncpa [#allocation3 + $0x1], 0 }
   0x2   :  { %10 = vsyncpa [#allocation6], 0 }
   0x3   :  { %12 = vsyncpa [#allocation6 + $0x1], 0 }
   0x4   :  { %13 = vsyncpa [#allocation4], 0 }
   0x5   :  { %15 = vsyncpa [#allocation4 + $0x1], 0  ;;  %s3280_s9 = smov 0   ;;  %s3282_s10 = smov 0  }
   0x6   :  { %s3284_s11 = smov 0   ;;  %s3286_s12 = smov 0  }
   0x7   :  { %s3288_s13 = smov 0   ;;  %s3290_s14 = smov 0  }
   0x8 LB: > { %s2508_s15 = sadd.s32 4294967295, %s3258_s14   ;;  %s2509_s16 = sadd.s32 4294967294, %s3258_s14   ;;  %s3258_s14 = sphi %s3290_s14, %s21_s14   ;;  %s3254_s13 = sphi %s3288_s13, %s6898_s13   ;;  %s3250_s12 = sphi %s3286_s12, %s6897_s12   ;;  %s3246_s11 = sphi %s3284_s11, %s6896_s11   ;;  %s3242_s10 = sphi %s3282_s10, %s6895_s10   ;;  %s3238_s9 = sphi %s3280_s9, %s6894_s9  }
   0x9   : > { %s33_s17 = sadd.s32 1, %s3254_s13  ;;  %s42_s18 = sadd.s32 1, %s3246_s11 }
   0xa   : > { %p35_p0 = scmp.ge.s32.totalorder %s33_s17, 2  ;;  %p49_p1 = scmp.ne.s32.totalorder %s3246_s11, %s3242_s10 }
   0xb   : > { %p50_p2 = scmp.eq.s32.totalorder %s3258_s14, 0  ;;  %p55_p3 = scmp.ne.s32.totalorder %s3242_s10, %s3238_s9 }
   0xc   : > { %s6900_s17 = smov (%p35_p0, %s33_s17), 0  ;;  %p56_p5 = scmp.eq.s32.totalorder %s2508_s15, 0 }
   0xd   : > { %p3321_p4 = por %p50_p2, %p49_p1  ;;  %s37_s20 = ssub.s32 %s3254_s13, %s6900_s17 }
   0xe   : > { %p107_p6 = scmp.eq.s32.totalorder %s2508_s15, 1  ;;  %p40_p7 = scmp.eq.s32.totalorder %s37_s20, 0 }
   0xf   : > { %p3327_p8 = por %p56_p5, %p55_p3  ;;  %p113_p10 = scmp.eq.s32.totalorder %s2509_s16, 1 }
  0x10   : > { %p3331_p9 = por %p107_p6, %p49_p1  ;;  %p2511_p12 = scmp.ge.s32.totalorder %s3258_s14, 2 }
  0x11   : > { %s3336_s23 = scalar_select %p40_p7, %s3246_s11, %s42_s18  }
  0x12   : > { %p3338_p11 = por %p113_p10, %p55_p3  ;;  %p3057_p13 = scmp.lt.s32.totalorder %s3258_s14, 2 }
  0x13   : > { %s3345_s25 = sand.u32 1, %s3246_s11   ;;  %s2513_s27 = sshll.u32 %s3254_s13, 2 }
  0x14   : > { %s2512_s26 = sshll.u32 %s3345_s25, 2  ;;  %s143_s30 = scalar_lea.hbm %s5920_s0, %s2513_s27 }
  0x15   : > { %s137_s3 = scalar_lea.vmem [#allocation2], %s2512_s26  ;;  %s145_s5 = sshll.u32 %s143_s30, 4  ;;  %s146_s5 = int_to_ptr.hbm [resolvable:$true] %s145_s5 }
  0x16   : > { %s147_s4 = sshll.u32 %s137_s3, 4  ;;  %p3354_p0 = pnand %p3057_p13, %p3321_p4  ;;  %s148_s4 = int_to_ptr.vmem [resolvable:$true] %s147_s4 }
  0x17   : > { %p2517_p1 = scmp.ge.s32.totalorder %s3258_s14, 1  ;;  %p174_p2 = scmp.lt.s32.totalorder %s3258_s14, 3 }
  0x18   : > { %s134_s7 = scalar_lea.sflag [#allocation3], %s3345_s25  ;;  %s2514_s8 = sshll.u32 %s3345_s25, 8 }
  0x19   : > { %3049 = dma.hbm_to_vmem [thread:$0]  (!%p3354_p0), %s146_s5, 64, %s148_s4, %s134_s7  }
  0x1a   : > { %p175_p3 = pnand %p2517_p1, %p174_p2  ;;  %s3038_s15 = sshll.u32 %s3254_s13, 8 }
  0x1b   : > { %s163_s20 = scalar_lea.hbm %s5921_s1, %s3038_s15  ;;  %s158_s26 = scalar_lea.vmem [#allocation5], %s2514_s8 }
  0x1c   : > { %s166_s19 = sshll.u32 %s158_s26, 4  ;;  %s164_s27 = sshll.u32 %s163_s20, 4  ;;  %s167_s19 = int_to_ptr.vmem [resolvable:$true] %s166_s19  ;;  %s165_s27 = int_to_ptr.hbm [resolvable:$true] %s164_s27 }
  0x1d   : > { %s155_s28 = scalar_lea.sflag [#allocation6], %s3345_s25  ;;  %s3260_s29 = smov 256  }
  0x1e   : > { %s3261_s30 = smov 16   ;;  %178 = sbr.rel (%p175_p3) target bundleno = 994 (0x3e2), region = 28 }
  0x1f   : > { %3052 = dma.hbm_to_vmem [thread:$0]  (!%p3354_p0), %s165_s27, 4096, %s167_s19, %s155_s28, %s3260_s29, %s3260_s29, %s3261_s30  }
  0x23   : > { %s3372_s3 = sand.u32 1, %s3242_s10  }
  0x24   : > { %s2518_s4 = sshll.u32 %s3372_s3, 2  ;;  %s181_s5 = scalar_lea.sflag [#allocation3], %s3372_s3 }
  0x25   : > { %s184_s7 = scalar_lea.vmem [#allocation2], %s2518_s4 }
  0x26   : > { %3225 = dma.done.wait (%p3327_p8), %s181_s5, 64  }
  0x27   : > { %3227 = vsyncadd (%p3327_p8), %s181_s5, 4294967232  ;;  %s2519_s25 = sshll.u32 %s3372_s3, 8  ;;  %s191_s6 = scalar_lea.sflag [#allocation6], %s3372_s3 }
  0x28   : > { %s3382_s8 = scalar_lea.vmem [#allocation5], %s2519_s25 }
  0x29   : > { %3229 = dma.done.wait (%p3327_p8), %s191_s6, 4096  }
  0x2a   : > { %3231 = vsyncadd (%p3327_p8), %s191_s6, 4294963200  ;;  %v256_v0 = vlaneseq  ;;  %v3402_v6 = vld [vmem:[%s184_s7] sm:$0xf]  ;;  %v5953_v14 = vmov 1.0|1.0   ;;  %v6229_v22 = vmov 0 }
  0x2b   : > { %v3405_v7 = vperm.slane %v3402_v6, 0  ;;  %v3408_v8 = vperm.slane %v3402_v6, 1  ;;  %v6231_v23 = vmov 0  ;;  %v6233_v26 = vmov 0  ;;  %v224_v41 = vld [vmem:[%s3382_s8] sm:$0xff]  ;;  %v225_v42 = vld [vmem:[%s3382_s8 + $0x8] sm:$0xff] }
  0x2c   : > { %v3388_v1 = vshrl.u32 %v256_v0, 7  ;;  %v6235_v29 = vmov 0  ;;  %v6237_v30 = vmov 0  ;;  %v6241_v33 = vmov 0  ;;  %v226_v46 = vld [vmem:[%s3382_s8 + $0x10] sm:$0xff]  ;;  %v227_v47 = vld [vmem:[%s3382_s8 + $0x18] sm:$0xff] }
  0x2d   : > { %v6245_v36 = vmov 0  ;;  %v6248_v37 = vmov 0  ;;  %v6251_v40 = vmov 0  ;;  %v6256_v43 = vmov 0  ;;  %s2520_s21 = sshll.u32 %s3372_s3, 9  ;;  %s3039_s16 = sshll.u32 %s3250_s12, 9 }
  0x2e   : > { %v3391_v2 = vadd.s32 112, %v3388_v1  ;;  %v3394_v3 = vadd.s32 120, %v3388_v1  ;;  %v3397_v4 = vadd.s32 240, %v3388_v1  ;;  %v3400_v5 = vadd.s32 248, %v3388_v1  ;;  %s5723_s15 = scalar_lea.vmem [#allocation7], %s2520_s21  ;;  %s2395_s26 = scalar_lea.hbm %s5922_s2, %s3039_s16 }
  0x2f   : > { %v3411_v9 = vadd.s32 96, %v3388_v1  ;;  %v3414_v10 = vadd.s32 104, %v3388_v1  ;;  %v3417_v11 = vadd.s32 224, %v3388_v1  ;;  %v3420_v12 = vadd.s32 232, %v3388_v1  ;;  %s2396_s19 = sshll.u32 %s5723_s15, 4  ;;  %s2398_s27 = sshll.u32 %s2395_s26, 4  ;;  %s2397_s19 = int_to_ptr.vmem [resolvable:$true] %s2396_s19  ;;  %s2399_s27 = int_to_ptr.hbm [resolvable:$true] %s2398_s27 }
  0x30   : > { %vm349_vm0 = vcmp.eq.s32.totalorder %v3391_v2, %v3405_v7  ;;  %vm353_vm1 = vcmp.eq.s32.totalorder %v3394_v3, %v3405_v7  ;;  %vm413_vm2 = vcmp.eq.s32.totalorder %v3397_v4, %v3405_v7  ;;  %vm417_vm3 = vcmp.eq.s32.totalorder %v3400_v5, %v3405_v7  ;;  %s2382_s12 = scalar_lea.sflag [#allocation4], %s3372_s3  ;;  %s3186_s28 = sshra.s32 %s2399_s27, 4  ;;  %s3187_s28 = int_to_ptr.hbm [resolvable:$true] %s3186_s28 }
  0x31   : > { %vm3430_vm4 = vmpackc.low %vm353_vm1, %vm349_vm0  ;;  %vm350_vm5 = vcmp.eq.s32.totalorder %v3391_v2, %v3408_v8  ;;  %vm354_vm6 = vcmp.eq.s32.totalorder %v3394_v3, %v3408_v8  ;;  %vm414_vm7 = vcmp.eq.s32.totalorder %v3397_v4, %v3408_v8  ;;  %vm418_vm8 = vcmp.eq.s32.totalorder %v3400_v5, %v3408_v8  ;;  %s3188_s29 = scalar_lea.hbm %s3187_s28, 512  ;;  %s3192_s5 = scalar_lea.hbm %s5922_s2, 1024 }
  0x32   : > { %2650 = vmatpush.bf16.msk.msra.mxu0 %vm3430_vm4, %v5953_v14  ;;  %vm3445_vm9 = vmpackc.low %vm417_vm3, %vm413_vm2  ;;  %vm341_vm10 = vcmp.eq.s32.totalorder %v3411_v9, %v3405_v7  ;;  %vm345_vm11 = vcmp.eq.s32.totalorder %v3414_v10, %v3405_v7  ;;  %v3454_v16 = vadd.s32 80, %v3388_v1  ;;  %v3457_v17 = vadd.s32 88, %v3388_v1  ;;  %p3189_p4 = scmp.ne.s32.totalorder %s3187_s28, %s3188_s29  ;;  %p3193_p7 = scmp.lt.s32.totalorder %s3187_s28, %s5922_s2 }
  0x33   : > { %2666 = vmatpush.bf16.msk.msra.mxu1 %vm3445_vm9, %v5953_v14  ;;  %vm3462_vm12 = vmpackc.low %vm354_vm6, %vm350_vm5  ;;  %vm405_vm13 = vcmp.eq.s32.totalorder %v3417_v11, %v3405_v7  ;;  %vm409_vm14 = vcmp.eq.s32.totalorder %v3420_v12, %v3405_v7  ;;  %v3471_v19 = vadd.s32 208, %v3388_v1  ;;  %v3474_v20 = vadd.s32 216, %v3388_v1  ;;  %p3194_p8 = scmp.lt.s32.totalorder %s3192_s5, %s3188_s29 }
  0x34   : > { %2682 = vmatpush.bf16.msk.msra.mxu2 %vm3462_vm12, %v5953_v14  ;;  %vm3485_vm15 = vmpackc.low %vm418_vm8, %vm414_vm7  ;;  %vm342_vm0 = vcmp.eq.s32.totalorder %v3411_v9, %v3408_v8  ;;  %vm346_vm1 = vcmp.eq.s32.totalorder %v3414_v10, %v3408_v8  ;;  %vm406_vm3 = vcmp.eq.s32.totalorder %v3417_v11, %v3408_v8  ;;  %vm410_vm5 = vcmp.eq.s32.totalorder %v3420_v12, %v3408_v8  ;;  %p3190_p5 = pnand %p3189_p4, %p3331_p9 }
  0x35   : > { %2698 = vmatpush.bf16.msk.msra.mxu3 %vm3485_vm15, %v5953_v14  ;;  %vm3499_vm2 = vmpackc.low %vm345_vm11, %vm341_vm10  ;;  %vm333_vm7 = vcmp.eq.s32.totalorder %v3454_v16, %v3405_v7  ;;  %vm337_vm8 = vcmp.eq.s32.totalorder %v3457_v17, %v3405_v7  ;;  %v3519_v24 = vadd.s32 64, %v3388_v1  ;;  %v3522_v25 = vadd.s32 72, %v3388_v1  ;;  %p3195_p10 = por %p3194_p8, %p3193_p7 }
  0x36   : > { %v6230_v22 = vsel %vm3499_vm2, 4294967295, %v6229_v22  ;;  %2652 = vmatpush.bf16.msk.msra.mxu0 %vm3499_vm2, %v5953_v14  ;;  %vm3510_vm6 = vmpackc.low %vm409_vm14, %vm405_vm13  ;;  %vm401_vm13 = vcmp.eq.s32.totalorder %v3474_v20, %v3405_v7  ;;  %v3536_v27 = vadd.s32 192, %v3388_v1  ;;  %v3539_v28 = vadd.s32 200, %v3388_v1  ;;  %p3191_p6 = pneg %p3190_p5 }
  0x37   : > { %v6232_v23 = vsel %vm3510_vm6, 4294967295, %v6231_v23  ;;  %2668 = vmatpush.bf16.msk.msra.mxu1 %vm3510_vm6, %v5953_v14  ;;  %vm3527_vm10 = vmpackc.low %vm346_vm1, %vm342_vm0  ;;  %vm338_vm1 = vcmp.eq.s32.totalorder %v3457_v17, %v3408_v8  ;;  %v3570_v31 = vadd.s32 48, %v3388_v1  ;;  %v3573_v32 = vadd.s32 56, %v3388_v1 }
  0x38   : > { %v6234_v26 = vsel %vm3527_vm10, 4294967295, %v6233_v26  ;;  %2684 = vmatpush.bf16.msk.msra.mxu2 %vm3527_vm10, %v5953_v14  ;;  %vm3547_vm14 = vmpackc.low %vm410_vm5, %vm406_vm3  ;;  %vm402_vm5 = vcmp.eq.s32.totalorder %v3474_v20, %v3408_v8  ;;  %vm329_vm0 = vcmp.eq.s32.totalorder %v3522_v25, %v3405_v7  ;;  %v3590_v34 = vadd.s32 176, %v3388_v1  ;;  %p3196_p13 = pnand %p3195_p10, %p3191_p6 }
  0x39   : > { %v6236_v29 = vsel %vm3547_vm14, 4294967295, %v6235_v29  ;;  %2700 = vmatpush.bf16.msk.msra.mxu3 %vm3547_vm14, %v5953_v14  ;;  %vm3561_vm11 = vmpackc.low %vm337_vm8, %vm333_vm7  ;;  %vm6240_vm7 = vcmp.eq.s32.totalorder %v3471_v19, %v3405_v7  ;;  %v3593_v35 = vadd.s32 184, %v3388_v1  ;;  %v3624_v38 = vadd.s32 32, %v3388_v1 }
  0x3a   : > { %v6238_v30 = vsel %vm3561_vm11, 4294967295, %v6237_v30  ;;  %2654 = vmatpush.bf16.msk.msra.mxu0 %vm3561_vm11, %v5953_v14  ;;  %vm3581_vm8 = vmpackc.low %vm401_vm13, %vm6240_vm7  ;;  %vm6244_vm13 = vcmp.eq.s32.totalorder %v3454_v16, %v3408_v8  ;;  %v3627_v39 = vadd.s32 40, %v3388_v1  ;;  %v3667_v44 = vadd.s32 160, %v3388_v1 }
  0x3b   : > { %6239 = vst [vmem:[#allocation11_spill] sm:$0xff] %v6238_v30  ;;  %v6242_v33 = vsel %vm3581_vm8, 4294967295, %v6241_v33  ;;  %2670 = vmatpush.bf16.msk.msra.mxu1 %vm3581_vm8, %v5953_v14  ;;  %vm3601_vm7 = vmpackc.low %vm338_vm1, %vm6244_vm13  ;;  %vm6247_vm8 = vcmp.eq.s32.totalorder %v3471_v19, %v3408_v8  ;;  %v3670_v45 = vadd.s32 168, %v3388_v1  ;;  %v6261_v48 = vmov 0 }
  0x3c   : > { %6243 = vst [vmem:[#allocation12_spill] sm:$0xff] %v6242_v33  ;;  %v6246_v36 = vsel %vm3601_vm7, 4294967295, %v6245_v36  ;;  %2686 = vmatpush.bf16.msk.msra.mxu2 %vm3601_vm7, %v5953_v14  ;;  %vm3615_vm6 = vmpackc.low %vm402_vm5, %vm6247_vm8  ;;  %vm6250_vm5 = vcmp.eq.s32.totalorder %v3519_v24, %v3405_v7  ;;  %v6266_v49 = vmov 0  ;;  %v3713_v50 = vadd.s32 16, %v3388_v1 }
  0x3d   : > { %v6249_v37 = vsel %vm3615_vm6, 4294967295, %v6248_v37  ;;  %2702 = vmatpush.bf16.msk.msra.mxu3 %vm3615_vm6, %v5953_v14  ;;  %vm3635_vm8 = vmpackc.low %vm329_vm0, %vm6250_vm5  ;;  %vm6254_vm0 = vcmp.eq.s32.totalorder %v3536_v27, %v3405_v7  ;;  %vm6255_vm5 = vcmp.eq.s32.totalorder %v3539_v28, %v3405_v7  ;;  %v3716_v51 = vadd.s32 24, %v3388_v1 }
  0x3e   : > { %v6252_v40 = vsel %vm3635_vm8, 4294967295, %v6251_v40  ;;  %2656 = vmatpush.bf16.msk.msra.mxu0 %vm3635_vm8, %v5953_v14  ;;  %vm3658_vm13 = vmpackc.low %vm6255_vm5, %vm6254_vm0  ;;  %vm6259_vm0 = vcmp.eq.s32.totalorder %v3519_v24, %v3408_v8  ;;  %vm6260_vm5 = vcmp.eq.s32.totalorder %v3522_v25, %v3408_v8  ;;  %v6271_v52 = vmov 0 }
  0x3f   : > { %6253 = vst [vmem:[#allocation13_spill] sm:$0xff] %v6252_v40  ;;  %v6257_v43 = vsel %vm3658_vm13, 4294967295, %v6256_v43  ;;  %2672 = vmatpush.bf16.msk.msra.mxu1 %vm3658_vm13, %v5953_v14  ;;  %vm3683_vm11 = vmpackc.low %vm6260_vm5, %vm6259_vm0  ;;  %vm6264_vm0 = vcmp.eq.s32.totalorder %v3536_v27, %v3408_v8  ;;  %vm6265_vm5 = vcmp.eq.s32.totalorder %v3539_v28, %v3408_v8  ;;  %v3735_v53 = vpack.c.bf16 %v225_v42, %v224_v41 }
  0x40   : > { %6258 = vst [vmem:[#allocation14_spill] sm:$0xff] %v6257_v43  ;;  %v6262_v48 = vsel %vm3683_vm11, 4294967295, %v6261_v48  ;;  %2688 = vmatpush.bf16.msk.msra.mxu2 %vm3683_vm11, %v5953_v14  ;;  %vm3704_vm3 = vmpackc.low %vm6265_vm5, %vm6264_vm0  ;;  %vm6269_vm0 = vcmp.eq.s32.totalorder %v3570_v31, %v3405_v7  ;;  %vm6270_vm5 = vcmp.eq.s32.totalorder %v3573_v32, %v3405_v7  ;;  %v3737_v54 = vpack.c.bf16 %v227_v47, %v226_v46 }
  0x41   : > { %6263 = vst [vmem:[#allocation15_spill] sm:$0xff] %v6262_v48  ;;  %v6267_v49 = vsel %vm3704_vm3, 4294967295, %v6266_v49  ;;  %2704 = vmatpush.bf16.msk.msra.mxu3 %vm3704_vm3, %v5953_v14  ;;  %vm3727_vm8 = vmpackc.low %vm6270_vm5, %vm6269_vm0  ;;  %vm6276_vm0 = vcmp.eq.s32.totalorder %v3590_v34, %v3405_v7  ;;  %vm6277_vm5 = vcmp.eq.s32.totalorder %v3593_v35, %v3405_v7  ;;  %v6278_v55 = vmov 0 }
  0x42   : > { %6268 = vst [vmem:[#allocation16_spill] sm:$0xff] %v6267_v49  ;;  %v6272_v52 = vsel %vm3727_vm8, 4294967295, %v6271_v52  ;;  %2658 = vmatpush.bf16.msk.msra.mxu0 %vm3727_vm8, %v5953_v14  ;;  %vm3748_vm3 = vmpackc.low %vm6277_vm5, %vm6276_vm0  ;;  %v3757_v56 = vadd.s32 144, %v3388_v1  ;;  %v3760_v57 = vadd.s32 152, %v3388_v1  ;;  %vm6281_vm0 = vcmp.eq.s32.totalorder %v3570_v31, %v3408_v8 }
  0x43   : > { %6273 = vst [vmem:[#allocation17_spill] sm:$0xff] %v6272_v52  ;;  %v6279_v55 = vsel %vm3748_vm3, 4294967295, %v6278_v55  ;;  %2674 = vmatpush.bf16.msk.msra.mxu1 %vm3748_vm3, %v5953_v14  ;;  %vm6282_vm5 = vcmp.eq.s32.totalorder %v3573_v32, %v3408_v8  ;;  %v6283_v58 = vmov 0  ;;  %v757_v59 = vunpack.c.l.bf16 %v3735_v53 }
  0x44   : > { %6274 = vst [vmem:[#allocation18_spill] sm:$0xff] %v3735_v53  ;;  %vm3771_vm1 = vmpackc.low %vm6282_vm5, %vm6281_vm0  ;;  %v758_v60 = vunpack.c.h.bf16 %v3735_v53  ;;  %v759_v61 = vunpack.c.l.bf16 %v3737_v54  ;;  %v760_v62 = vunpack.c.h.bf16 %v3737_v54  ;;  %vm6286_vm0 = vcmp.eq.s32.totalorder %v3590_v34, %v3408_v8 }
  0x45   : > { %6275 = vst [vmem:[#allocation19_spill] sm:$0xff] %v3737_v54  ;;  %v6284_v58 = vsel %vm3771_vm1, 4294967295, %v6283_v58  ;;  %2690 = vmatpush.bf16.msk.msra.mxu2 %vm3771_vm1, %v5953_v14  ;;  %vm6287_vm5 = vcmp.eq.s32.totalorder %v3593_v35, %v3408_v8  ;;  %v6288_v63 = vmov 0  ;;  %v6293_v0 = vmov 0 }
  0x46   : > { %6280 = vst [vmem:[#allocation20_spill] sm:$0xff] %v6279_v55  ;;  %vm3788_vm13 = vmpackc.low %vm6287_vm5, %vm6286_vm0  ;;  %vm6291_vm0 = vcmp.eq.s32.totalorder %v3624_v38, %v3405_v7  ;;  %vm6292_vm5 = vcmp.eq.s32.totalorder %v3627_v39, %v3405_v7  ;;  %v3813_v54 = vsub.f32 %v224_v41, %v757_v59  ;;  %v3815_v53 = vsub.f32 %v225_v42, %v758_v60 }
  0x47   : > { %6285 = vst [vmem:[#allocation21_spill] sm:$0xff] %v6284_v58  ;;  %v6289_v63 = vsel %vm3788_vm13, 4294967295, %v6288_v63  ;;  %2706 = vmatpush.bf16.msk.msra.mxu3 %vm3788_vm13, %v5953_v14  ;;  %vm3809_vm3 = vmpackc.low %vm6292_vm5, %vm6291_vm0  ;;  %v3817_v55 = vsub.f32 %v226_v46, %v759_v61  ;;  %v3819_v52 = vsub.f32 %v227_v47, %v760_v62  ;;  %v3825_v14 = vld [vmem:[%s3382_s8 + $0x28] sm:$0xff]  ;;  %v6300_v58 = vmov 1.0|1.0   ;;  %v3850_v46 = vld [vmem:[%s3382_s8 + $0x30] sm:$0xff] }
  0x48   : > { %6290 = vst [vmem:[#allocation22_spill] sm:$0xff] %v6289_v63  ;;  %v6294_v0 = vsel %vm3809_vm3, 4294967295, %v6293_v0  ;;  %v3822_v63 = vld [vmem:[%s3382_s8 + $0x20] sm:$0xff]  ;;  %2660 = vmatpush.bf16.msk.msra.mxu0 %vm3809_vm3, %v6300_v58  ;;  %vm6301_vm0 = vcmp.eq.s32.totalorder %v3667_v44, %v3405_v7  ;;  %vm6302_vm5 = vcmp.eq.s32.totalorder %v3670_v45, %v3405_v7  ;;  %v6303_v41 = vmov 0  ;;  %v3853_v47 = vld [vmem:[%s3382_s8 + $0x38] sm:$0xff] }
  0x49   : > { %6295 = vst [vmem:[#allocation23_spill] sm:$0xff] %v6294_v0  ;;  %vm3836_vm1 = vmpackc.low %vm6302_vm5, %vm6301_vm0  ;;  %v3847_v42 = vadd.s32 8, %v3388_v1  ;;  %vm6306_vm0 = vcmp.eq.s32.totalorder %v3624_v38, %v3408_v8  ;;  %vm6307_vm5 = vcmp.eq.s32.totalorder %v3627_v39, %v3408_v8  ;;  %v6308_v59 = vmov 0 }
  0x4a   : > { %6296 = vst [vmem:[#allocation24_spill] sm:$0xff] %v3813_v54  ;;  %v6304_v41 = vsel %vm3836_vm1, 4294967295, %v6303_v41  ;;  %2676 = vmatpush.bf16.msk.msra.mxu1 %vm3836_vm1, %v6300_v58  ;;  %vm3864_vm8 = vmpackc.low %vm6307_vm5, %vm6306_vm0  ;;  %v3869_v60 = vadd.s32 128, %v3388_v1  ;;  %v3872_v61 = vadd.s32 136, %v3388_v1  ;;  %v3876_v62 = vpack.c.bf16 %v3815_v53, %v3813_v54 }
  0x4b   : > { %6297 = vst [vmem:[#allocation25_spill] sm:$0xff] %v3815_v53  ;;  %v6309_v59 = vsel %vm3864_vm8, 4294967295, %v6308_v59  ;;  %2692 = vmatpush.bf16.msk.msra.mxu2 %vm3864_vm8, %v6300_v58  ;;  %vm6313_vm0 = vcmp.eq.s32.totalorder %v3667_v44, %v3408_v8  ;;  %vm6314_vm5 = vcmp.eq.s32.totalorder %v3670_v45, %v3408_v8  ;;  %v6315_v0 = vmov 0 }
  0x4c   : > { %6298 = vst [vmem:[#allocation26_spill] sm:$0xff] %v3817_v55  ;;  %vm3891_vm13 = vmpackc.low %vm6314_vm5, %vm6313_vm0  ;;  %vm6319_vm0 = vcmp.eq.s32.totalorder %v3713_v50, %v3405_v7  ;;  %vm6320_vm5 = vcmp.eq.s32.totalorder %v3716_v51, %v3405_v7  ;;  %v6321_v53 = vmov 0  ;;  %v934_v43 = vunpack.c.h.b16 %v3876_v62 }
  0x4d   : > { %6299 = vst [vmem:[#allocation27_spill] sm:$0xff] %v3819_v52  ;;  %v6316_v0 = vsel %vm3891_vm13, 4294967295, %v6315_v0  ;;  %2708 = vmatpush.bf16.msk.msra.mxu3 %vm3891_vm13, %v6300_v58  ;;  %vm3914_vm11 = vmpackc.low %vm6320_vm5, %vm6319_vm0  ;;  %vm6325_vm0 = vcmp.eq.s32.totalorder %v3757_v56, %v3405_v7  ;;  %vm6326_vm5 = vcmp.eq.s32.totalorder %v3760_v57, %v3405_v7  ;;  %v6332_v49 = vmov 0 }
  0x4e   : > { %6305 = vst [vmem:[#allocation28_spill] sm:$0xff] %v6304_v41  ;;  %v3880_v41 = vpack.c.bf16 %v3819_v52, %v3817_v55  ;;  %v3903_v52 = vpack.c.bf16 %v3825_v14, %v3822_v63  ;;  %v6322_v53 = vsel %vm3914_vm11, 4294967295, %v6321_v53  ;;  %v933_v55 = vunpack.c.l.b16 %v3876_v62  ;;  %2662 = vmatpush.bf16.msk.msra.mxu0 %vm3914_vm11, %v6300_v58  ;;  %vm3935_vm1 = vmpackc.low %vm6326_vm5, %vm6325_vm0 }
  0x4f   : > { %6310 = vst [vmem:[#allocation29_spill] sm:$0xff] %v6309_v59  ;;  %v6327_v59 = vmov 0  ;;  %2678 = vmatpush.bf16.msk.msra.mxu1 %vm3935_vm1, %v6300_v58  ;;  %vm6330_vm0 = vcmp.eq.s32.totalorder %v3713_v50, %v3408_v8  ;;  %vm6331_vm5 = vcmp.eq.s32.totalorder %v3716_v51, %v3408_v8 }
  0x50   : > { %6311 = vst [vmem:[#allocation30_spill] sm:$0xff] %v3876_v62  ;;  %v935_v54 = vunpack.c.l.b16 %v3880_v41  ;;  %v6328_v59 = vsel %vm3935_vm1, 4294967295, %v6327_v59  ;;  %v936_v40 = vunpack.c.h.b16 %v3880_v41  ;;  %vm3955_vm11 = vmpackc.low %vm6331_vm5, %vm6330_vm0  ;;  %vm6335_vm0 = vcmp.eq.s32.totalorder %v3757_v56, %v3408_v8 }
  0x51   : > { %6312 = vst [vmem:[#allocation31_spill] sm:$0xff] %v3880_v41  ;;  %v6333_v49 = vsel %vm3955_vm11, 4294967295, %v6332_v49  ;;  %v3966_v41 = vperm.slane %v3402_v6, 2  ;;  %2694 = vmatpush.bf16.msk.msra.mxu2 %vm3955_vm11, %v6300_v58  ;;  %vm6336_vm5 = vcmp.eq.s32.totalorder %v3760_v57, %v3408_v8  ;;  %v6337_v62 = vmov 0 }
  0x52   : > { %6317 = vst [vmem:[#allocation32_spill] sm:$0xff] %v6316_v0  ;;  %v3924_v0 = vpack.c.bf16 %v3853_v47, %v3850_v46  ;;  %vm3977_vm3 = vmpackc.low %vm6336_vm5, %vm6335_vm0  ;;  %vm6340_vm0 = vcmp.eq.s32.totalorder %v3388_v1, %v3405_v7  ;;  %vm6341_vm5 = vcmp.eq.s32.totalorder %v3847_v42, %v3405_v7  ;;  %v762_v48 = vunpack.c.h.bf16 %v3903_v52 }
  0x53   : > { %6318 = vst [vmem:[#allocation33_spill] sm:$0xff] %v3903_v52  ;;  %v6338_v62 = vsel %vm3977_vm3, 4294967295, %v6337_v62  ;;  %2710 = vmatpush.bf16.msk.msra.mxu3 %vm3977_vm3, %v6300_v58  ;;  %vm3997_vm11 = vmpackc.low %vm6341_vm5, %vm6340_vm0  ;;  %vm6344_vm1 = vcmp.eq.s32.totalorder %v3869_v60, %v3405_v7  ;;  %vm6345_vm0 = vcmp.eq.s32.totalorder %v3872_v61, %v3405_v7  ;;  %v6350_v7 = vmov 0 }
  0x54   : > { %6323 = vst [vmem:[#allocation34_spill] sm:$0xff] %v6322_v53  ;;  %v3944_v53 = vperm.slane %v3402_v6, 3  ;;  %v761_v6 = vunpack.c.l.bf16 %v3903_v52  ;;  %v763_v33 = vunpack.c.l.bf16 %v3924_v0  ;;  %v764_v30 = vunpack.c.h.bf16 %v3924_v0  ;;  %2664 = vmatpush.bf16.msk.msra.mxu0 %vm3997_vm11, %v6300_v58  ;;  %vm4015_vm5 = vmpackc.low %vm6345_vm0, %vm6344_vm1 }
  0x55   : > { %6324 = vst [vmem:[#allocation35_spill] sm:$0xff] %v3924_v0  ;;  %2680 = vmatpush.bf16.msk.msra.mxu1 %vm4015_vm5, %v6300_v58  ;;  %vm6349_vm1 = vcmp.eq.s32.totalorder %v3847_v42, %v3408_v8  ;;  %vm347_vm6 = vcmp.eq.s32.totalorder %v3414_v10, %v3966_v41 }
  0x56   : > { %6329 = vst [vmem:[#allocation36_spill] sm:$0xff] %v6328_v59  ;;  %v6342_v59 = vmov 0  ;;  %vm356_vm8 = vcmp.eq.s32.totalorder %v3394_v3, %v3944_v53  ;;  %vm340_vm7 = vcmp.eq.s32.totalorder %v3457_v17, %v3944_v53 }
  0x57   : > { %6334 = vst [vmem:[#allocation37_spill] sm:$0xff] %v6333_v49  ;;  %v6343_v59 = vsel %vm3997_vm11, 4294967295, %v6342_v59  ;;  %v4001_v49 = vpack.c.b16 %v935_v54, %v933_v55  ;;  %v4019_v54 = vpack.c.b16 %v936_v40, %v934_v43  ;;  %vm6348_vm11 = vcmp.eq.s32.totalorder %v3388_v1, %v3408_v8 }
  0x58   : > { %6339 = vst [vmem:[#allocation38_spill] sm:$0xff] %v6338_v62  ;;  %v6346_v62 = vmov 0  ;;  %vm4034_vm0 = vmpackc.low %vm6349_vm1, %vm6348_vm11  ;;  %vm6353_vm11 = vcmp.eq.s32.totalorder %v3872_v61, %v3408_v8  ;;  %v6354_v40 = vmov 0  ;;  %v4064_v43 = vsub.f32 %v3822_v63, %v761_v6 }
  0x59   : > { %v6347_v62 = vsel %vm4015_vm5, 4294967295, %v6346_v62  ;;  %v6351_v7 = vsel %vm4034_vm0, 4294967295, %v6350_v7  ;;  %2696 = vmatpush.bf16.msk.msra.mxu2 %vm4034_vm0, %v6300_v58  ;;  %vm6352_vm5 = vcmp.eq.s32.totalorder %v3869_v60, %v3408_v8  ;;  %1005 = vmatmul.bf16.vlgmr.msra.gmra.mxu0 %v4001_v49  ;;  %v6358_v8 = vmov 0 }
  0x5a   : > { %vm4053_vm1 = vmpackc.low %vm6353_vm11, %vm6352_vm5  ;;  %6356 = vst [vmem:[#allocation39_spill] sm:$0xff] %v4064_v43  ;;  %vm6357_vm5 = vcmp.eq.s32.totalorder %v3391_v2, %v3944_v53  ;;  %v4078_v55 = vsub.f32 %v3825_v14, %v762_v48  ;;  %v4081_v63 = vsub.f32 %v3850_v46, %v763_v33  ;;  %v4084_v6 = vsub.f32 %v3853_v47, %v764_v30  ;;  %v232_v33 = vld [vmem:[%s3382_s8 + $0x40] sm:$0xff]  ;;  %v233_v48 = vld [vmem:[%s3382_s8 + $0x48] sm:$0xff] }
  0x5b   : > { %v6355_v40 = vsel %vm4053_vm1, 4294967295, %v6354_v40  ;;  %2712 = vmatpush.bf16.msk.msra.mxu3 %vm4053_vm1, %v6300_v58  ;;  %vm4073_vm11 = vmpackc.low %vm356_vm8, %vm6357_vm5  ;;  %1054 = vmatmul.bf16.vlgmr.msra.gmra.mxu1 %v4019_v54  ;;  %vm6364_vm8 = vcmp.eq.s32.totalorder %v3397_v4, %v3944_v53  ;;  %vm6365_vm5 = vcmp.eq.s32.totalorder %v3400_v5, %v3944_v53  ;;  %v6366_v14 = vmov 0  ;;  %v235_v46 = vld [vmem:[%s3382_s8 + $0x58] sm:$0xff]  ;;  %v6631_v21 = vld [vmem:[#allocation33_spill] sm:$0xff] }
  0x5c   : > { %v6359_v8 = vsel %vm4073_vm11, 4294967295, %v6358_v8  ;;  %6361 = vst [vmem:[#allocation41_spill] sm:$0xff] %v4078_v55  ;;  %vm4096_vm13 = vmpackc.low %vm6365_vm5, %vm6364_vm8  ;;  %1103 = vmatmul.bf16.vlgmr.msra.gmra.mxu2 %v4001_v49  ;;  %vm6370_vm8 = vcmp.eq.s32.totalorder %v3394_v3, %v3966_v41  ;;  %v6371_v30 = vmov 0  ;;  %v234_v3 = vld [vmem:[%s3382_s8 + $0x50] sm:$0xff]  ;;  %v6383_v47 = vmov 0 }
  0x5d   : > { %6360 = vst [vmem:[#allocation40_spill] sm:$0xff] %v6359_v8  ;;  %2746 = vmatpush.bf16.msk.msrb.mxu2 %vm4073_vm11, %v6300_v58  ;;  %v6367_v14 = vsel %vm4096_vm13, 4294967295, %v6366_v14  ;;  %vm6369_vm11 = vcmp.eq.s32.totalorder %v3391_v2, %v3966_v41  ;;  %v6376_v2 = vmov 0  ;;  %vm6386_vm1 = vcmp.eq.s32.totalorder %v3417_v11, %v3944_v53 }
  0x5e   : > { %6362 = vst [vmem:[#allocation42_spill] sm:$0xff] %v4081_v63  ;;  %vm4114_vm5 = vmpackc.low %vm6370_vm8, %vm6369_vm11  ;;  %1152 = vmatmul.bf16.vlgmr.msra.gmra.mxu3 %v4019_v54  ;;  %vm6374_vm11 = vcmp.eq.s32.totalorder %v3397_v4, %v3966_v41  ;;  %vm6375_vm8 = vcmp.eq.s32.totalorder %v3400_v5, %v3966_v41  ;;  %v4149_v4 = vpack.c.bf16 %v4078_v55, %v4064_v43  ;;  %v6400_v43 = vmov 0 }
  0x5f   : > { %6363 = vst [vmem:[#allocation43_spill] sm:$0xff] %v4084_v6  ;;  %2762 = vmatpush.bf16.msk.msrb.mxu3 %vm4096_vm13, %v6300_v58  ;;  %v6372_v30 = vsel %vm4114_vm5, 4294967295, %v6371_v30  ;;  %2714 = vmatpush.bf16.msk.msrb.mxu0 %vm4114_vm5, %v6300_v58  ;;  %vm4134_vm13 = vmpackc.low %vm6375_vm8, %vm6374_vm11  ;;  %v4153_v5 = vpack.c.bf16 %v4084_v6, %v4081_v63  ;;  %vm6381_vm11 = vcmp.eq.s32.totalorder %v3411_v9, %v3944_v53 }
  0x60   : > { %6368 = vst [vmem:[#allocation44_spill] sm:$0xff] %v6367_v14  ;;  %v6377_v2 = vsel %vm4134_vm13, 4294967295, %v6376_v2  ;;  %2730 = vmatpush.bf16.msk.msrb.mxu1 %vm4134_vm13, %v6300_v58  ;;  %vm6382_vm8 = vcmp.eq.s32.totalorder %v3414_v10, %v3944_v53  ;;  %vm407_vm13 = vcmp.eq.s32.totalorder %v3417_v11, %v3966_v41  ;;  %vm411_vm5 = vcmp.eq.s32.totalorder %v3420_v12, %v3966_v41 }
  0x61   : > { %6373 = vst [vmem:[#allocation45_spill] sm:$0xff] %v6372_v30  ;;  %vm4161_vm3 = vmpackc.low %vm6382_vm8, %vm6381_vm11  ;;  %vm6387_vm0 = vcmp.eq.s32.totalorder %v3420_v12, %v3944_v53  ;;  %v6388_v10 = vmov 0  ;;  %v6392_v11 = vmov 0  ;;  %v4196_v12 = vpack.c.bf16 %v233_v48, %v232_v33 }
  0x62   : > { %6378 = vst [vmem:[#allocation46_spill] sm:$0xff] %v6377_v2  ;;  %v6384_v47 = vsel %vm4161_vm3, 4294967295, %v6383_v47  ;;  %2748 = vmatpush.bf16.msk.msrb.mxu2 %vm4161_vm3, %v6300_v58  ;;  %vm4178_vm11 = vmpackc.low %vm6387_vm0, %vm6386_vm1  ;;  %vm6391_vm3 = vcmp.eq.s32.totalorder %v3411_v9, %v3966_v41  ;;  %v4198_v6 = vpack.c.bf16 %v235_v46, %v234_v3  ;;  %vm400_vm0 = vcmp.eq.s32.totalorder %v3471_v19, %v3944_v53 }
  0x63   : > { %6379 = vst [vmem:[#allocation47_spill] sm:$0xff] %v4149_v4  ;;  %v6389_v10 = vsel %vm4178_vm11, 4294967295, %v6388_v10  ;;  %2764 = vmatpush.bf16.msk.msrb.mxu3 %vm4178_vm11, %v6300_v58  ;;  %vm4192_vm2 = vmpackc.low %vm347_vm6, %vm6391_vm3  ;;  %vm404_vm1 = vcmp.eq.s32.totalorder %v3474_v20, %v3944_v53  ;;  %v6396_v9 = vmov 0  ;;  %v937_v55 = vunpack.c.l.b16 %v4149_v4 }
  0x64   : > { %6380 = vst [vmem:[#allocation48_spill] sm:$0xff] %v4153_v5  ;;  %v6393_v11 = vsel %vm4192_vm2, 4294967295, %v6392_v11  ;;  %2716 = vmatpush.bf16.msk.msrb.mxu0 %vm4192_vm2, %v6300_v58  ;;  %vm4207_vm8 = vmpackc.low %vm411_vm5, %vm407_vm13  ;;  %v939_v63 = vunpack.c.l.b16 %v4153_v5  ;;  %vm6399_vm13 = vcmp.eq.s32.totalorder %v3454_v16, %v3944_v53  ;;  %vm399_vm6 = vcmp.eq.s32.totalorder %v3471_v19, %v3966_v41 }
  0x65   : > { %6385 = vst [vmem:[#allocation49_spill] sm:$0xff] %v6384_v47  ;;  %v6397_v9 = vsel %vm4207_vm8, 4294967295, %v6396_v9  ;;  %2732 = vmatpush.bf16.msk.msrb.mxu1 %vm4207_vm8, %v6300_v58  ;;  %vm4223_vm5 = vmpackc.low %vm340_vm7, %vm6399_vm13  ;;  %vm403_vm3 = vcmp.eq.s32.totalorder %v3474_v20, %v3966_v41  ;;  %v938_v0 = vunpack.c.h.b16 %v4149_v4  ;;  %v940_v52 = vunpack.c.h.b16 %v4153_v5 }
  0x66   : > { %6390 = vst [vmem:[#allocation50_spill] sm:$0xff] %v6389_v10  ;;  %v6401_v43 = vsel %vm4223_vm5, 4294967295, %v6400_v43  ;;  %2750 = vmatpush.bf16.msk.msrb.mxu2 %vm4223_vm5, %v6300_v58  ;;  %vm4239_vm7 = vmpackc.low %vm404_vm1, %vm400_vm0  ;;  %v6403_v10 = vmov 0  ;;  %v765_v47 = vunpack.c.l.bf16 %v4196_v12  ;;  %v767_v20 = vunpack.c.l.bf16 %v4198_v6 }
  0x67   : > { %6394 = vst [vmem:[#allocation51_spill] sm:$0xff] %v4196_v12  ;;  %v6404_v10 = vsel %vm4239_vm7, 4294967295, %v6403_v10  ;;  %v768_v4 = vunpack.c.h.bf16 %v4198_v6  ;;  %2766 = vmatpush.bf16.msk.msrb.mxu3 %vm4239_vm7, %v6300_v58  ;;  %vm6406_vm13 = vcmp.eq.s32.totalorder %v3454_v16, %v3966_v41  ;;  %vm6407_vm0 = vcmp.eq.s32.totalorder %v3457_v17, %v3966_v41  ;;  %vm4263_vm5 = vmpackc.low %vm403_vm3, %vm399_vm6 }
  0x68   : > { %6395 = vst [vmem:[#allocation52_spill] sm:$0xff] %v4198_v6  ;;  %vm4256_vm1 = vmpackc.low %vm6407_vm0, %vm6406_vm13  ;;  %v6408_v19 = vmov 0  ;;  %v6411_v5 = vmov 0  ;;  %v4267_v6 = vpack.c.b16 %v939_v63, %v937_v55  ;;  %v4272_v16 = vpack.c.b16 %v940_v52, %v938_v0  ;;  %v236_v0 = vld [vmem:[%s3382_s8 + $0x60] sm:$0xff]  ;;  %v237_v63 = vld [vmem:[%s3382_s8 + $0x68] sm:$0xff] }
  0x69   : > { %6398 = vst [vmem:[#allocation53_spill] sm:$0xff] %v6397_v9  ;;  %v766_v9 = vunpack.c.h.bf16 %v4196_v12  ;;  %v6409_v19 = vsel %vm4256_vm1, 4294967295, %v6408_v19  ;;  %2718 = vmatpush.bf16.msk.msrb.mxu0 %vm4256_vm1, %v6300_v58  ;;  %v6412_v5 = vsel %vm4263_vm5, 4294967295, %v6411_v5  ;;  %2734 = vmatpush.bf16.msk.msrb.mxu1 %vm4263_vm5, %v6300_v58  ;;  %v4274_v17 = vsub.f32 %v232_v33, %v765_v47  ;;  %v238_v33 = vld [vmem:[%s3382_s8 + $0x70] sm:$0xff] }
  0x6a   : > { %6402 = vst [vmem:[#allocation54_spill] sm:$0xff] %v6401_v43  ;;  %v4280_v43 = vsub.f32 %v235_v46, %v768_v4  ;;  %1010 = vmatmul.bf16.gmra.mxu0 %v4267_v6  ;;  %vm328_vm6 = vcmp.eq.s32.totalorder %v3519_v24, %v3944_v53  ;;  %vm332_vm3 = vcmp.eq.s32.totalorder %v3522_v25, %v3944_v53  ;;  %v6425_v46 = vmov 0 }
  0x6b   : > { %6405 = vst [vmem:[#allocation55_spill] sm:$0xff] %v6404_v10  ;;  %v4276_v12 = vsub.f32 %v233_v48, %v766_v9  ;;  %v4278_v10 = vsub.f32 %v234_v3, %v767_v20  ;;  %1059 = vmatmul.bf16.gmra.mxu1 %v4272_v16  ;;  %v239_v48 = vld [vmem:[%s3382_s8 + $0x78] sm:$0xff]  ;;  %vm392_vm13 = vcmp.eq.s32.totalorder %v3536_v27, %v3944_v53  ;;  %vm4306_vm7 = vmpackc.low %vm332_vm3, %vm328_vm6  ;;  %v6422_v3 = vmov 0 }
  0x6c   : > { %6410 = vst [vmem:[#allocation56_spill] sm:$0xff] %v6409_v19  ;;  %1108 = vmatmul.bf16.gmra.mxu2 %v4267_v6  ;;  %vm396_vm0 = vcmp.eq.s32.totalorder %v3539_v28, %v3944_v53  ;;  %v6423_v3 = vsel %vm4306_vm7, 4294967295, %v6422_v3  ;;  %vm327_vm5 = vcmp.eq.s32.totalorder %v3519_v24, %v3966_v41  ;;  %vm331_vm1 = vcmp.eq.s32.totalorder %v3522_v25, %v3966_v41 }
  0x6d   : > { %6413 = vst [vmem:[#allocation57_spill] sm:$0xff] %v6412_v5  ;;  %v4287_v55 = vpack.c.bf16 %v4276_v12, %v4274_v17  ;;  %v4291_v52 = vpack.c.bf16 %v4280_v43, %v4278_v10  ;;  %vm391_vm11 = vcmp.eq.s32.totalorder %v3536_v27, %v3966_v41  ;;  %vm395_vm8 = vcmp.eq.s32.totalorder %v3539_v28, %v3966_v41  ;;  %vm4321_vm6 = vmpackc.low %vm396_vm0, %vm392_vm13 }
  0x6e   : > { %6414 = vst [vmem:[#allocation58_spill] sm:$0xff] %v4267_v6  ;;  %1157 = vmatmul.bf16.gmra.mxu3 %v4272_v16  ;;  %2752 = vmatpush.bf16.msk.msrb.mxu2 %vm4306_vm7, %v6300_v58  ;;  %v6426_v46 = vsel %vm4321_vm6, 4294967295, %v6425_v46  ;;  %v4325_v4 = vpack.c.bf16 %v237_v63, %v236_v0  ;;  %v4327_v24 = vpack.c.bf16 %v239_v48, %v238_v33  ;;  %vm4332_vm3 = vmpackc.low %vm331_vm1, %vm327_vm5  ;;  %v6430_v25 = vmov 0 }
  0x6f   : > { %6415 = vst [vmem:[#allocation59_spill] sm:$0xff] %v4272_v16  ;;  %2768 = vmatpush.bf16.msk.msrb.mxu3 %vm4321_vm6, %v6300_v58  ;;  %v6431_v25 = vsel %vm4332_vm3, 4294967295, %v6430_v25  ;;  %2720 = vmatpush.bf16.msk.msrb.mxu0 %vm4332_vm3, %v6300_v58  ;;  %vm4339_vm13 = vmpackc.low %vm395_vm8, %vm391_vm11  ;;  %v6433_v27 = vmov 0  ;;  %v941_v28 = vunpack.c.l.b16 %v4287_v55  ;;  %v943_v47 = vunpack.c.l.b16 %v4291_v52 }
  0x70   : > { %6416 = vst [vmem:[#allocation60_spill] sm:$0xff] %v4274_v17  ;;  %v6434_v27 = vsel %vm4339_vm13, 4294967295, %v6433_v27  ;;  %2736 = vmatpush.bf16.msk.msrb.mxu1 %vm4339_vm13, %v6300_v58  ;;  %v942_v9 = vunpack.c.h.b16 %v4287_v55  ;;  %v944_v20 = vunpack.c.h.b16 %v4291_v52  ;;  %v772_v17 = vunpack.c.h.bf16 %v4327_v24 }
  0x71   : > { %6417 = vst [vmem:[#allocation61_spill] sm:$0xff] %v4276_v12  ;;  %v770_v12 = vunpack.c.h.bf16 %v4325_v4  ;;  %v4354_v16 = vpack.c.b16 %v943_v47, %v941_v28  ;;  %vm320_vm11 = vcmp.eq.s32.totalorder %v3570_v31, %v3944_v53  ;;  %vm324_vm8 = vcmp.eq.s32.totalorder %v3573_v32, %v3944_v53 }
  0x72   : > { %6418 = vst [vmem:[#allocation62_spill] sm:$0xff] %v4278_v10  ;;  %v771_v10 = vunpack.c.l.bf16 %v4327_v24  ;;  %vm384_vm5 = vcmp.eq.s32.totalorder %v3590_v34, %v3944_v53  ;;  %vm388_vm1 = vcmp.eq.s32.totalorder %v3593_v35, %v3944_v53  ;;  %vm4390_vm0 = vmpackc.low %vm324_vm8, %vm320_vm11  ;;  %vm319_vm6 = vcmp.eq.s32.totalorder %v3570_v31, %v3966_v41 }
  0x73   : > { %6419 = vst [vmem:[#allocation63_spill] sm:$0xff] %v4280_v43  ;;  %v769_v43 = vunpack.c.l.bf16 %v4325_v4  ;;  %vm323_vm7 = vcmp.eq.s32.totalorder %v3573_v32, %v3966_v41  ;;  %vm383_vm13 = vcmp.eq.s32.totalorder %v3590_v34, %v3966_v41  ;;  %vm387_vm3 = vcmp.eq.s32.totalorder %v3593_v35, %v3966_v41  ;;  %2754 = vmatpush.bf16.msk.msrb.mxu2 %vm4390_vm0, %v6300_v58  ;;  %vm4405_vm11 = vmpackc.low %vm388_vm1, %vm384_vm5 }
  0x74   : > { %6420 = vst [vmem:[#allocation64_spill] sm:$0xff] %v4287_v55  ;;  %v4360_v55 = vsub.f32 %v237_v63, %v770_v12  ;;  %v240_v12 = vld [vmem:[%s3382_s8 + $0x80] sm:$0xff]  ;;  %v6443_v63 = vmov 0  ;;  %2770 = vmatpush.bf16.msk.msrb.mxu3 %vm4405_vm11, %v6300_v58  ;;  %vm4416_vm8 = vmpackc.low %vm323_vm7, %vm319_vm6  ;;  %v6449_v32 = vmov 0  ;;  %v6451_v34 = vmov 0 }
  0x75   : > { %6421 = vst [vmem:[#allocation65_spill] sm:$0xff] %v4291_v52  ;;  %v4358_v6 = vsub.f32 %v236_v0, %v769_v43  ;;  %v4362_v52 = vsub.f32 %v238_v33, %v771_v10  ;;  %v241_v10 = vld [vmem:[%s3382_s8 + $0x88] sm:$0xff]  ;;  %v243_v0 = vld [vmem:[%s3382_s8 + $0x98] sm:$0xff]  ;;  %v6444_v63 = vsel %vm4390_vm0, 4294967295, %v6443_v63  ;;  %v6445_v33 = vmov 0  ;;  %2722 = vmatpush.bf16.msk.msrb.mxu0 %vm4416_vm8, %v6300_v58  ;;  %vm4423_vm5 = vmpackc.low %vm387_vm3, %vm383_vm13 }
  0x76   : > { %6424 = vst [vmem:[#allocation66_spill] sm:$0xff] %v6423_v3  ;;  %v4364_v3 = vsub.f32 %v239_v48, %v772_v17  ;;  %v242_v17 = vld [vmem:[%s3382_s8 + $0x90] sm:$0xff]  ;;  %v6446_v33 = vsel %vm4405_vm11, 4294967295, %v6445_v33  ;;  %v4409_v48 = vpack.c.bf16 %v241_v10, %v240_v12  ;;  %v6450_v32 = vsel %vm4416_vm8, 4294967295, %v6449_v32  ;;  %2738 = vmatpush.bf16.msk.msrb.mxu1 %vm4423_vm5, %v6300_v58 }
  0x77   : > { %6427 = vst [vmem:[#allocation67_spill] sm:$0xff] %v6426_v46  ;;  %v4356_v46 = vpack.c.b16 %v944_v20, %v942_v9  ;;  %v4371_v28 = vpack.c.bf16 %v4360_v55, %v4358_v6  ;;  %v4411_v31 = vpack.c.bf16 %v243_v0, %v242_v17  ;;  %v6452_v34 = vsel %vm4423_vm5, 4294967295, %v6451_v34 }
  0x78   : > { %6428 = vst [vmem:[#allocation68_spill] sm:$0xff] %v4325_v4  ;;  %v4375_v43 = vpack.c.bf16 %v4364_v3, %v4362_v52  ;;  %vm312_vm7 = vcmp.eq.s32.totalorder %v3624_v38, %v3944_v53  ;;  %vm316_vm6 = vcmp.eq.s32.totalorder %v3627_v39, %v3944_v53  ;;  %vm376_vm3 = vcmp.eq.s32.totalorder %v3667_v44, %v3944_v53 }
  0x79   : > { %6429 = vst [vmem:[#allocation69_spill] sm:$0xff] %v4327_v24  ;;  %v945_v35 = vunpack.c.l.b16 %v4371_v28  ;;  %v946_v9 = vunpack.c.h.b16 %v4371_v28  ;;  %vm380_vm13 = vcmp.eq.s32.totalorder %v3670_v45, %v3944_v53  ;;  %vm4474_vm1 = vmpackc.low %vm316_vm6, %vm312_vm7  ;;  %vm311_vm11 = vcmp.eq.s32.totalorder %v3624_v38, %v3966_v41 }
  0x7a   : > { %6432 = vst [vmem:[#allocation70_spill] sm:$0xff] %v6431_v25  ;;  %1015 = vmatmul.bf16.gmra.mxu0 %v4354_v16  ;;  %v947_v47 = vunpack.c.l.b16 %v4375_v43  ;;  %v948_v20 = vunpack.c.h.b16 %v4375_v43  ;;  %vm315_vm0 = vcmp.eq.s32.totalorder %v3627_v39, %v3966_v41  ;;  %vm375_vm5 = vcmp.eq.s32.totalorder %v3667_v44, %v3966_v41  ;;  %2756 = vmatpush.bf16.msk.msrb.mxu2 %vm4474_vm1, %v6300_v58  ;;  %vm4489_vm7 = vmpackc.low %vm380_vm13, %vm376_vm3 }
  0x7b   : > { %6435 = vst [vmem:[#allocation71_spill] sm:$0xff] %v4354_v16  ;;  %1064 = vmatmul.bf16.gmra.mxu1 %v4356_v46  ;;  %vm379_vm8 = vcmp.eq.s32.totalorder %v3670_v45, %v3966_v41  ;;  %2772 = vmatpush.bf16.msk.msrb.mxu3 %vm4489_vm7, %v6300_v58  ;;  %vm4500_vm6 = vmpackc.low %vm315_vm0, %vm311_vm11  ;;  %v6469_v39 = vmov 0  ;;  %v6471_v44 = vmov 0  ;;  %vm304_vm0 = vcmp.eq.s32.totalorder %v3713_v50, %v3944_v53 }
  0x7c   : > { %6436 = vst [vmem:[#allocation72_spill] sm:$0xff] %v4356_v46  ;;  %1113 = vmatmul.bf16.gmra.mxu2 %v4354_v16  ;;  %v4438_v24 = vpack.c.b16 %v947_v47, %v945_v35  ;;  %v4440_v4 = vpack.c.b16 %v948_v20, %v946_v9  ;;  %v6470_v39 = vsel %vm4500_vm6, 4294967295, %v6469_v39  ;;  %2724 = vmatpush.bf16.msk.msrb.mxu0 %vm4500_vm6, %v6300_v58  ;;  %vm4507_vm3 = vmpackc.low %vm379_vm8, %vm375_vm5 }
  0x7d   : > { %6437 = vst [vmem:[#allocation73_spill] sm:$0xff] %v4358_v6  ;;  %v776_v6 = vunpack.c.h.bf16 %v4411_v31  ;;  %v6472_v44 = vsel %vm4507_vm3, 4294967295, %v6471_v44  ;;  %2740 = vmatpush.bf16.msk.msrb.mxu1 %vm4507_vm3, %v6300_v58  ;;  %vm308_vm11 = vcmp.eq.s32.totalorder %v3716_v51, %v3944_v53  ;;  %vm368_vm8 = vcmp.eq.s32.totalorder %v3757_v56, %v3944_v53 }
  0x7e   : > { %6438 = vst [vmem:[#allocation74_spill] sm:$0xff] %v4360_v55  ;;  %1162 = vmatmul.bf16.gmra.mxu3 %v4356_v46  ;;  %v774_v55 = vunpack.c.h.bf16 %v4409_v48  ;;  %vm372_vm5 = vcmp.eq.s32.totalorder %v3760_v57, %v3944_v53  ;;  %vm4558_vm13 = vmpackc.low %vm308_vm11, %vm304_vm0  ;;  %vm367_vm3 = vcmp.eq.s32.totalorder %v3757_v56, %v3966_v41  ;;  %vm371_vm6 = vcmp.eq.s32.totalorder %v3760_v57, %v3966_v41 }
  0x7f   : > { %6439 = vst [vmem:[#allocation75_spill] sm:$0xff] %v4362_v52  ;;  %v775_v52 = vunpack.c.l.bf16 %v4411_v31  ;;  %v4448_v16 = vsub.f32 %v243_v0, %v776_v6  ;;  %v246_v6 = vld [vmem:[%s3382_s8 + $0xb0] sm:$0xff]  ;;  %2758 = vmatpush.bf16.msk.msrb.mxu2 %vm4558_vm13, %v6300_v58  ;;  %vm4573_vm0 = vmpackc.low %vm372_vm5, %vm368_vm8  ;;  %v6493_v56 = vmov 0 }
  0x80   : > { %6440 = vst [vmem:[#allocation76_spill] sm:$0xff] %v4364_v3  ;;  %v773_v3 = vunpack.c.l.bf16 %v4409_v48  ;;  %2774 = vmatpush.bf16.msk.msrb.mxu3 %vm4573_vm0, %v6300_v58  ;;  %vm4591_vm8 = vmpackc.low %vm371_vm6, %vm367_vm3  ;;  %vm360_vm6 = vcmp.eq.s32.totalorder %v3869_v60, %v3944_v53  ;;  %vm364_vm3 = vcmp.eq.s32.totalorder %v3872_v61, %v3944_v53 }
  0x81   : > { %6441 = vst [vmem:[#allocation77_spill] sm:$0xff] %v4371_v28  ;;  %v4444_v28 = vsub.f32 %v241_v10, %v774_v55  ;;  %v244_v55 = vld [vmem:[%s3382_s8 + $0xa0] sm:$0xff]  ;;  %v6461_v10 = vmov 0  ;;  %v6494_v56 = vsel %vm4591_vm8, 4294967295, %v6493_v56  ;;  %2742 = vmatpush.bf16.msk.msrb.mxu1 %vm4591_vm8, %v6300_v58  ;;  %vm359_vm8 = vcmp.eq.s32.totalorder %v3869_v60, %v3966_v41 }
  0x82   : > { %6442 = vst [vmem:[#allocation78_spill] sm:$0xff] %v4375_v43  ;;  %v4442_v46 = vsub.f32 %v240_v12, %v773_v3  ;;  %v4446_v43 = vsub.f32 %v242_v17, %v775_v52  ;;  %v245_v52 = vld [vmem:[%s3382_s8 + $0xa8] sm:$0xff]  ;;  %v247_v12 = vld [vmem:[%s3382_s8 + $0xb8] sm:$0xff]  ;;  %v6462_v10 = vsel %vm4474_vm1, 4294967295, %v6461_v10  ;;  %v6464_v17 = vmov 0 }
  0x83   : > { %6447 = vst [vmem:[#allocation79_spill] sm:$0xff] %v4409_v48  ;;  %v6465_v17 = vsel %vm4489_vm7, 4294967295, %v6464_v17  ;;  %v4493_v0 = vpack.c.bf16 %v245_v52, %v244_v55  ;;  %v4495_v38 = vpack.c.bf16 %v247_v12, %v246_v6  ;;  %vm303_vm7 = vcmp.eq.s32.totalorder %v3713_v50, %v3966_v41 }
  0x84   : > { %6448 = vst [vmem:[#allocation80_spill] sm:$0xff] %v4411_v31  ;;  %v4455_v35 = vpack.c.bf16 %v4444_v28, %v4442_v46  ;;  %v4459_v3 = vpack.c.bf16 %v4448_v16, %v4446_v43  ;;  %vm307_vm1 = vcmp.eq.s32.totalorder %v3716_v51, %v3966_v41  ;;  %v6490_v51 = vmov 0 }
  0x85   : > { %6453 = vst [vmem:[#allocation81_spill] sm:$0xff] %v4438_v24  ;;  %vm4584_vm11 = vmpackc.low %vm307_vm1, %vm303_vm7  ;;  %vm296_vm1 = vcmp.eq.s32.totalorder %v3388_v1, %v3944_v53  ;;  %vm300_vm7 = vcmp.eq.s32.totalorder %v3847_v42, %v3944_v53  ;;  %v255_v53 = vld [vmem:[%s3382_s8 + $0xf8] sm:$0xff]  ;;  %v6511_v60 = vmov 0 }
  0x86   : > { %6454 = vst [vmem:[#allocation82_spill] sm:$0xff] %v4440_v4  ;;  %v949_v45 = vunpack.c.l.b16 %v4455_v35  ;;  %v951_v47 = vunpack.c.l.b16 %v4459_v3  ;;  %v950_v9 = vunpack.c.h.b16 %v4455_v35  ;;  %v952_v20 = vunpack.c.h.b16 %v4459_v3  ;;  %2726 = vmatpush.bf16.msk.msrb.mxu0 %vm4584_vm11, %v6300_v58  ;;  %vm4640_vm5 = vmpackc.low %vm300_vm7, %vm296_vm1 }
  0x87   : > { %6455 = vst [vmem:[#allocation83_spill] sm:$0xff] %v4442_v46  ;;  %v780_v46 = vunpack.c.h.bf16 %v4495_v38  ;;  %v6491_v51 = vsel %vm4584_vm11, 4294967295, %v6490_v51  ;;  %vm363_vm11 = vcmp.eq.s32.totalorder %v3872_v61, %v3966_v41  ;;  %2760 = vmatpush.bf16.msk.msrb.mxu2 %vm4640_vm5, %v6300_v58  ;;  %vm4657_vm1 = vmpackc.low %vm364_vm3, %vm360_vm6 }
  0x88   : > { %6456 = vst [vmem:[#allocation84_spill] sm:$0xff] %v4444_v28  ;;  %v778_v28 = vunpack.c.h.bf16 %v4493_v0  ;;  %v4522_v31 = vpack.c.b16 %v951_v47, %v949_v45  ;;  %v4524_v48 = vpack.c.b16 %v952_v20, %v950_v9  ;;  %2776 = vmatpush.bf16.msk.msrb.mxu3 %vm4657_vm1, %v6300_v58  ;;  %vm4676_vm6 = vmpackc.low %vm363_vm11, %vm359_vm8  ;;  %vm6518_vm11 = vnez %v6246_v36 }
  0x89   : > { %6457 = vst [vmem:[#allocation85_spill] sm:$0xff] %v4446_v43  ;;  %v779_v43 = vunpack.c.l.bf16 %v4495_v38  ;;  %v6512_v60 = vsel %vm4676_vm6, 4294967295, %v6511_v60  ;;  %2744 = vmatpush.bf16.msk.msrb.mxu1 %vm4676_vm6, %v6300_v58  ;;  %vm6519_vm8 = vnez %v6249_v37 }
  0x8a   : > { %6458 = vst [vmem:[#allocation86_spill] sm:$0xff] %v4448_v16  ;;  %1020 = vmatmul.bf16.gmra.mxu0 %v4438_v24  ;;  %v777_v16 = vunpack.c.l.bf16 %v4493_v0 }
  0x8b   : > { %1069 = vmatmul.bf16.gmra.mxu1 %v4440_v4  ;;  %6459 = vst [vmem:[#allocation87_spill] sm:$0xff] %v4455_v35  ;;  %v4528_v35 = vsub.f32 %v245_v52, %v778_v28  ;;  %v248_v28 = vld [vmem:[%s3382_s8 + $0xc0] sm:$0xff]  ;;  %v6482_v52 = vmov 0  ;;  %2810 = vmatpush.bf16.msk.msra.mxu2 %vm3462_vm12, %v6300_v58 }
  0x8c   : > { %1118 = vmatmul.bf16.gmra.mxu2 %v4438_v24  ;;  %6460 = vst [vmem:[#allocation88_spill] sm:$0xff] %v4459_v3  ;;  %v4530_v3 = vsub.f32 %v246_v6, %v779_v43  ;;  %v4532_v24 = vsub.f32 %v247_v12, %v780_v46  ;;  %v249_v43 = vld [vmem:[%s3382_s8 + $0xc8] sm:$0xff]  ;;  %v250_v46 = vld [vmem:[%s3382_s8 + $0xd0] sm:$0xff]  ;;  %v6483_v52 = vsel %vm4558_vm13, 4294967295, %v6482_v52  ;;  %v6485_v6 = vmov 0  ;;  %2826 = vmatpush.bf16.msk.msra.mxu3 %vm3485_vm15, %v6300_v58 }
  0x8d   : > { %6463 = vst [vmem:[#allocation89_spill] sm:$0xff] %v6462_v10  ;;  %v6486_v6 = vsel %vm4573_vm0, 4294967295, %v6485_v6  ;;  %v4577_v12 = vpack.c.bf16 %v249_v43, %v248_v28  ;;  %vm295_vm0 = vcmp.eq.s32.totalorder %v3388_v1, %v3966_v41  ;;  %vm299_vm13 = vcmp.eq.s32.totalorder %v3847_v42, %v3966_v41  ;;  %2794 = vmatpush.bf16.msk.msra.mxu1 %vm3445_vm9, %v6300_v58 }
  0x8e   : > { %1167 = vmatmul.bf16.gmra.mxu3 %v4440_v4  ;;  %6466 = vst [vmem:[#allocation90_spill] sm:$0xff] %v6465_v17  ;;  %v4526_v4 = vsub.f32 %v244_v55, %v777_v16  ;;  %v4543_v16 = vpack.c.bf16 %v4532_v24, %v4530_v3  ;;  %v251_v55 = vld [vmem:[%s3382_s8 + $0xd8] sm:$0xff]  ;;  %vm4664_vm7 = vmpackc.low %vm299_vm13, %vm295_vm0  ;;  %v6508_v1 = vmov 0  ;;  %vm6516_vm13 = vnez %v6230_v22 }
  0x8f   : > { %6467 = vst [vmem:[#allocation91_spill] sm:$0xff] %v4493_v0  ;;  %v4579_v50 = vpack.c.bf16 %v251_v55, %v250_v46  ;;  %v6509_v1 = vsel %vm4664_vm7, 4294967295, %v6508_v1  ;;  %2728 = vmatpush.bf16.msk.msrb.mxu0 %vm4664_vm7, %v6300_v58  ;;  %2812 = vmatpush.bf16.msk.msra.mxu2 %vm3527_vm10, %v6300_v58  ;;  %vm6517_vm0 = vnez %v6232_v23  ;;  %v1410_v22 = vunpack.c.h.b16 %v6631_v21 }
  0x90   : > { %6468 = vst [vmem:[#allocation92_spill] sm:$0xff] %v4495_v38  ;;  %v4539_v45 = vpack.c.bf16 %v4528_v35, %v4526_v4  ;;  %v955_v47 = vunpack.c.l.b16 %v4543_v16  ;;  %v956_v20 = vunpack.c.h.b16 %v4543_v16  ;;  %2828 = vmatpush.bf16.msk.msra.mxu3 %vm3547_vm14, %v6300_v58 }
  0x91   : > { %6473 = vst [vmem:[#allocation93_spill] sm:$0xff] %v6472_v44  ;;  %2796 = vmatpush.bf16.msk.msra.mxu1 %vm6517_vm0, %v6300_v58 }
  0x92   : > { %6474 = vst [vmem:[#allocation94_spill] sm:$0xff] %v4522_v31  ;;  %v953_v57 = vunpack.c.l.b16 %v4539_v45  ;;  %v954_v9 = vunpack.c.h.b16 %v4539_v45 }
  0x93   : > { %6475 = vst [vmem:[#allocation95_spill] sm:$0xff] %v4524_v48  ;;  %2778 = vmatpush.bf16.msk.msra.mxu0 %vm3430_vm4, %v6300_v58  ;;  %2814 = vmatpush.bf16.msk.msra.mxu2 %vm6518_vm11, %v6300_v58 }
  0x94   : > { %6476 = vst [vmem:[#allocation96_spill] sm:$0xff] %v4526_v4  ;;  %v784_v4 = vunpack.c.h.bf16 %v4579_v50  ;;  %v4606_v38 = vpack.c.b16 %v955_v47, %v953_v57  ;;  %v4608_v0 = vpack.c.b16 %v956_v20, %v954_v9  ;;  %2830 = vmatpush.bf16.msk.msra.mxu3 %vm6519_vm8, %v6300_v58 }
  0x95   : > { %6477 = vst [vmem:[#allocation97_spill] sm:$0xff] %v4528_v35  ;;  %v782_v35 = vunpack.c.h.bf16 %v4577_v12 }
  0x96   : > { %6478 = vst [vmem:[#allocation98_spill] sm:$0xff] %v4530_v3  ;;  %v783_v3 = vunpack.c.l.bf16 %v4579_v50 }
  0x97   : > { %6479 = vst [vmem:[#allocation99_spill] sm:$0xff] %v4532_v24  ;;  %v781_v24 = vunpack.c.l.bf16 %v4577_v12  ;;  %2780 = vmatpush.bf16.msk.msra.mxu0 %vm6516_vm13, %v6300_v58 }
  0x98   : > { %6480 = vst [vmem:[#allocation100_spill] sm:$0xff] %v4539_v45  ;;  %v4614_v45 = vsub.f32 %v250_v46, %v783_v3  ;;  %v6502_v3 = vmov 0 }
  0x99   : > { %6481 = vst [vmem:[#allocation101_spill] sm:$0xff] %v4543_v16  ;;  %v4616_v16 = vsub.f32 %v251_v55, %v784_v4  ;;  %v252_v4 = vld [vmem:[%s3382_s8 + $0xe0] sm:$0xff]  ;;  %v6503_v3 = vsel %vm4640_vm5, 4294967295, %v6502_v3 }
  0x9a   : > { %1025 = vmatmul.bf16.gmra.mxu0 %v4522_v31  ;;  %6484 = vst [vmem:[#allocation102_spill] sm:$0xff] %v6483_v52 }
  0x9b   : > { %1074 = vmatmul.bf16.gmra.mxu1 %v4524_v48  ;;  %6487 = vst [vmem:[#allocation103_spill] sm:$0xff] %v6486_v6 }
  0x9c   : > { %1123 = vmatmul.bf16.gmra.mxu2 %v4522_v31  ;;  %6488 = vst [vmem:[#allocation104_spill] sm:$0xff] %v4577_v12  ;;  %v4612_v31 = vsub.f32 %v249_v43, %v782_v35  ;;  %v253_v35 = vld [vmem:[%s3382_s8 + $0xe8] sm:$0xff]  ;;  %v6505_v43 = vmov 0 }
  0x9d   : > { %6489 = vst [vmem:[#allocation105_spill] sm:$0xff] %v4579_v50  ;;  %v6506_v43 = vsel %vm4657_vm1, 4294967295, %v6505_v43  ;;  %v4683_v61 = vpack.c.bf16 %v253_v35, %v252_v4  ;;  %v6546_v50 = vld [vmem:[#allocation29_spill] sm:$0xff] }
  0x9e   : > { %1172 = vmatmul.bf16.gmra.mxu3 %v4524_v48  ;;  %6492 = vst [vmem:[#allocation106_spill] sm:$0xff] %v6491_v51  ;;  %v4610_v48 = vsub.f32 %v248_v28, %v781_v24  ;;  %v4627_v24 = vpack.c.bf16 %v4616_v16, %v4614_v45  ;;  %v254_v28 = vld [vmem:[%s3382_s8 + $0xf0] sm:$0xff] }
  0x9f   : > { %6495 = vst [vmem:[#allocation107_spill] sm:$0xff] %v6494_v56  ;;  %v4685_v46 = vpack.c.bf16 %v255_v53, %v254_v28  ;;  %v785_v20 = vunpack.c.l.bf16 %v4683_v61 }
  0xa0   : > { %6496 = vst [vmem:[#allocation108_spill] sm:$0xff] %v4610_v48  ;;  %v4623_v57 = vpack.c.bf16 %v4612_v31, %v4610_v48  ;;  %v959_v42 = vunpack.c.l.b16 %v4627_v24  ;;  %v960_v47 = vunpack.c.h.b16 %v4627_v24 }
  0xa1   : > { %6497 = vst [vmem:[#allocation109_spill] sm:$0xff] %v4612_v31  ;;  %v787_v31 = vunpack.c.l.bf16 %v4685_v46 }
  0xa2   : > { %6498 = vst [vmem:[#allocation110_spill] sm:$0xff] %v4614_v45  ;;  %v957_v41 = vunpack.c.l.b16 %v4623_v57  ;;  %v958_v55 = vunpack.c.h.b16 %v4623_v57  ;;  %v788_v45 = vunpack.c.h.bf16 %v4685_v46 }
  0xa3   : > { %6499 = vst [vmem:[#allocation111_spill] sm:$0xff] %v4616_v16  ;;  %v786_v16 = vunpack.c.h.bf16 %v4683_v61 }
  0xa4   : > { %6500 = vst [vmem:[#allocation112_spill] sm:$0xff] %v4623_v57  ;;  %v4701_v9 = vpack.c.b16 %v959_v42, %v957_v41  ;;  %v4713_v48 = vpack.c.b16 %v960_v47, %v958_v55  ;;  %v4725_v41 = vsub.f32 %v252_v4, %v785_v20  ;;  %v4729_v55 = vsub.f32 %v254_v28, %v787_v31  ;;  %v6526_v57 = vld [vmem:[#allocation12_spill] sm:$0xff]  ;;  %v6536_v28 = vld [vmem:[#allocation14_spill] sm:$0xff] }
  0xa5   : > { %6501 = vst [vmem:[#allocation113_spill] sm:$0xff] %v4627_v24  ;;  %v4727_v42 = vsub.f32 %v253_v35, %v786_v16  ;;  %v4731_v47 = vsub.f32 %v255_v53, %v788_v45  ;;  %v6524_v24 = vld [vmem:[#allocation11_spill] sm:$0xff]  ;;  %vm6527_vm8 = vnez %v6526_v57  ;;  %v6532_v4 = vld [vmem:[#allocation16_spill] sm:$0xff]  ;;  %v6534_v35 = vld [vmem:[#allocation13_spill] sm:$0xff]  ;;  %vm6537_vm14 = vnez %v6536_v28 }
  0xa6   : > { %6504 = vst [vmem:[#allocation114_spill] sm:$0xff] %v6503_v3  ;;  %vm6525_vm3 = vnez %v6524_v24  ;;  %2798 = vmatpush.bf16.msk.msra.mxu1 %vm6527_vm8, %v6300_v58  ;;  %v6528_v16 = vld [vmem:[#allocation15_spill] sm:$0xff]  ;;  %vm6535_vm8 = vnez %v6534_v35  ;;  %v6538_v53 = vld [vmem:[#allocation21_spill] sm:$0xff] }
  0xa7   : > { %6507 = vst [vmem:[#allocation115_spill] sm:$0xff] %v6506_v43  ;;  %2782 = vmatpush.bf16.msk.msra.mxu0 %vm6525_vm3, %v6300_v58  ;;  %vm6529_vm11 = vnez %v6528_v16  ;;  %v4747_v31 = vpack.c.bf16 %v4727_v42, %v4725_v41  ;;  %v4751_v45 = vpack.c.bf16 %v4731_v47, %v4729_v55  ;;  %vm6533_vm3 = vnez %v6532_v4 }
  0xa8   : > { %6510 = vst [vmem:[#allocation116_spill] sm:$0xff] %v6509_v1  ;;  %2816 = vmatpush.bf16.msk.msra.mxu2 %vm6529_vm11, %v6300_v58  ;;  %2832 = vmatpush.bf16.msk.msra.mxu3 %vm6533_vm3, %v6300_v58  ;;  %vm6539_vm11 = vnez %v6538_v53  ;;  %v6552_v53 = vld [vmem:[#allocation28_spill] sm:$0xff] }
  0xa9   : > { %6513 = vst [vmem:[#allocation117_spill] sm:$0xff] %v6512_v60  ;;  %v961_v20 = vunpack.c.l.b16 %v4747_v31  ;;  %v6606_v1 = vld [vmem:[#allocation72_spill] sm:$0xff] }
  0xaa   : > { %1030 = vmatmul.bf16.gmra.mxu0 %v4606_v38  ;;  %6514 = vst [vmem:[#allocation118_spill] sm:$0xff] %v4683_v61  ;;  %2800 = vmatpush.bf16.msk.msra.mxu1 %vm6537_vm14, %v6300_v58  ;;  %v6544_v61 = vld [vmem:[#allocation20_spill] sm:$0xff] }
  0xab   : > { %1079 = vmatmul.bf16.gmra.mxu1 %v4608_v0  ;;  %6515 = vst [vmem:[#allocation119_spill] sm:$0xff] %v4685_v46  ;;  %2784 = vmatpush.bf16.msk.msra.mxu0 %vm6535_vm8, %v6300_v58  ;;  %v6542_v46 = vld [vmem:[#allocation17_spill] sm:$0xff]  ;;  %vm6545_vm14 = vnez %v6544_v61 }
  0xac   : > { %1128 = vmatmul.bf16.gmra.mxu2 %v4606_v38  ;;  %6520 = vst [vmem:[#allocation120_spill] sm:$0xff] %v4725_v41  ;;  %v964_v41 = vunpack.c.h.b16 %v4751_v45  ;;  %vm6543_vm3 = vnez %v6542_v46  ;;  %v6554_v61 = vld [vmem:[#allocation37_spill] sm:$0xff] }
  0xad   : > { %6521 = vst [vmem:[#allocation121_spill] sm:$0xff] %v4727_v42  ;;  %2818 = vmatpush.bf16.msk.msra.mxu2 %vm6539_vm11, %v6300_v58  ;;  %v6540_v42 = vld [vmem:[#allocation22_spill] sm:$0xff]  ;;  %vm6547_vm11 = vnez %v6546_v50 }
  0xae   : > { %1177 = vmatmul.bf16.gmra.mxu3 %v4608_v0  ;;  %6522 = vst [vmem:[#allocation122_spill] sm:$0xff] %v4729_v55  ;;  %vm6541_vm10 = vnez %v6540_v42  ;;  %v962_v55 = vunpack.c.h.b16 %v4747_v31  ;;  %2802 = vmatpush.bf16.msk.msra.mxu1 %vm6545_vm14, %v6300_v58  ;;  %v6548_v42 = vld [vmem:[#allocation32_spill] sm:$0xff]  ;;  %vm6555_vm14 = vnez %v6554_v61 }
  0xaf   : > { %6523 = vst [vmem:[#allocation123_spill] sm:$0xff] %v4731_v47  ;;  %v963_v47 = vunpack.c.l.b16 %v4751_v45  ;;  %2834 = vmatpush.bf16.msk.msra.mxu3 %vm6541_vm10, %v6300_v58  ;;  %2786 = vmatpush.bf16.msk.msra.mxu0 %vm6543_vm3, %v6300_v58  ;;  %vm6549_vm10 = vnez %v6548_v42  ;;  %vm6553_vm3 = vnez %v6552_v53 }
  0xb0   : > { %6530 = vst [vmem:[#allocation11_spill] sm:$0xff] %v4747_v31  ;;  %v4786_v31 = vpack.c.b16 %v964_v41, %v962_v55  ;;  %v6558_v41 = vld [vmem:[#allocation34_spill] sm:$0xff]  ;;  %v6560_v55 = vld [vmem:[#allocation36_spill] sm:$0xff] }
  0xb1   : > { %6531 = vst [vmem:[#allocation12_spill] sm:$0xff] %v4751_v45  ;;  %2820 = vmatpush.bf16.msk.msra.mxu2 %vm6547_vm11, %v6300_v58  ;;  %v4781_v12 = vpack.c.b16 %v963_v47, %v961_v20  ;;  %v6550_v45 = vld [vmem:[#allocation23_spill] sm:$0xff]  ;;  %v6556_v47 = vld [vmem:[#allocation38_spill] sm:$0xff] }
  0xb2   : > { %vm6551_vm8 = vnez %v6550_v45  ;;  %2804 = vmatpush.bf16.msk.msra.mxu1 %vm6553_vm3, %v6300_v58  ;;  %vm6557_vm11 = vnez %v6556_v47  ;;  %vm6561_vm3 = vnez %v6560_v55 }
  0xb3   : > { %2836 = vmatpush.bf16.msk.msra.mxu3 %vm6549_vm10, %v6300_v58  ;;  %2788 = vmatpush.bf16.msk.msra.mxu0 %vm6551_vm8, %v6300_v58  ;;  %vm6559_vm10 = vnez %v6558_v41  ;;  %vm6564_vm8 = vnez %v6343_v59 }
  0xb5   : > { %2822 = vmatpush.bf16.msk.msra.mxu2 %vm6555_vm14, %v6300_v58  ;;  %vm6562_vm14 = vnez %v6351_v7 }
  0xb6   : > { %2806 = vmatpush.bf16.msk.msra.mxu1 %vm6561_vm3, %v6300_v58 }
  0xb7   : > { %2838 = vmatpush.bf16.msk.msra.mxu3 %vm6557_vm11, %v6300_v58  ;;  %2790 = vmatpush.bf16.msk.msra.mxu0 %vm6559_vm10, %v6300_v58  ;;  %vm6563_vm11 = vnez %v6355_v40  ;;  %vm6565_vm10 = vnez %v6347_v62 }
  0xb9   : > { %2824 = vmatpush.bf16.msk.msra.mxu2 %vm6562_vm14, %v6300_v58  ;;  %vm6567_vm14 = vnez %v6372_v30 }
  0xba   : > { %1035 = vmatmul.bf16.gmra.mxu0 %v4701_v9  ;;  %2808 = vmatpush.bf16.msk.msra.mxu1 %vm6565_vm10, %v6300_v58  ;;  %vm6569_vm10 = vnez %v6359_v8 }
  0xbb   : > { %1084 = vmatmul.bf16.gmra.mxu1 %v4713_v48  ;;  %2840 = vmatpush.bf16.msk.msra.mxu3 %vm6563_vm11, %v6300_v58  ;;  %vm6568_vm11 = vnez %v6377_v2  ;;  %v6571_v2 = vld [vmem:[#allocation53_spill] sm:$0xff] }
  0xbc   : > { %1133 = vmatmul.bf16.gmra.mxu2 %v4701_v9  ;;  %2792 = vmatpush.bf16.msk.msra.mxu0 %vm6564_vm8, %v6300_v58  ;;  %vm6570_vm8 = vnez %v6367_v14  ;;  %v6575_v14 = vld [vmem:[#allocation50_spill] sm:$0xff] }
  0xbe   : > { %1182 = vmatmul.bf16.gmra.mxu3 %v4713_v48 }
  0xca   : > { %1040 = vmatmul.bf16.gmra.mxu0 %v4781_v12 }
  0xcb   : > { %1089 = vmatmul.bf16.gmra.mxu1 %v4786_v31 }
  0xcc   : > { %1138 = vmatmul.bf16.gmra.mxu2 %v4781_v12 }
  0xce   : > { %1187 = vmatmul.bf16.gmra.mxu3 %v4786_v31 }
  0xd6   : > { %v1006_v20 = vpop.f32.mrf.mxu0 }
  0xd8   : > { %v1055_v47 = vpop.f32.mrf.mxu1 }
  0xd9   : > { %v4822_v61 = vadd.f32 %v1055_v47, %v1006_v20 }
  0xda   : > { %1201 = vmatmul.bf16.vlgmr.msrb.gmra.mxu0 %v4001_v49 }
  0xdb   : > { %6566 = vst [vmem:[#allocation15_spill] sm:$0xff] %v4822_v61  ;;  %1250 = vmatmul.bf16.vlgmr.msrb.gmra.mxu1 %v4019_v54  ;;  %2842 = vmatpush.bf16.msk.msrb.mxu0 %vm6567_vm14, %v6300_v58  ;;  %v6573_v61 = vld [vmem:[#allocation49_spill] sm:$0xff]  ;;  %vm6578_vm14 = vnez %v6412_v5 }
  0xdc   : > { %1299 = vmatmul.bf16.vlgmr.msrb.gmra.mxu2 %v4001_v49  ;;  %2858 = vmatpush.bf16.msk.msrb.mxu1 %vm6568_vm11, %v6300_v58  ;;  %vm6572_vm11 = vnez %v6571_v2  ;;  %v6588_v2 = vld [vmem:[#allocation67_spill] sm:$0xff] }
  0xdd   : > { %2874 = vmatpush.bf16.msk.msrb.mxu2 %vm6569_vm10, %v6300_v58  ;;  %vm6574_vm10 = vnez %v6573_v61  ;;  %v6585_v61 = vld [vmem:[#allocation66_spill] sm:$0xff] }
  0xde   : > { %1348 = vmatmul.bf16.vlgmr.msrb.gmra.mxu3 %v4019_v54  ;;  %v1008_v20 = vpop.f32.mrf.mxu0 }
  0xdf   : > { %2890 = vmatpush.bf16.msk.msrb.mxu3 %vm6570_vm8, %v6300_v58  ;;  %v1104_v47 = vpop.f32.mrf.mxu2  ;;  %2844 = vmatpush.bf16.msk.msrb.mxu0 %vm4192_vm2, %v6300_v58  ;;  %vm6576_vm8 = vnez %v6575_v14  ;;  %vm6577_vm2 = vnez %v6409_v19 }
  0xe0   : > { %v1057_v30 = vpop.f32.mrf.mxu1  ;;  %2860 = vmatpush.bf16.msk.msrb.mxu1 %vm6572_vm11, %v6300_v58 }
  0xe1   : > { %v1153_v49 = vpop.f32.mrf.mxu3  ;;  %v4848_v8 = vadd.f32 %v1057_v30, %v1008_v20  ;;  %2876 = vmatpush.bf16.msk.msrb.mxu2 %vm6574_vm10, %v6300_v58  ;;  %v6581_v30 = vld [vmem:[#allocation55_spill] sm:$0xff]  ;;  %vm6602_vm10 = vnez %v6486_v6 }
  0xe2   : > { %v4846_v54 = vadd.f32 %v1153_v49, %v1104_v47  ;;  %v6579_v47 = vld [vmem:[#allocation54_spill] sm:$0xff]  ;;  %vm6582_vm3 = vnez %v6581_v30  ;;  %v6605_v6 = vld [vmem:[#allocation71_spill] sm:$0xff] }
  0xe3   : > { %2892 = vmatpush.bf16.msk.msrb.mxu3 %vm6576_vm8, %v6300_v58  ;;  %2846 = vmatpush.bf16.msk.msrb.mxu0 %vm6577_vm2, %v6300_v58  ;;  %vm6580_vm11 = vnez %v6579_v47  ;;  %vm6583_vm8 = vnez %v6431_v25  ;;  %vm6584_vm2 = vnez %v6434_v27  ;;  %v6587_v30 = vld [vmem:[#allocation58_spill] sm:$0xff]  ;;  %v6590_v25 = vld [vmem:[#allocation59_spill] sm:$0xff] }
  0xe4   : > { %2862 = vmatpush.bf16.msk.msrb.mxu1 %vm6578_vm14, %v6300_v58  ;;  %vm6600_vm14 = vnez %v6494_v56 }
  0xe5   : > { %2878 = vmatpush.bf16.msk.msrb.mxu2 %vm6580_vm11, %v6300_v58  ;;  %vm6586_vm11 = vnez %v6585_v61 }
  0xe7   : > { %2894 = vmatpush.bf16.msk.msrb.mxu3 %vm6582_vm3, %v6300_v58  ;;  %v1106_v20 = vpop.f32.mrf.mxu2  ;;  %v1011_v49 = vpop.f32.mrf.mxu0  ;;  %2848 = vmatpush.bf16.msk.msrb.mxu0 %vm6583_vm8, %v6300_v58  ;;  %vm6589_vm3 = vnez %v6588_v2  ;;  %vm6591_vm8 = vnez %v6450_v32 }
  0xe8   : > { %v1060_v14 = vpop.f32.mrf.mxu1  ;;  %2864 = vmatpush.bf16.msk.msrb.mxu1 %vm6584_vm2, %v6300_v58  ;;  %vm6592_vm2 = vnez %v6452_v34 }
  0xe9   : > { %v1155_v19 = vpop.f32.mrf.mxu3  ;;  %v4876_v47 = vadd.f32 %v1060_v14, %v1011_v49  ;;  %2880 = vmatpush.bf16.msk.msrb.mxu2 %vm6586_vm11, %v6300_v58  ;;  %vm6593_vm11 = vnez %v6444_v63 }
  0xea   : > { %v4874_v5 = vadd.f32 %v1155_v19, %v1106_v20  ;;  %1206 = vmatmul.bf16.gmra.mxu0 %v6587_v30 }
  0xeb   : > { %2896 = vmatpush.bf16.msk.msrb.mxu3 %vm6589_vm3, %v6300_v58  ;;  %1255 = vmatmul.bf16.gmra.mxu1 %v6590_v25  ;;  %vm6594_vm3 = vnez %v6446_v33 }
  0xec   : > { %2850 = vmatpush.bf16.msk.msrb.mxu0 %vm6591_vm8, %v6300_v58  ;;  %1304 = vmatmul.bf16.gmra.mxu2 %v6587_v30  ;;  %vm6595_vm8 = vnez %v6470_v39 }
  0xed   : > { %2866 = vmatpush.bf16.msk.msrb.mxu1 %vm6592_vm2, %v6300_v58  ;;  %2882 = vmatpush.bf16.msk.msrb.mxu2 %vm6593_vm11, %v6300_v58  ;;  %vm6596_vm2 = vnez %v6472_v44  ;;  %vm6597_vm11 = vnez %v6462_v10  ;;  %v6611_v44 = vld [vmem:[#allocation81_spill] sm:$0xff] }
  0xee   : > { %1353 = vmatmul.bf16.gmra.mxu3 %v6590_v25 }
  0xef   : > { %2898 = vmatpush.bf16.msk.msrb.mxu3 %vm6594_vm3, %v6300_v58  ;;  %v1109_v14 = vpop.f32.mrf.mxu2  ;;  %v1013_v19 = vpop.f32.mrf.mxu0  ;;  %vm6598_vm3 = vnez %v6465_v17 }
  0xf0   : > { %2852 = vmatpush.bf16.msk.msrb.mxu0 %vm6595_vm8, %v6300_v58  ;;  %v1062_v20 = vpop.f32.mrf.mxu1  ;;  %vm6599_vm8 = vnez %v6491_v51 }
  0xf1   : > { %v1158_v30 = vpop.f32.mrf.mxu3  ;;  %2868 = vmatpush.bf16.msk.msrb.mxu1 %vm6596_vm2, %v6300_v58  ;;  %v4908_v49 = vadd.f32 %v1062_v20, %v1013_v19  ;;  %2884 = vmatpush.bf16.msk.msrb.mxu2 %vm6597_vm11, %v6300_v58  ;;  %vm6601_vm2 = vnez %v6483_v52 }
  0xf2   : > { %v4906_v25 = vadd.f32 %v1158_v30, %v1109_v14 }
  0xf3   : > { %2900 = vmatpush.bf16.msk.msrb.mxu3 %vm6598_vm3, %v6300_v58 }
  0xf4   : > { %2854 = vmatpush.bf16.msk.msrb.mxu0 %vm6599_vm8, %v6300_v58 }
  0xf5   : > { %2870 = vmatpush.bf16.msk.msrb.mxu1 %vm6600_vm14, %v6300_v58  ;;  %2886 = vmatpush.bf16.msk.msrb.mxu2 %vm6601_vm2, %v6300_v58 }
  0xf7   : > { %2902 = vmatpush.bf16.msk.msrb.mxu3 %vm6602_vm10, %v6300_v58  ;;  %v1111_v14 = vpop.f32.mrf.mxu2  ;;  %v1016_v19 = vpop.f32.mrf.mxu0 }
  0xf8   : > { %2856 = vmatpush.bf16.msk.msrb.mxu0 %vm4664_vm7, %v6300_v58  ;;  %v1065_v20 = vpop.f32.mrf.mxu1 }
  0xf9   : > { %v1160_v30 = vpop.f32.mrf.mxu3  ;;  %2872 = vmatpush.bf16.msk.msrb.mxu1 %vm4676_vm6, %v6300_v58  ;;  %v4936_v52 = vadd.f32 %v1065_v20, %v1016_v19  ;;  %2888 = vmatpush.bf16.msk.msrb.mxu2 %vm4640_vm5, %v6300_v58 }
  0xfa   : > { %v4934_v56 = vadd.f32 %v1160_v30, %v1111_v14  ;;  %1211 = vmatmul.bf16.gmra.mxu0 %v6605_v6 }
  0xfb   : > { %6604 = vst [vmem:[#allocation13_spill] sm:$0xff] %v4936_v52  ;;  %2904 = vmatpush.bf16.msk.msrb.mxu3 %vm4657_vm1, %v6300_v58  ;;  %1260 = vmatmul.bf16.gmra.mxu1 %v6606_v1 }
  0xfc   : > { %6603 = vst [vmem:[#allocation16_spill] sm:$0xff] %v4934_v56  ;;  %1309 = vmatmul.bf16.gmra.mxu2 %v6605_v6  ;;  %v6612_v6 = vld [vmem:[#allocation82_spill] sm:$0xff] }
  0xfe   : > { %1358 = vmatmul.bf16.gmra.mxu3 %v6606_v1 }
  0xff   : > { %v1114_v14 = vpop.f32.mrf.mxu2  ;;  %v1018_v30 = vpop.f32.mrf.mxu0 }
 0x100   : > { %v1067_v20 = vpop.f32.mrf.mxu1 }
 0x101   : > { %v1163_v19 = vpop.f32.mrf.mxu3  ;;  %v4950_v3 = vadd.f32 %v1067_v20, %v1018_v30 }
 0x102   : > { %v4948_v60 = vadd.f32 %v1163_v19, %v1114_v14 }
 0x103   : > { %6608 = vst [vmem:[#allocation17_spill] sm:$0xff] %v4950_v3 }
 0x104   : > { %6607 = vst [vmem:[#allocation14_spill] sm:$0xff] %v4948_v60  ;;  %v6616_v60 = vld [vmem:[#allocation94_spill] sm:$0xff] }
 0x107   : > { %v1116_v52 = vpop.f32.mrf.mxu2  ;;  %v1021_v56 = vpop.f32.mrf.mxu0 }
 0x108   : > { %v1070_v17 = vpop.f32.mrf.mxu1 }
 0x109   : > { %v1165_v51 = vpop.f32.mrf.mxu3  ;;  %v4954_v10 = vadd.f32 %v1070_v17, %v1021_v56 }
 0x10a   : > { %v4952_v43 = vadd.f32 %v1165_v51, %v1116_v52  ;;  %1216 = vmatmul.bf16.gmra.mxu0 %v6611_v44 }
 0x10b   : > { %6610 = vst [vmem:[#allocation32_spill] sm:$0xff] %v4954_v10  ;;  %1265 = vmatmul.bf16.gmra.mxu1 %v6612_v6 }
 0x10c   : > { %6609 = vst [vmem:[#allocation29_spill] sm:$0xff] %v4952_v43  ;;  %1314 = vmatmul.bf16.gmra.mxu2 %v6611_v44  ;;  %v6617_v44 = vld [vmem:[#allocation95_spill] sm:$0xff] }
 0x10e   : > { %1363 = vmatmul.bf16.gmra.mxu3 %v6612_v6 }
 0x10f   : > { %v1119_v1 = vpop.f32.mrf.mxu2  ;;  %v1023_v14 = vpop.f32.mrf.mxu0 }
 0x110   : > { %v1072_v19 = vpop.f32.mrf.mxu1 }
 0x111   : > { %v1168_v30 = vpop.f32.mrf.mxu3  ;;  %v4962_v3 = vadd.f32 %v1072_v19, %v1023_v14 }
 0x112   : > { %v4960_v20 = vadd.f32 %v1168_v30, %v1119_v1 }
 0x113   : > { %6613 = vst [vmem:[#allocation23_spill] sm:$0xff] %v4962_v3 }
 0x117   : > { %v1121_v52 = vpop.f32.mrf.mxu2  ;;  %v1026_v51 = vpop.f32.mrf.mxu0 }
 0x118   : > { %v1075_v56 = vpop.f32.mrf.mxu1 }
 0x119   : > { %v1170_v17 = vpop.f32.mrf.mxu3  ;;  %v4966_v43 = vadd.f32 %v1075_v56, %v1026_v51 }
 0x11a   : > { %v4964_v10 = vadd.f32 %v1170_v17, %v1121_v52  ;;  %1221 = vmatmul.bf16.gmra.mxu0 %v6616_v60 }
 0x11b   : > { %6615 = vst [vmem:[#allocation34_spill] sm:$0xff] %v4966_v43  ;;  %1270 = vmatmul.bf16.gmra.mxu1 %v6617_v44 }
 0x11c   : > { %6614 = vst [vmem:[#allocation28_spill] sm:$0xff] %v4964_v10  ;;  %1319 = vmatmul.bf16.gmra.mxu2 %v6616_v60 }
 0x11e   : > { %1368 = vmatmul.bf16.gmra.mxu3 %v6617_v44 }
 0x11f   : > { %v1124_v6 = vpop.f32.mrf.mxu2  ;;  %v1028_v1 = vpop.f32.mrf.mxu0 }
 0x120   : > { %v1077_v30 = vpop.f32.mrf.mxu1 }
 0x121   : > { %v1173_v14 = vpop.f32.mrf.mxu3  ;;  %v4974_v3 = vadd.f32 %v1077_v30, %v1028_v1 }
 0x122   : > { %v4972_v19 = vadd.f32 %v1173_v14, %v1124_v6 }
 0x127   : > { %v1126_v52 = vpop.f32.mrf.mxu2  ;;  %v1031_v17 = vpop.f32.mrf.mxu0 }
 0x128   : > { %v1080_v56 = vpop.f32.mrf.mxu1 }
 0x129   : > { %v1175_v51 = vpop.f32.mrf.mxu3  ;;  %v4978_v10 = vadd.f32 %v1080_v56, %v1031_v17 }
 0x12a   : > { %v4976_v43 = vadd.f32 %v1175_v51, %v1126_v52  ;;  %1226 = vmatmul.bf16.gmra.mxu0 %v4606_v38 }
 0x12b   : > { %6619 = vst [vmem:[#allocation66_spill] sm:$0xff] %v4978_v10  ;;  %1275 = vmatmul.bf16.gmra.mxu1 %v4608_v0 }
 0x12c   : > { %6618 = vst [vmem:[#allocation36_spill] sm:$0xff] %v4976_v43  ;;  %1324 = vmatmul.bf16.gmra.mxu2 %v4606_v38 }
 0x12e   : > { %1373 = vmatmul.bf16.gmra.mxu3 %v4608_v0 }
 0x12f   : > { %v1129_v60 = vpop.f32.mrf.mxu2  ;;  %v1033_v44 = vpop.f32.mrf.mxu0 }
 0x130   : > { %v1082_v1 = vpop.f32.mrf.mxu1 }
 0x131   : > { %v1178_v6 = vpop.f32.mrf.mxu3  ;;  %v4986_v30 = vadd.f32 %v1082_v1, %v1033_v44 }
 0x132   : > { %v4984_v14 = vadd.f32 %v1178_v6, %v1129_v60 }
 0x133   : > { %6621 = vst [vmem:[#allocation67_spill] sm:$0xff] %v4986_v30 }
 0x134   : > { %6620 = vst [vmem:[#allocation58_spill] sm:$0xff] %v4984_v14 }
 0x137   : > { %v1131_v52 = vpop.f32.mrf.mxu2  ;;  %v1036_v51 = vpop.f32.mrf.mxu0 }
 0x138   : > { %v1085_v56 = vpop.f32.mrf.mxu1 }
 0x139   : > { %v1180_v17 = vpop.f32.mrf.mxu3  ;;  %v4990_v43 = vadd.f32 %v1085_v56, %v1036_v51 }
 0x13a   : > { %v4988_v10 = vadd.f32 %v1180_v17, %v1131_v52  ;;  %1231 = vmatmul.bf16.gmra.mxu0 %v4701_v9 }
 0x13b   : > { %6623 = vst [vmem:[#allocation71_spill] sm:$0xff] %v4990_v43  ;;  %1280 = vmatmul.bf16.gmra.mxu1 %v4713_v48 }
 0x13c   : > { %6622 = vst [vmem:[#allocation59_spill] sm:$0xff] %v4988_v10  ;;  %1329 = vmatmul.bf16.gmra.mxu2 %v4701_v9 }
 0x13e   : > { %1378 = vmatmul.bf16.gmra.mxu3 %v4713_v48 }
 0x13f   : > { %v1134_v0 = vpop.f32.mrf.mxu2  ;;  %v1038_v38 = vpop.f32.mrf.mxu0 }
 0x140   : > { %v1087_v44 = vpop.f32.mrf.mxu1 }
 0x141   : > { %v1183_v60 = vpop.f32.mrf.mxu3  ;;  %v4998_v1 = vadd.f32 %v1087_v44, %v1038_v38 }
 0x142   : > { %v4996_v6 = vadd.f32 %v1183_v60, %v1134_v0 }
 0x143   : > { %6625 = vst [vmem:[#allocation81_spill] sm:$0xff] %v4998_v1 }
 0x144   : > { %6624 = vst [vmem:[#allocation72_spill] sm:$0xff] %v4996_v6 }
 0x147   : > { %v1136_v52 = vpop.f32.mrf.mxu2  ;;  %v1041_v17 = vpop.f32.mrf.mxu0 }
 0x148   : > { %v1090_v56 = vpop.f32.mrf.mxu1 }
 0x149   : > { %v1185_v51 = vpop.f32.mrf.mxu3  ;;  %v5002_v10 = vadd.f32 %v1090_v56, %v1041_v17  ;;  %v6629_v17 = vld [vmem:[#allocation19_spill] sm:$0xff] }
 0x14a   : > { %v5000_v43 = vadd.f32 %v1185_v51, %v1136_v52  ;;  %1236 = vmatmul.bf16.gmra.mxu0 %v4781_v12  ;;  %v6628_v52 = vld [vmem:[#allocation18_spill] sm:$0xff]  ;;  %v1407_v56 = vunpack.c.l.b16 %v6629_v17 }
 0x14b   : > { %6627 = vst [vmem:[#allocation94_spill] sm:$0xff] %v5002_v10  ;;  %1285 = vmatmul.bf16.gmra.mxu1 %v4786_v31  ;;  %v1405_v51 = vunpack.c.l.b16 %v6628_v52  ;;  %v1406_v10 = vunpack.c.h.b16 %v6628_v52 }
 0x14c   : > { %6626 = vst [vmem:[#allocation82_spill] sm:$0xff] %v5000_v43  ;;  %1334 = vmatmul.bf16.gmra.mxu2 %v4781_v12  ;;  %v1408_v43 = vunpack.c.h.b16 %v6629_v17 }
 0x14d   : > { %v5016_v1 = vpack.c.b16 %v1407_v56, %v1405_v51 }
 0x14e   : > { %1383 = vmatmul.bf16.gmra.mxu3 %v4786_v31  ;;  %v5018_v6 = vpack.c.b16 %v1408_v43, %v1406_v10 }
 0x14f   : > { %v1139_v48 = vpop.f32.mrf.mxu2  ;;  %v1043_v9 = vpop.f32.mrf.mxu0 }
 0x150   : > { %v1092_v38 = vpop.f32.mrf.mxu1 }
 0x151   : > { %v1188_v0 = vpop.f32.mrf.mxu3  ;;  %v5010_v44 = vadd.f32 %v1092_v38, %v1043_v9 }
 0x152   : > { %v5008_v60 = vadd.f32 %v1188_v0, %v1139_v48  ;;  %v6632_v0 = vld [vmem:[#allocation35_spill] sm:$0xff] }
 0x153   : > { %v1411_v38 = vunpack.c.l.b16 %v6632_v0  ;;  %v1412_v23 = vunpack.c.h.b16 %v6632_v0 }
 0x155   : > { %v5074_v51 = vpack.c.b16 %v1412_v23, %v1410_v22 }
 0x157   : > { %v1141_v12 = vpop.f32.mrf.mxu2  ;;  %v1202_v31 = vpop.f32.mrf.mxu0 }
 0x158   : > { %v1251_v14 = vpop.f32.mrf.mxu1 }
 0x159   : > { %v1190_v30 = vpop.f32.mrf.mxu3  ;;  %v5022_v9 = vadd.f32 %v1251_v14, %v1202_v31 }
 0x15a   : > { %v5020_v48 = vadd.f32 %v1190_v30, %v1141_v12  ;;  %1477 = vmatmul.bf16.vlgmr.msra.gmra.mxu0 %v5016_v1  ;;  %v1409_v30 = vunpack.c.l.b16 %v6631_v21 }
 0x15b   : > { %1526 = vmatmul.bf16.vlgmr.msra.gmra.mxu1 %v5018_v6  ;;  %2906 = vmatpush.bf16.msk.msra.mxu0 %vm3430_vm4, %v6300_v58  ;;  %vm6630_vm4 = vnez %v6234_v26 }
 0x15c   : > { %1575 = vmatmul.bf16.vlgmr.msra.gmra.mxu2 %v5016_v1  ;;  %2922 = vmatpush.bf16.msk.msra.mxu1 %vm3445_vm9, %v6300_v58  ;;  %vm6633_vm9 = vnez %v6236_v29  ;;  %v5069_v26 = vpack.c.b16 %v1411_v38, %v1409_v30 }
 0x15d   : > { %2938 = vmatpush.bf16.msk.msra.mxu2 %vm3462_vm12, %v6300_v58  ;;  %vm6634_vm12 = vnez %v6524_v24 }
 0x15e   : > { %1624 = vmatmul.bf16.vlgmr.msra.gmra.mxu3 %v5018_v6 }
 0x15f   : > { %2954 = vmatpush.bf16.msk.msra.mxu3 %vm3485_vm15, %v6300_v58  ;;  %v1300_v10 = vpop.f32.mrf.mxu2  ;;  %v1204_v43 = vpop.f32.mrf.mxu0  ;;  %2908 = vmatpush.bf16.msk.msra.mxu0 %vm6516_vm13, %v6300_v58  ;;  %vm6635_vm15 = vnez %v6526_v57  ;;  %vm6636_vm13 = vnez %v6246_v36 }
 0x160   : > { %v1253_v14 = vpop.f32.mrf.mxu1  ;;  %2924 = vmatpush.bf16.msk.msra.mxu1 %vm6517_vm0, %v6300_v58  ;;  %vm6637_vm0 = vnez %v6249_v37  ;;  %v6643_v37 = vld [vmem:[#allocation20_spill] sm:$0xff] }
 0x161   : > { %v1349_v13 = vpop.f32.mrf.mxu3  ;;  %v5048_v18 = vadd.f32 %v1253_v14, %v1204_v43  ;;  %2940 = vmatpush.bf16.msk.msra.mxu2 %vm6630_vm4, %v6300_v58  ;;  %vm6638_vm4 = vnez %v6534_v35 }
 0x162   : > { %v5046_v15 = vadd.f32 %v1349_v13, %v1300_v10  ;;  %v6652_v10 = vld [vmem:[#allocation51_spill] sm:$0xff]  ;;  %v6653_v13 = vld [vmem:[#allocation52_spill] sm:$0xff] }
 0x163   : > { %2956 = vmatpush.bf16.msk.msra.mxu3 %vm6633_vm9, %v6300_v58  ;;  %2910 = vmatpush.bf16.msk.msra.mxu0 %vm6634_vm12, %v6300_v58  ;;  %vm6639_vm9 = vnez %v6536_v28  ;;  %vm6640_vm12 = vnez %v6528_v16  ;;  %v6645_v16 = vld [vmem:[#allocation21_spill] sm:$0xff]  ;;  %v1413_v43 = vunpack.c.l.b16 %v6652_v10  ;;  %v1415_v14 = vunpack.c.l.b16 %v6653_v13 }
 0x164   : > { %2926 = vmatpush.bf16.msk.msra.mxu1 %vm6635_vm15, %v6300_v58  ;;  %vm6641_vm15 = vnez %v6532_v4  ;;  %v6647_v4 = vld [vmem:[#allocation22_spill] sm:$0xff] }
 0x165   : > { %2942 = vmatpush.bf16.msk.msra.mxu2 %vm6636_vm13, %v6300_v58  ;;  %vm6642_vm13 = vnez %v6542_v46  ;;  %v5137_v21 = vpack.c.b16 %v1415_v14, %v1413_v43 }
 0x167   : > { %2958 = vmatpush.bf16.msk.msra.mxu3 %vm6637_vm0, %v6300_v58  ;;  %v1302_v29 = vpop.f32.mrf.mxu2  ;;  %v1207_v52 = vpop.f32.mrf.mxu0  ;;  %2912 = vmatpush.bf16.msk.msra.mxu0 %vm6638_vm4, %v6300_v58  ;;  %vm6644_vm0 = vnez %v6643_v37  ;;  %vm6646_vm4 = vnez %v6645_v16  ;;  %v6667_v16 = vld [vmem:[#allocation69_spill] sm:$0xff] }
 0x168   : > { %v1256_v24 = vpop.f32.mrf.mxu1  ;;  %2928 = vmatpush.bf16.msk.msra.mxu1 %vm6639_vm9, %v6300_v58  ;;  %vm6648_vm9 = vnez %v6647_v4  ;;  %v1419_v4 = vunpack.c.l.b16 %v6667_v16 }
 0x169   : > { %v1351_v57 = vpop.f32.mrf.mxu3  ;;  %v5084_v17 = vadd.f32 %v1256_v24, %v1207_v52  ;;  %2944 = vmatpush.bf16.msk.msra.mxu2 %vm6640_vm12, %v6300_v58  ;;  %vm6649_vm12 = vnez %v6550_v45  ;;  %v1414_v45 = vunpack.c.h.b16 %v6652_v10  ;;  %v6666_v24 = vld [vmem:[#allocation68_spill] sm:$0xff] }
 0x16a   : > { %v5082_v36 = vadd.f32 %v1351_v57, %v1302_v29  ;;  %1482 = vmatmul.bf16.gmra.mxu0 %v5069_v26  ;;  %v1417_v37 = vunpack.c.l.b16 %v6666_v24 }
 0x16b   : > { %2960 = vmatpush.bf16.msk.msra.mxu3 %vm6641_vm15, %v6300_v58  ;;  %1531 = vmatmul.bf16.gmra.mxu1 %v5074_v51  ;;  %vm6650_vm15 = vnez %v6552_v53  ;;  %v1416_v53 = vunpack.c.h.b16 %v6653_v13 }
 0x16c   : > { %2914 = vmatpush.bf16.msk.msra.mxu0 %vm6642_vm13, %v6300_v58  ;;  %1580 = vmatmul.bf16.gmra.mxu2 %v5069_v26  ;;  %vm6651_vm13 = vnez %v6546_v50  ;;  %v6657_v50 = vld [vmem:[#allocation37_spill] sm:$0xff] }
 0x16d   : > { %2930 = vmatpush.bf16.msk.msra.mxu1 %vm6644_vm0, %v6300_v58  ;;  %2946 = vmatpush.bf16.msk.msra.mxu2 %vm6646_vm4, %v6300_v58  ;;  %vm6654_vm0 = vnez %v6548_v42  ;;  %vm6655_vm4 = vnez %v6558_v41  ;;  %v6659_v42 = vld [vmem:[#allocation38_spill] sm:$0xff]  ;;  %v5142_v38 = vpack.c.b16 %v1416_v53, %v1414_v45 }
 0x16e   : > { %1629 = vmatmul.bf16.gmra.mxu3 %v5074_v51 }
 0x16f   : > { %2962 = vmatpush.bf16.msk.msra.mxu3 %vm6648_vm9, %v6300_v58  ;;  %v1305_v35 = vpop.f32.mrf.mxu2  ;;  %v1209_v28 = vpop.f32.mrf.mxu0  ;;  %vm6656_vm9 = vnez %v6560_v55 }
 0x170   : > { %2916 = vmatpush.bf16.msk.msra.mxu0 %vm6649_vm12, %v6300_v58  ;;  %v1258_v56 = vpop.f32.mrf.mxu1  ;;  %vm6658_vm12 = vnez %v6657_v50 }
 0x171   : > { %v1354_v46 = vpop.f32.mrf.mxu3  ;;  %2932 = vmatpush.bf16.msk.msra.mxu1 %vm6650_vm15, %v6300_v58  ;;  %v5116_v31 = vadd.f32 %v1258_v56, %v1209_v28  ;;  %2948 = vmatpush.bf16.msk.msra.mxu2 %vm6651_vm13, %v6300_v58  ;;  %vm6660_vm15 = vnez %v6659_v42  ;;  %vm6661_vm13 = vnez %v6343_v59  ;;  %v5172_v28 = vpack.c.b16 %v1419_v4, %v1417_v37 }
 0x172   : > { %v5114_v12 = vadd.f32 %v1354_v46, %v1305_v35  ;;  %v1420_v35 = vunpack.c.h.b16 %v6667_v16 }
 0x173   : > { %2964 = vmatpush.bf16.msk.msra.mxu3 %vm6654_vm0, %v6300_v58  ;;  %vm6662_vm0 = vnez %v6347_v62 }
 0x174   : > { %2918 = vmatpush.bf16.msk.msra.mxu0 %vm6655_vm4, %v6300_v58  ;;  %vm6663_vm4 = vnez %v6351_v7 }
 0x175   : > { %2934 = vmatpush.bf16.msk.msra.mxu1 %vm6656_vm9, %v6300_v58  ;;  %2950 = vmatpush.bf16.msk.msra.mxu2 %vm6658_vm12, %v6300_v58  ;;  %vm6664_vm9 = vnez %v6355_v40  ;;  %v1418_v40 = vunpack.c.h.b16 %v6666_v24 }
 0x177   : > { %2966 = vmatpush.bf16.msk.msra.mxu3 %vm6660_vm15, %v6300_v58  ;;  %v1307_v30 = vpop.f32.mrf.mxu2  ;;  %v1212_v0 = vpop.f32.mrf.mxu0  ;;  %v5174_v10 = vpack.c.b16 %v1420_v35, %v1418_v40 }
 0x178   : > { %2920 = vmatpush.bf16.msk.msra.mxu0 %vm6661_vm13, %v6300_v58  ;;  %v1261_v55 = vpop.f32.mrf.mxu1 }
 0x179   : > { %v1356_v41 = vpop.f32.mrf.mxu3  ;;  %2936 = vmatpush.bf16.msk.msra.mxu1 %vm6662_vm0, %v6300_v58  ;;  %v5152_v23 = vadd.f32 %v1261_v55, %v1212_v0  ;;  %2952 = vmatpush.bf16.msk.msra.mxu2 %vm6663_vm4, %v6300_v58  ;;  %v6672_v55 = vld [vmem:[#allocation79_spill] sm:$0xff]  ;;  %vm6702_vm4 = vnez %v6393_v11  ;;  %v6707_v11 = vld [vmem:[#allocation50_spill] sm:$0xff] }
 0x17a   : > { %v5150_v22 = vadd.f32 %v1356_v41, %v1307_v30  ;;  %1487 = vmatmul.bf16.gmra.mxu0 %v5137_v21 }
 0x17b   : > { %2968 = vmatpush.bf16.msk.msra.mxu3 %vm6664_vm9, %v6300_v58  ;;  %1536 = vmatmul.bf16.gmra.mxu1 %v5142_v38 }
 0x17c   : > { %1585 = vmatmul.bf16.gmra.mxu2 %v5137_v21 }
 0x17e   : > { %1634 = vmatmul.bf16.gmra.mxu3 %v5142_v38 }
 0x17f   : > { %v1310_v59 = vpop.f32.mrf.mxu2  ;;  %v1214_v62 = vpop.f32.mrf.mxu0 }
 0x180   : > { %v1263_v52 = vpop.f32.mrf.mxu1 }
 0x181   : > { %v1359_v29 = vpop.f32.mrf.mxu3  ;;  %v5166_v7 = vadd.f32 %v1263_v52, %v1214_v62  ;;  %v6673_v62 = vld [vmem:[#allocation80_spill] sm:$0xff]  ;;  %v1422_v52 = vunpack.c.h.b16 %v6672_v55 }
 0x182   : > { %v5164_v57 = vadd.f32 %v1359_v29, %v1310_v59  ;;  %v1421_v59 = vunpack.c.l.b16 %v6672_v55  ;;  %v1423_v29 = vunpack.c.l.b16 %v6673_v62  ;;  %v1424_v24 = vunpack.c.h.b16 %v6673_v62 }
 0x183   : > { %6665 = vst [vmem:[#allocation95_spill] sm:$0xff] %v5166_v7 }
 0x184   : > { %v5192_v37 = vpack.c.b16 %v1423_v29, %v1421_v59  ;;  %v5194_v40 = vpack.c.b16 %v1424_v24, %v1422_v52  ;;  %v6678_v59 = vld [vmem:[#allocation91_spill] sm:$0xff]  ;;  %v6679_v29 = vld [vmem:[#allocation92_spill] sm:$0xff] }
 0x185   : > { %v1425_v62 = vunpack.c.l.b16 %v6678_v59  ;;  %v1427_v52 = vunpack.c.l.b16 %v6679_v29  ;;  %v1426_v24 = vunpack.c.h.b16 %v6678_v59 }
 0x187   : > { %v1312_v46 = vpop.f32.mrf.mxu2  ;;  %v1217_v56 = vpop.f32.mrf.mxu0 }
 0x188   : > { %v1266_v13 = vpop.f32.mrf.mxu1 }
 0x189   : > { %v1361_v43 = vpop.f32.mrf.mxu3  ;;  %v5178_v45 = vadd.f32 %v1266_v13, %v1217_v56 }
 0x18a   : > { %v5176_v14 = vadd.f32 %v1361_v43, %v1312_v46  ;;  %1492 = vmatmul.bf16.gmra.mxu0 %v5172_v28 }
 0x18b   : > { %6669 = vst [vmem:[#allocation19_spill] sm:$0xff] %v5178_v45  ;;  %1541 = vmatmul.bf16.gmra.mxu1 %v5174_v10 }
 0x18c   : > { %6668 = vst [vmem:[#allocation18_spill] sm:$0xff] %v5176_v14  ;;  %1590 = vmatmul.bf16.gmra.mxu2 %v5172_v28 }
 0x18e   : > { %1639 = vmatmul.bf16.gmra.mxu3 %v5174_v10 }
 0x18f   : > { %v1315_v53 = vpop.f32.mrf.mxu2  ;;  %v1219_v50 = vpop.f32.mrf.mxu0 }
 0x190   : > { %v1268_v30 = vpop.f32.mrf.mxu1 }
 0x191   : > { %v1364_v42 = vpop.f32.mrf.mxu3  ;;  %v5186_v41 = vadd.f32 %v1268_v30, %v1219_v50 }
 0x192   : > { %v5184_v0 = vadd.f32 %v1364_v42, %v1315_v53 }
 0x193   : > { %6671 = vst [vmem:[#allocation35_spill] sm:$0xff] %v5186_v41 }
 0x194   : > { %6670 = vst [vmem:[#allocation33_spill] sm:$0xff] %v5184_v0 }
 0x197   : > { %v1317_v16 = vpop.f32.mrf.mxu2  ;;  %v1222_v4 = vpop.f32.mrf.mxu0 }
 0x198   : > { %v1271_v46 = vpop.f32.mrf.mxu1 }
 0x199   : > { %v1366_v35 = vpop.f32.mrf.mxu3  ;;  %v5198_v43 = vadd.f32 %v1271_v46, %v1222_v4  ;;  %v5212_v4 = vpack.c.b16 %v1427_v52, %v1425_v62 }
 0x19a   : > { %v5196_v56 = vadd.f32 %v1366_v35, %v1317_v16  ;;  %1497 = vmatmul.bf16.gmra.mxu0 %v5192_v37  ;;  %v1428_v16 = vunpack.c.h.b16 %v6679_v29 }
 0x19b   : > { %6675 = vst [vmem:[#allocation21_spill] sm:$0xff] %v5198_v43  ;;  %1546 = vmatmul.bf16.gmra.mxu1 %v5194_v40 }
 0x19c   : > { %6674 = vst [vmem:[#allocation20_spill] sm:$0xff] %v5196_v56  ;;  %1595 = vmatmul.bf16.gmra.mxu2 %v5192_v37  ;;  %v5214_v43 = vpack.c.b16 %v1428_v16, %v1426_v24 }
 0x19e   : > { %1644 = vmatmul.bf16.gmra.mxu3 %v5194_v40 }
 0x19f   : > { %v1320_v13 = vpop.f32.mrf.mxu2  ;;  %v1224_v53 = vpop.f32.mrf.mxu0 }
 0x1a0   : > { %v1273_v42 = vpop.f32.mrf.mxu1 }
 0x1a1   : > { %v1369_v50 = vpop.f32.mrf.mxu3  ;;  %v5206_v55 = vadd.f32 %v1273_v42, %v1224_v53 }
 0x1a2   : > { %v5204_v30 = vadd.f32 %v1369_v50, %v1320_v13 }
 0x1a3   : > { %6677 = vst [vmem:[#allocation51_spill] sm:$0xff] %v5206_v55 }
 0x1a4   : > { %6676 = vst [vmem:[#allocation22_spill] sm:$0xff] %v5204_v30 }
 0x1a7   : > { %v1322_v35 = vpop.f32.mrf.mxu2  ;;  %v1227_v46 = vpop.f32.mrf.mxu0 }
 0x1a8   : > { %v1276_v41 = vpop.f32.mrf.mxu1 }
 0x1a9   : > { %v1371_v56 = vpop.f32.mrf.mxu3  ;;  %v5218_v53 = vadd.f32 %v1276_v41, %v1227_v46  ;;  %v6685_v41 = vld [vmem:[#allocation105_spill] sm:$0xff] }
 0x1aa   : > { %v5216_v13 = vadd.f32 %v1371_v56, %v1322_v35  ;;  %1502 = vmatmul.bf16.gmra.mxu0 %v5212_v4  ;;  %v6684_v56 = vld [vmem:[#allocation104_spill] sm:$0xff]  ;;  %v1431_v16 = vunpack.c.l.b16 %v6685_v41  ;;  %v1432_v46 = vunpack.c.h.b16 %v6685_v41 }
 0x1ab   : > { %6681 = vst [vmem:[#allocation37_spill] sm:$0xff] %v5218_v53  ;;  %1551 = vmatmul.bf16.gmra.mxu1 %v5214_v43  ;;  %v1429_v24 = vunpack.c.l.b16 %v6684_v56  ;;  %v1430_v35 = vunpack.c.h.b16 %v6684_v56 }
 0x1ac   : > { %6680 = vst [vmem:[#allocation52_spill] sm:$0xff] %v5216_v13  ;;  %1600 = vmatmul.bf16.gmra.mxu2 %v5212_v4 }
 0x1ad   : > { %v5232_v53 = vpack.c.b16 %v1431_v16, %v1429_v24  ;;  %v5234_v30 = vpack.c.b16 %v1432_v46, %v1430_v35 }
 0x1ae   : > { %1649 = vmatmul.bf16.gmra.mxu3 %v5214_v43 }
 0x1af   : > { %v1325_v50 = vpop.f32.mrf.mxu2  ;;  %v1229_v42 = vpop.f32.mrf.mxu0 }
 0x1b0   : > { %v1278_v62 = vpop.f32.mrf.mxu1 }
 0x1b1   : > { %v1374_v59 = vpop.f32.mrf.mxu3  ;;  %v5226_v52 = vadd.f32 %v1278_v62, %v1229_v42 }
 0x1b2   : > { %v5224_v29 = vadd.f32 %v1374_v59, %v1325_v50 }
 0x1b3   : > { %6683 = vst [vmem:[#allocation68_spill] sm:$0xff] %v5226_v52 }
 0x1b4   : > { %6682 = vst [vmem:[#allocation38_spill] sm:$0xff] %v5224_v29 }
 0x1b7   : > { %v1327_v13 = vpop.f32.mrf.mxu2  ;;  %v1232_v55 = vpop.f32.mrf.mxu0 }
 0x1b8   : > { %v1281_v45 = vpop.f32.mrf.mxu1 }
 0x1b9   : > { %v1376_v0 = vpop.f32.mrf.mxu3  ;;  %v5238_v42 = vadd.f32 %v1281_v45, %v1232_v55  ;;  %v6690_v45 = vld [vmem:[#allocation119_spill] sm:$0xff] }
 0x1ba   : > { %v5236_v50 = vadd.f32 %v1376_v0, %v1327_v13  ;;  %1507 = vmatmul.bf16.gmra.mxu0 %v5232_v53  ;;  %v6689_v0 = vld [vmem:[#allocation118_spill] sm:$0xff]  ;;  %v1435_v55 = vunpack.c.l.b16 %v6690_v45  ;;  %v1436_v46 = vunpack.c.h.b16 %v6690_v45 }
 0x1bb   : > { %6687 = vst [vmem:[#allocation79_spill] sm:$0xff] %v5238_v42  ;;  %1556 = vmatmul.bf16.gmra.mxu1 %v5234_v30  ;;  %v1433_v13 = vunpack.c.l.b16 %v6689_v0  ;;  %v1434_v35 = vunpack.c.h.b16 %v6689_v0 }
 0x1bc   : > { %6686 = vst [vmem:[#allocation69_spill] sm:$0xff] %v5236_v50  ;;  %1605 = vmatmul.bf16.gmra.mxu2 %v5232_v53 }
 0x1bd   : > { %v5252_v42 = vpack.c.b16 %v1435_v55, %v1433_v13  ;;  %v5254_v29 = vpack.c.b16 %v1436_v46, %v1434_v35 }
 0x1be   : > { %1654 = vmatmul.bf16.gmra.mxu3 %v5234_v30 }
 0x1bf   : > { %v1330_v59 = vpop.f32.mrf.mxu2  ;;  %v1234_v62 = vpop.f32.mrf.mxu0 }
 0x1c0   : > { %v1283_v24 = vpop.f32.mrf.mxu1 }
 0x1c1   : > { %v1379_v56 = vpop.f32.mrf.mxu3  ;;  %v5246_v16 = vadd.f32 %v1283_v24, %v1234_v62 }
 0x1c2   : > { %v5244_v41 = vadd.f32 %v1379_v56, %v1330_v59 }
 0x1c3   : > { %6688 = vst [vmem:[#allocation80_spill] sm:$0xff] %v5246_v16  ;;  %v6694_v16 = vld [vmem:[#allocation45_spill] sm:$0xff] }
 0x1c4   : > { %vm6695_vm12 = vnez %v6694_v16 }
 0x1c7   : > { %v1332_v50 = vpop.f32.mrf.mxu2  ;;  %v1237_v52 = vpop.f32.mrf.mxu0 }
 0x1c8   : > { %v1286_v7 = vpop.f32.mrf.mxu1 }
 0x1c9   : > { %v1381_v14 = vpop.f32.mrf.mxu3  ;;  %v5258_v62 = vadd.f32 %v1286_v7, %v1237_v52  ;;  %v6693_v52 = vld [vmem:[#allocation15_spill] sm:$0xff] }
 0x1ca   : > { %v5256_v59 = vadd.f32 %v1381_v14, %v1332_v50  ;;  %1512 = vmatmul.bf16.gmra.mxu0 %v5252_v42 }
 0x1cb   : > { %6692 = vst [vmem:[#allocation92_spill] sm:$0xff] %v5258_v62  ;;  %1561 = vmatmul.bf16.gmra.mxu1 %v5254_v29 }
 0x1cc   : > { %6691 = vst [vmem:[#allocation91_spill] sm:$0xff] %v5256_v59  ;;  %1610 = vmatmul.bf16.gmra.mxu2 %v5252_v42 }
 0x1ce   : > { %1659 = vmatmul.bf16.gmra.mxu3 %v5254_v29 }
 0x1cf   : > { %v1335_v56 = vpop.f32.mrf.mxu2  ;;  %v1239_v24 = vpop.f32.mrf.mxu0 }
 0x1d0   : > { %v1288_v13 = vpop.f32.mrf.mxu1 }
 0x1d1   : > { %v1384_v0 = vpop.f32.mrf.mxu3  ;;  %v5266_v55 = vadd.f32 %v1288_v13, %v1239_v24  ;;  %v6698_v24 = vld [vmem:[#allocation40_spill] sm:$0xff] }
 0x1d2   : > { %v5264_v45 = vadd.f32 %v1384_v0, %v1335_v56  ;;  %v6696_v56 = vld [vmem:[#allocation46_spill] sm:$0xff]  ;;  %vm6699_vm13 = vnez %v6698_v24  ;;  %v6700_v0 = vld [vmem:[#allocation44_spill] sm:$0xff]  ;;  %v6715_v24 = vld [vmem:[#allocation55_spill] sm:$0xff] }
 0x1d3   : > { %vm6697_vm15 = vnez %v6696_v56  ;;  %vm6701_vm0 = vnez %v6700_v0  ;;  %v6713_v56 = vld [vmem:[#allocation54_spill] sm:$0xff] }
 0x1d7   : > { %v1337_v14 = vpop.f32.mrf.mxu2  ;;  %v1478_v50 = vpop.f32.mrf.mxu0 }
 0x1d8   : > { %v1479_v35 = vadd.f32 %v1478_v50, %v6693_v52  ;;  %v1527_v46 = vpop.f32.mrf.mxu1  ;;  %v6705_v52 = vld [vmem:[#allocation49_spill] sm:$0xff] }
 0x1d9   : > { %v1386_v7 = vpop.f32.mrf.mxu3 }
 0x1da   : > { %v5269_v62 = vadd.f32 %v1386_v7, %v1337_v14  ;;  %v5271_v59 = vadd.f32 %v1527_v46, %v1479_v35  ;;  %1673 = vmatmul.bf16.vlgmr.msrb.gmra.mxu0 %v5016_v1  ;;  %v6703_v7 = vld [vmem:[#allocation53_spill] sm:$0xff] }
 0x1db   : > { %1722 = vmatmul.bf16.vlgmr.msrb.gmra.mxu1 %v5018_v6  ;;  %2970 = vmatpush.bf16.msk.msrb.mxu0 %vm6695_vm12, %v6300_v58  ;;  %vm6704_vm9 = vnez %v6703_v7  ;;  %vm6706_vm12 = vnez %v6705_v52 }
 0x1dc   : > { %1771 = vmatmul.bf16.vlgmr.msrb.gmra.mxu2 %v5016_v1  ;;  %2986 = vmatpush.bf16.msk.msrb.mxu1 %vm6697_vm15, %v6300_v58  ;;  %vm6708_vm15 = vnez %v6707_v11 }
 0x1dd   : > { %3002 = vmatpush.bf16.msk.msrb.mxu2 %vm6699_vm13, %v6300_v58 }
 0x1de   : > { %1820 = vmatmul.bf16.vlgmr.msrb.gmra.mxu3 %v5018_v6 }
 0x1df   : > { %3018 = vmatpush.bf16.msk.msrb.mxu3 %vm6701_vm0, %v6300_v58  ;;  %v1576_v13 = vpop.f32.mrf.mxu2  ;;  %v1480_v14 = vpop.f32.mrf.mxu0  ;;  %2972 = vmatpush.bf16.msk.msrb.mxu0 %vm6702_vm4, %v6300_v58  ;;  %vm6714_vm4 = vnez %v6713_v56 }
 0x1e0   : > { %v1577_v1 = vadd.f32 %v1576_v13, %v4846_v54  ;;  %v1481_v50 = vadd.f32 %v1480_v14, %v4848_v8  ;;  %v1529_v6 = vpop.f32.mrf.mxu1  ;;  %2988 = vmatpush.bf16.msk.msrb.mxu1 %vm6704_vm9, %v6300_v58  ;;  %v6709_v54 = vld [vmem:[#allocation56_spill] sm:$0xff]  ;;  %v6711_v8 = vld [vmem:[#allocation57_spill] sm:$0xff]  ;;  %vm6716_vm9 = vnez %v6715_v24  ;;  %v6717_v14 = vld [vmem:[#allocation70_spill] sm:$0xff] }
 0x1e1   : > { %v1625_v16 = vpop.f32.mrf.mxu3  ;;  %3004 = vmatpush.bf16.msk.msrb.mxu2 %vm6706_vm12, %v6300_v58  ;;  %vm6710_vm13 = vnez %v6709_v54  ;;  %vm6712_vm0 = vnez %v6711_v8  ;;  %vm6718_vm12 = vnez %v6717_v14  ;;  %v6736_v24 = vld [vmem:[#allocation16_spill] sm:$0xff]  ;;  %v6737_v14 = vld [vmem:[#allocation13_spill] sm:$0xff] }
 0x1e2   : > { %v5300_v35 = vadd.f32 %v1625_v16, %v1577_v1  ;;  %v5302_v46 = vadd.f32 %v1529_v6, %v1481_v50 }
 0x1e3   : > { %3020 = vmatpush.bf16.msk.msrb.mxu3 %vm6708_vm15, %v6300_v58  ;;  %2974 = vmatpush.bf16.msk.msrb.mxu0 %vm6710_vm13, %v6300_v58  ;;  %vm6719_vm15 = vnez %v6434_v27  ;;  %vm6720_vm13 = vnez %v6585_v61 }
 0x1e4   : > { %2990 = vmatpush.bf16.msk.msrb.mxu1 %vm6712_vm0, %v6300_v58  ;;  %vm6721_vm0 = vnez %v6588_v2 }
 0x1e5   : > { %3006 = vmatpush.bf16.msk.msrb.mxu2 %vm6714_vm4, %v6300_v58  ;;  %vm6722_vm4 = vnez %v6450_v32 }
 0x1e7   : > { %3022 = vmatpush.bf16.msk.msrb.mxu3 %vm6716_vm9, %v6300_v58  ;;  %v1578_v0 = vpop.f32.mrf.mxu2  ;;  %v1483_v13 = vpop.f32.mrf.mxu0  ;;  %2976 = vmatpush.bf16.msk.msrb.mxu0 %vm6718_vm12, %v6300_v58  ;;  %vm6723_vm9 = vnez %v6452_v34  ;;  %vm6724_vm12 = vnez %v6444_v63 }
 0x1e8   : > { %v1579_v1 = vadd.f32 %v1578_v0, %v4874_v5  ;;  %v1484_v50 = vadd.f32 %v1483_v13, %v4876_v47  ;;  %v1532_v6 = vpop.f32.mrf.mxu1  ;;  %2992 = vmatpush.bf16.msk.msrb.mxu1 %vm6719_vm15, %v6300_v58  ;;  %vm6725_vm15 = vnez %v6446_v33  ;;  %v6727_v47 = vld [vmem:[#allocation93_spill] sm:$0xff] }
 0x1e9   : > { %v1627_v16 = vpop.f32.mrf.mxu3  ;;  %3008 = vmatpush.bf16.msk.msrb.mxu2 %vm6720_vm13, %v6300_v58  ;;  %vm6726_vm13 = vnez %v6470_v39  ;;  %v6742_v39 = vld [vmem:[#allocation17_spill] sm:$0xff] }
 0x1ea   : > { %v5330_v7 = vadd.f32 %v1627_v16, %v1579_v1  ;;  %v5332_v52 = vadd.f32 %v1532_v6, %v1484_v50  ;;  %1678 = vmatmul.bf16.gmra.mxu0 %v5069_v26 }
 0x1eb   : > { %3024 = vmatpush.bf16.msk.msrb.mxu3 %vm6721_vm0, %v6300_v58  ;;  %1727 = vmatmul.bf16.gmra.mxu1 %v5074_v51  ;;  %vm6728_vm0 = vnez %v6727_v47 }
 0x1ec   : > { %2978 = vmatpush.bf16.msk.msrb.mxu0 %vm6722_vm4, %v6300_v58  ;;  %1776 = vmatmul.bf16.gmra.mxu2 %v5069_v26 }
 0x1ed   : > { %2994 = vmatpush.bf16.msk.msrb.mxu1 %vm6723_vm9, %v6300_v58  ;;  %3010 = vmatpush.bf16.msk.msrb.mxu2 %vm6724_vm12, %v6300_v58 }
 0x1ee   : > { %1825 = vmatmul.bf16.gmra.mxu3 %v5074_v51 }
 0x1ef   : > { %3026 = vmatpush.bf16.msk.msrb.mxu3 %vm6725_vm15, %v6300_v58  ;;  %v1581_v2 = vpop.f32.mrf.mxu2  ;;  %v1485_v5 = vpop.f32.mrf.mxu0 }
 0x1f0   : > { %2980 = vmatpush.bf16.msk.msrb.mxu0 %vm6726_vm13, %v6300_v58  ;;  %v1582_v27 = vadd.f32 %v1581_v2, %v4906_v25  ;;  %v1486_v34 = vadd.f32 %v1485_v5, %v4908_v49  ;;  %v1534_v61 = vpop.f32.mrf.mxu1 }
 0x1f1   : > { %v1630_v32 = vpop.f32.mrf.mxu3  ;;  %2996 = vmatpush.bf16.msk.msrb.mxu1 %vm6728_vm0, %v6300_v58  ;;  %3012 = vmatpush.bf16.msk.msrb.mxu2 %vm6597_vm11, %v6300_v58 }
 0x1f2   : > { %v5364_v33 = vadd.f32 %v1630_v32, %v1582_v27  ;;  %v5366_v26 = vadd.f32 %v1534_v61, %v1486_v34  ;;  %v6741_v61 = vld [vmem:[#allocation14_spill] sm:$0xff]  ;;  %v6745_v27 = vld [vmem:[#allocation23_spill] sm:$0xff] }
 0x1f3   : > { %3028 = vmatpush.bf16.msk.msrb.mxu3 %vm6598_vm3, %v6300_v58 }
 0x1f4   : > { %2982 = vmatpush.bf16.msk.msrb.mxu0 %vm6599_vm8, %v6300_v58 }
 0x1f5   : > { %2998 = vmatpush.bf16.msk.msrb.mxu1 %vm6600_vm14, %v6300_v58  ;;  %3014 = vmatpush.bf16.msk.msrb.mxu2 %vm6601_vm2, %v6300_v58 }
 0x1f7   : > { %3030 = vmatpush.bf16.msk.msrb.mxu3 %vm6602_vm10, %v6300_v58  ;;  %v1583_v54 = vpop.f32.mrf.mxu2  ;;  %v1488_v8 = vpop.f32.mrf.mxu0 }
 0x1f8   : > { %2984 = vmatpush.bf16.msk.msrb.mxu0 %vm4664_vm7, %v6300_v58  ;;  %v1584_v0 = vadd.f32 %v1583_v54, %v6736_v24  ;;  %v1489_v1 = vadd.f32 %v1488_v8, %v6737_v14  ;;  %v1537_v16 = vpop.f32.mrf.mxu1  ;;  %v6743_v8 = vld [vmem:[#allocation29_spill] sm:$0xff] }
 0x1f9   : > { %v1632_v13 = vpop.f32.mrf.mxu3  ;;  %3000 = vmatpush.bf16.msk.msrb.mxu1 %vm4676_vm6, %v6300_v58  ;;  %3016 = vmatpush.bf16.msk.msrb.mxu2 %vm4640_vm5, %v6300_v58 }
 0x1fa   : > { %v5394_v2 = vadd.f32 %v1632_v13, %v1584_v0  ;;  %v5396_v5 = vadd.f32 %v1537_v16, %v1489_v1  ;;  %1683 = vmatmul.bf16.gmra.mxu0 %v5137_v21 }
 0x1fb   : > { %3032 = vmatpush.bf16.msk.msrb.mxu3 %vm4657_vm1, %v6300_v58  ;;  %1732 = vmatmul.bf16.gmra.mxu1 %v5142_v38 }
 0x1fc   : > { %1781 = vmatmul.bf16.gmra.mxu2 %v5137_v21  ;;  %v6744_v21 = vld [vmem:[#allocation32_spill] sm:$0xff] }
 0x1fe   : > { %1830 = vmatmul.bf16.gmra.mxu3 %v5142_v38 }
 0x1ff   : > { %v1586_v32 = vpop.f32.mrf.mxu2  ;;  %v1490_v34 = vpop.f32.mrf.mxu0 }
 0x200   : > { %v1587_v47 = vadd.f32 %v1586_v32, %v6741_v61  ;;  %v1491_v25 = vadd.f32 %v1490_v34, %v6742_v39  ;;  %v1539_v49 = vpop.f32.mrf.mxu1 }
 0x201   : > { %v1635_v63 = vpop.f32.mrf.mxu3 }
 0x202   : > { %v5407_v51 = vadd.f32 %v1635_v63, %v1587_v47  ;;  %v5409_v11 = vadd.f32 %v1539_v49, %v1491_v25  ;;  %v6746_v25 = vld [vmem:[#allocation28_spill] sm:$0xff] }
 0x207   : > { %v1588_v54 = vpop.f32.mrf.mxu2  ;;  %v1493_v58 = vpop.f32.mrf.mxu0 }
 0x208   : > { %v1589_v56 = vadd.f32 %v1588_v54, %v6743_v8  ;;  %v1494_v0 = vadd.f32 %v1493_v58, %v6744_v21  ;;  %v1542_v38 = vpop.f32.mrf.mxu1 }
 0x209   : > { %v1637_v24 = vpop.f32.mrf.mxu3 }
 0x20a   : > { %v5413_v13 = vadd.f32 %v1637_v24, %v1589_v56  ;;  %v5415_v14 = vadd.f32 %v1542_v38, %v1494_v0  ;;  %1688 = vmatmul.bf16.gmra.mxu0 %v5172_v28 }
 0x20b   : > { %1737 = vmatmul.bf16.gmra.mxu1 %v5174_v10 }
 0x20c   : > { %1786 = vmatmul.bf16.gmra.mxu2 %v5172_v28  ;;  %v6747_v28 = vld [vmem:[#allocation34_spill] sm:$0xff] }
 0x20e   : > { %1835 = vmatmul.bf16.gmra.mxu3 %v5174_v10 }
 0x20f   : > { %v1591_v1 = vpop.f32.mrf.mxu2  ;;  %v1495_v16 = vpop.f32.mrf.mxu0 }
 0x210   : > { %v1592_v50 = vadd.f32 %v1591_v1, %v4960_v20  ;;  %v1496_v32 = vadd.f32 %v1495_v16, %v6745_v27  ;;  %v1544_v34 = vpop.f32.mrf.mxu1 }
 0x211   : > { %v1640_v6 = vpop.f32.mrf.mxu3 }
 0x212   : > { %v5423_v61 = vadd.f32 %v1640_v6, %v1592_v50  ;;  %v5425_v47 = vadd.f32 %v1544_v34, %v1496_v32  ;;  %v6748_v32 = vld [vmem:[#allocation36_spill] sm:$0xff] }
 0x217   : > { %v1593_v63 = vpop.f32.mrf.mxu2  ;;  %v1498_v39 = vpop.f32.mrf.mxu0 }
 0x218   : > { %v1594_v49 = vadd.f32 %v1593_v63, %v6746_v25  ;;  %v1499_v58 = vadd.f32 %v1498_v39, %v6747_v28  ;;  %v1547_v10 = vpop.f32.mrf.mxu1 }
 0x219   : > { %v1642_v54 = vpop.f32.mrf.mxu3 }
 0x21a   : > { %v5429_v8 = vadd.f32 %v1642_v54, %v1594_v49  ;;  %v5431_v56 = vadd.f32 %v1547_v10, %v1499_v58  ;;  %1693 = vmatmul.bf16.gmra.mxu0 %v5192_v37  ;;  %v6750_v54 = vld [vmem:[#allocation58_spill] sm:$0xff]  ;;  %v6751_v10 = vld [vmem:[#allocation67_spill] sm:$0xff] }
 0x21b   : > { %1742 = vmatmul.bf16.gmra.mxu1 %v5194_v40 }
 0x21c   : > { %1791 = vmatmul.bf16.gmra.mxu2 %v5192_v37  ;;  %v6749_v37 = vld [vmem:[#allocation66_spill] sm:$0xff] }
 0x21e   : > { %1840 = vmatmul.bf16.gmra.mxu3 %v5194_v40 }
 0x21f   : > { %v1596_v20 = vpop.f32.mrf.mxu2  ;;  %v1500_v24 = vpop.f32.mrf.mxu0 }
 0x220   : > { %v1597_v21 = vadd.f32 %v1596_v20, %v4972_v19  ;;  %v1501_v38 = vadd.f32 %v1500_v24, %v4974_v3  ;;  %v1549_v1 = vpop.f32.mrf.mxu1 }
 0x221   : > { %v1645_v0 = vpop.f32.mrf.mxu3 }
 0x222   : > { %v5439_v16 = vadd.f32 %v1645_v0, %v1597_v21  ;;  %v5441_v50 = vadd.f32 %v1549_v1, %v1501_v38 }
 0x227   : > { %v1598_v6 = vpop.f32.mrf.mxu2  ;;  %v1503_v27 = vpop.f32.mrf.mxu0 }
 0x228   : > { %v1599_v34 = vadd.f32 %v1598_v6, %v6748_v32  ;;  %v1504_v39 = vadd.f32 %v1503_v27, %v6749_v37  ;;  %v1552_v40 = vpop.f32.mrf.mxu1  ;;  %v6752_v6 = vld [vmem:[#allocation59_spill] sm:$0xff] }
 0x229   : > { %v1647_v63 = vpop.f32.mrf.mxu3 }
 0x22a   : > { %v5445_v25 = vadd.f32 %v1647_v63, %v1599_v34  ;;  %v5447_v49 = vadd.f32 %v1552_v40, %v1504_v39  ;;  %1698 = vmatmul.bf16.gmra.mxu0 %v5212_v4 }
 0x22b   : > { %1747 = vmatmul.bf16.gmra.mxu1 %v5214_v43 }
 0x22c   : > { %1796 = vmatmul.bf16.gmra.mxu2 %v5212_v4  ;;  %v6753_v4 = vld [vmem:[#allocation71_spill] sm:$0xff] }
 0x22e   : > { %1845 = vmatmul.bf16.gmra.mxu3 %v5214_v43 }
 0x22f   : > { %v1601_v3 = vpop.f32.mrf.mxu2  ;;  %v1505_v19 = vpop.f32.mrf.mxu0 }
 0x230   : > { %v1602_v28 = vadd.f32 %v1601_v3, %v6750_v54  ;;  %v1506_v20 = vadd.f32 %v1505_v19, %v6751_v10  ;;  %v1554_v24 = vpop.f32.mrf.mxu1  ;;  %v6755_v3 = vld [vmem:[#allocation72_spill] sm:$0xff] }
 0x231   : > { %v1650_v58 = vpop.f32.mrf.mxu3 }
 0x232   : > { %v5455_v21 = vadd.f32 %v1650_v58, %v1602_v28  ;;  %v5457_v0 = vadd.f32 %v1554_v24, %v1506_v20  ;;  %v6756_v28 = vld [vmem:[#allocation81_spill] sm:$0xff] }
 0x237   : > { %v1603_v38 = vpop.f32.mrf.mxu2  ;;  %v1508_v1 = vpop.f32.mrf.mxu0 }
 0x238   : > { %v1604_v27 = vadd.f32 %v1603_v38, %v6752_v6  ;;  %v1509_v34 = vadd.f32 %v1508_v1, %v6753_v4  ;;  %v1557_v43 = vpop.f32.mrf.mxu1  ;;  %v6759_v6 = vld [vmem:[#allocation82_spill] sm:$0xff] }
 0x239   : > { %v1652_v32 = vpop.f32.mrf.mxu3 }
 0x23a   : > { %v5461_v63 = vadd.f32 %v1652_v32, %v1604_v27  ;;  %v5463_v37 = vadd.f32 %v1557_v43, %v1509_v34  ;;  %1703 = vmatmul.bf16.gmra.mxu0 %v5232_v53 }
 0x23b   : > { %1752 = vmatmul.bf16.gmra.mxu1 %v5234_v30 }
 0x23c   : > { %6754 = vst [vmem:[#allocation104_spill] sm:$0xff] %v5463_v37  ;;  %1801 = vmatmul.bf16.gmra.mxu2 %v5232_v53  ;;  %v6760_v53 = vld [vmem:[#allocation94_spill] sm:$0xff] }
 0x23e   : > { %1850 = vmatmul.bf16.gmra.mxu3 %v5234_v30 }
 0x23f   : > { %v1606_v39 = vpop.f32.mrf.mxu2  ;;  %v1510_v40 = vpop.f32.mrf.mxu0 }
 0x240   : > { %v1607_v19 = vadd.f32 %v1606_v39, %v6755_v3  ;;  %v1511_v58 = vadd.f32 %v1510_v40, %v6756_v28  ;;  %v1559_v10 = vpop.f32.mrf.mxu1  ;;  %v6763_v39 = vld [vmem:[#allocation30_spill] sm:$0xff]  ;;  %v6764_v3 = vld [vmem:[#allocation31_spill] sm:$0xff] }
 0x241   : > { %v1655_v54 = vpop.f32.mrf.mxu3  ;;  %v837_v40 = vunpack.c.l.bf16 %v6763_v39 }
 0x242   : > { %v5471_v20 = vadd.f32 %v1655_v54, %v1607_v19  ;;  %v5473_v24 = vadd.f32 %v1559_v10, %v1511_v58  ;;  %v839_v19 = vunpack.c.l.bf16 %v6764_v3  ;;  %v838_v58 = vunpack.c.h.bf16 %v6763_v39 }
 0x243   : > { %v840_v10 = vunpack.c.h.bf16 %v6764_v3 }
 0x244   : > { %6757 = vst [vmem:[#allocation105_spill] sm:$0xff] %v5471_v20 }
 0x245   : > { %6758 = vst [vmem:[#allocation118_spill] sm:$0xff] %v5473_v24  ;;  %v6770_v24 = vld [vmem:[#allocation27_spill] sm:$0xff] }
 0x246   : > { %v872_v39 = vsub.f32 %v6770_v24, %v840_v10  ;;  %v6773_v24 = vld [vmem:[#allocation47_spill] sm:$0xff] }
 0x247   : > { %v1608_v38 = vpop.f32.mrf.mxu2  ;;  %v1513_v1 = vpop.f32.mrf.mxu0 }
 0x248   : > { %v1609_v27 = vadd.f32 %v1608_v38, %v6759_v6  ;;  %v1514_v4 = vadd.f32 %v1513_v1, %v6760_v53  ;;  %v1562_v30 = vpop.f32.mrf.mxu1 }
 0x249   : > { %v1657_v32 = vpop.f32.mrf.mxu3 }
 0x24a   : > { %v5477_v34 = vadd.f32 %v1657_v32, %v1609_v27  ;;  %v5479_v43 = vadd.f32 %v1562_v30, %v1514_v4  ;;  %1708 = vmatmul.bf16.gmra.mxu0 %v5252_v42  ;;  %v6768_v4 = vld [vmem:[#allocation26_spill] sm:$0xff] }
 0x24b   : > { %1757 = vmatmul.bf16.gmra.mxu1 %v5254_v29  ;;  %v871_v30 = vsub.f32 %v6768_v4, %v839_v19 }
 0x24c   : > { %6761 = vst [vmem:[#allocation119_spill] sm:$0xff] %v5477_v34  ;;  %1806 = vmatmul.bf16.gmra.mxu2 %v5252_v42 }
 0x24d   : > { %6762 = vst [vmem:[#allocation15_spill] sm:$0xff] %v5479_v43  ;;  %v6769_v43 = vld [vmem:[#allocation25_spill] sm:$0xff] }
 0x24e   : > { %1855 = vmatmul.bf16.gmra.mxu3 %v5254_v29  ;;  %v6767_v29 = vld [vmem:[#allocation24_spill] sm:$0xff]  ;;  %v870_v34 = vsub.f32 %v6769_v43, %v838_v58 }
 0x24f   : > { %v1611_v54 = vpop.f32.mrf.mxu2  ;;  %v1515_v28 = vpop.f32.mrf.mxu0  ;;  %v869_v53 = vsub.f32 %v6767_v29, %v837_v40  ;;  %v6774_v43 = vld [vmem:[#allocation48_spill] sm:$0xff] }
 0x250   : > { %v1612_v38 = vadd.f32 %v1611_v54, %v5008_v60  ;;  %v1516_v6 = vadd.f32 %v1515_v28, %v5010_v44  ;;  %v1564_v27 = vpop.f32.mrf.mxu1  ;;  %v5501_v54 = vpack.c.bf16 %v872_v39, %v870_v34  ;;  %v841_v34 = vunpack.c.l.bf16 %v6773_v24 }
 0x251   : > { %v1660_v1 = vpop.f32.mrf.mxu3  ;;  %v5499_v20 = vpack.c.bf16 %v871_v30, %v869_v53  ;;  %v844_v10 = vunpack.c.h.bf16 %v6774_v43 }
 0x252   : > { %v5491_v32 = vadd.f32 %v1660_v1, %v1612_v38  ;;  %v5493_v42 = vadd.f32 %v1564_v27, %v1516_v6 }
 0x254   : > { %6765 = vst [vmem:[#allocation45_spill] sm:$0xff] %v5491_v32  ;;  %v6843_v32 = vld [vmem:[#allocation111_spill] sm:$0xff] }
 0x255   : > { %6766 = vst [vmem:[#allocation46_spill] sm:$0xff] %v5493_v42 }
 0x257   : > { %v1613_v3 = vpop.f32.mrf.mxu2  ;;  %v1674_v60 = vpop.f32.mrf.mxu0 }
 0x258   : > { %v1614_v44 = vadd.f32 %v1613_v3, %v5020_v48  ;;  %v1675_v38 = vadd.f32 %v1674_v60, %v5022_v9  ;;  %v1723_v1 = vpop.f32.mrf.mxu1  ;;  %v843_v48 = vunpack.c.l.bf16 %v6774_v43  ;;  %v842_v9 = vunpack.c.h.bf16 %v6773_v24  ;;  %v6777_v3 = vld [vmem:[#allocation39_spill] sm:$0xff] }
 0x259   : > { %v1662_v28 = vpop.f32.mrf.mxu3  ;;  %v873_v60 = vsub.f32 %v6777_v3, %v841_v34 }
 0x25a   : > { %v5505_v6 = vadd.f32 %v1662_v28, %v1614_v44  ;;  %v5507_v40 = vadd.f32 %v1723_v1, %v1675_v38  ;;  %1869 = vmatmul.bf16.vlgmr.msra.gmra.mxu0 %v5499_v20  ;;  %v6778_v44 = vld [vmem:[#allocation42_spill] sm:$0xff]  ;;  %v6779_v38 = vld [vmem:[#allocation41_spill] sm:$0xff] }
 0x25b   : > { %1918 = vmatmul.bf16.vlgmr.msra.gmra.mxu1 %v5501_v54  ;;  %v875_v28 = vsub.f32 %v6778_v44, %v843_v48  ;;  %v874_v1 = vsub.f32 %v6779_v38, %v842_v9  ;;  %v6784_v9 = vld [vmem:[#allocation65_spill] sm:$0xff] }
 0x25c   : > { %6771 = vst [vmem:[#allocation40_spill] sm:$0xff] %v5505_v6  ;;  %1967 = vmatmul.bf16.vlgmr.msra.gmra.mxu2 %v5499_v20  ;;  %v848_v3 = vunpack.c.h.bf16 %v6784_v9 }
 0x25d   : > { %6772 = vst [vmem:[#allocation44_spill] sm:$0xff] %v5507_v40  ;;  %v6780_v40 = vld [vmem:[#allocation43_spill] sm:$0xff]  ;;  %v5527_v6 = vpack.c.bf16 %v875_v28, %v873_v60 }
 0x25e   : > { %2016 = vmatmul.bf16.vlgmr.msra.gmra.mxu3 %v5501_v54  ;;  %v876_v24 = vsub.f32 %v6780_v40, %v844_v10  ;;  %v6783_v40 = vld [vmem:[#allocation64_spill] sm:$0xff] }
 0x25f   : > { %v1772_v19 = vpop.f32.mrf.mxu2  ;;  %v1676_v58 = vpop.f32.mrf.mxu0  ;;  %v845_v48 = vunpack.c.l.bf16 %v6783_v40 }
 0x260   : > { %v1773_v27 = vadd.f32 %v1772_v19, %v5046_v15  ;;  %v1677_v53 = vadd.f32 %v1676_v58, %v5048_v18  ;;  %v1725_v4 = vpop.f32.mrf.mxu1  ;;  %v5529_v19 = vpack.c.bf16 %v876_v24, %v874_v1 }
 0x261   : > { %v1821_v29 = vpop.f32.mrf.mxu3 }
 0x262   : > { %v5519_v30 = vadd.f32 %v1821_v29, %v1773_v27  ;;  %v5521_v39 = vadd.f32 %v1725_v4, %v1677_v53 }
 0x264   : > { %6775 = vst [vmem:[#allocation53_spill] sm:$0xff] %v5519_v30  ;;  %v6829_v30 = vld [vmem:[#allocation99_spill] sm:$0xff] }
 0x265   : > { %6776 = vst [vmem:[#allocation49_spill] sm:$0xff] %v5521_v39 }
 0x267   : > { %v1774_v43 = vpop.f32.mrf.mxu2  ;;  %v1679_v15 = vpop.f32.mrf.mxu0 }
 0x268   : > { %v1775_v18 = vadd.f32 %v1774_v43, %v5082_v36  ;;  %v1680_v27 = vadd.f32 %v1679_v15, %v5084_v17  ;;  %v1728_v29 = vpop.f32.mrf.mxu1  ;;  %v847_v36 = vunpack.c.l.bf16 %v6784_v9  ;;  %v846_v17 = vunpack.c.h.bf16 %v6783_v40  ;;  %v6787_v43 = vld [vmem:[#allocation60_spill] sm:$0xff] }
 0x269   : > { %v1823_v58 = vpop.f32.mrf.mxu3  ;;  %v877_v15 = vsub.f32 %v6787_v43, %v845_v48 }
 0x26a   : > { %v5533_v53 = vadd.f32 %v1823_v58, %v1775_v18  ;;  %v5535_v34 = vadd.f32 %v1728_v29, %v1680_v27  ;;  %1874 = vmatmul.bf16.gmra.mxu0 %v5527_v6  ;;  %v6788_v18 = vld [vmem:[#allocation62_spill] sm:$0xff]  ;;  %v6789_v27 = vld [vmem:[#allocation61_spill] sm:$0xff] }
 0x26b   : > { %1923 = vmatmul.bf16.gmra.mxu1 %v5529_v19  ;;  %v879_v58 = vsub.f32 %v6788_v18, %v847_v36  ;;  %v878_v29 = vsub.f32 %v6789_v27, %v846_v17  ;;  %v6794_v17 = vld [vmem:[#allocation78_spill] sm:$0xff] }
 0x26c   : > { %6781 = vst [vmem:[#allocation50_spill] sm:$0xff] %v5533_v53  ;;  %1972 = vmatmul.bf16.gmra.mxu2 %v5527_v6  ;;  %v852_v43 = vunpack.c.h.bf16 %v6794_v17 }
 0x26d   : > { %6782 = vst [vmem:[#allocation56_spill] sm:$0xff] %v5535_v34  ;;  %v6790_v34 = vld [vmem:[#allocation63_spill] sm:$0xff]  ;;  %v5555_v53 = vpack.c.bf16 %v879_v58, %v877_v15 }
 0x26e   : > { %2021 = vmatmul.bf16.gmra.mxu3 %v5529_v19  ;;  %v880_v40 = vsub.f32 %v6790_v34, %v848_v3  ;;  %v6793_v34 = vld [vmem:[#allocation77_spill] sm:$0xff]  ;;  %v6795_v58 = vld [vmem:[#allocation95_spill] sm:$0xff] }
 0x26f   : > { %v1777_v10 = vpop.f32.mrf.mxu2  ;;  %v1681_v4 = vpop.f32.mrf.mxu0  ;;  %v849_v36 = vunpack.c.l.bf16 %v6793_v34 }
 0x270   : > { %v1778_v60 = vadd.f32 %v1777_v10, %v5114_v12  ;;  %v1682_v28 = vadd.f32 %v1681_v4, %v5116_v31  ;;  %v1730_v38 = vpop.f32.mrf.mxu1  ;;  %v5557_v10 = vpack.c.bf16 %v880_v40, %v878_v29 }
 0x271   : > { %v1826_v44 = vpop.f32.mrf.mxu3 }
 0x272   : > { %v5547_v1 = vadd.f32 %v1826_v44, %v1778_v60  ;;  %v5549_v24 = vadd.f32 %v1730_v38, %v1682_v28 }
 0x274   : > { %6785 = vst [vmem:[#allocation57_spill] sm:$0xff] %v5547_v1  ;;  %v6815_v1 = vld [vmem:[#allocation86_spill] sm:$0xff] }
 0x275   : > { %6786 = vst [vmem:[#allocation54_spill] sm:$0xff] %v5549_v24 }
 0x277   : > { %v1779_v9 = vpop.f32.mrf.mxu2  ;;  %v1684_v12 = vpop.f32.mrf.mxu0 }
 0x278   : > { %v1780_v31 = vadd.f32 %v1779_v9, %v5150_v22  ;;  %v1685_v60 = vadd.f32 %v1684_v12, %v5152_v23  ;;  %v1733_v44 = vpop.f32.mrf.mxu1  ;;  %v851_v22 = vunpack.c.l.bf16 %v6794_v17  ;;  %v850_v23 = vunpack.c.h.bf16 %v6793_v34  ;;  %v6798_v12 = vld [vmem:[#allocation73_spill] sm:$0xff] }
 0x279   : > { %v1828_v4 = vpop.f32.mrf.mxu3 }
 0x27a   : > { %v5561_v28 = vadd.f32 %v1828_v4, %v1780_v31  ;;  %v5563_v48 = vadd.f32 %v1733_v44, %v1685_v60  ;;  %1879 = vmatmul.bf16.gmra.mxu0 %v5555_v53  ;;  %v881_v31 = vsub.f32 %v6798_v12, %v849_v36  ;;  %v6799_v4 = vld [vmem:[#allocation75_spill] sm:$0xff]  ;;  %v6800_v44 = vld [vmem:[#allocation74_spill] sm:$0xff] }
 0x27b   : > { %1928 = vmatmul.bf16.gmra.mxu1 %v5557_v10  ;;  %v883_v60 = vsub.f32 %v6799_v4, %v851_v22  ;;  %v6807_v22 = vld [vmem:[#allocation88_spill] sm:$0xff] }
 0x27c   : > { %6791 = vst [vmem:[#allocation55_spill] sm:$0xff] %v5561_v28  ;;  %1977 = vmatmul.bf16.gmra.mxu2 %v5555_v53  ;;  %v6801_v28 = vld [vmem:[#allocation76_spill] sm:$0xff]  ;;  %v856_v4 = vunpack.c.h.bf16 %v6807_v22 }
 0x27d   : > { %6792 = vst [vmem:[#allocation70_spill] sm:$0xff] %v5563_v48  ;;  %v882_v48 = vsub.f32 %v6800_v44, %v850_v23  ;;  %v884_v34 = vsub.f32 %v6801_v28, %v852_v43  ;;  %v5583_v24 = vpack.c.bf16 %v883_v60, %v881_v31  ;;  %v6806_v28 = vld [vmem:[#allocation87_spill] sm:$0xff]  ;;  %v855_v23 = vunpack.c.l.bf16 %v6807_v22  ;;  %v6808_v60 = vld [vmem:[#allocation33_spill] sm:$0xff] }
 0x27e   : > { %2026 = vmatmul.bf16.gmra.mxu3 %v5557_v10  ;;  %v854_v31 = vunpack.c.h.bf16 %v6806_v28 }
 0x27f   : > { %v1782_v3 = vpop.f32.mrf.mxu2  ;;  %v1686_v38 = vpop.f32.mrf.mxu0 }
 0x280   : > { %v1783_v15 = vadd.f32 %v1782_v3, %v5164_v57  ;;  %v1687_v27 = vadd.f32 %v1686_v38, %v6795_v58  ;;  %v1735_v29 = vpop.f32.mrf.mxu1  ;;  %v5585_v3 = vpack.c.bf16 %v884_v34, %v882_v48  ;;  %v6802_v38 = vld [vmem:[#allocation18_spill] sm:$0xff]  ;;  %v853_v48 = vunpack.c.l.bf16 %v6806_v28 }
 0x281   : > { %v1831_v18 = vpop.f32.mrf.mxu3  ;;  %v888_v28 = vsub.f32 %v6815_v1, %v856_v4  ;;  %v6820_v1 = vld [vmem:[#allocation100_spill] sm:$0xff] }
 0x282   : > { %v5575_v40 = vadd.f32 %v1831_v18, %v1783_v15  ;;  %v5577_v9 = vadd.f32 %v1735_v29, %v1687_v27  ;;  %v6803_v18 = vld [vmem:[#allocation19_spill] sm:$0xff]  ;;  %v858_v4 = vunpack.c.h.bf16 %v6820_v1 }
 0x284   : > { %6796 = vst [vmem:[#allocation93_spill] sm:$0xff] %v5575_v40 }
 0x285   : > { %6797 = vst [vmem:[#allocation89_spill] sm:$0xff] %v5577_v9 }
 0x287   : > { %v1784_v17 = vpop.f32.mrf.mxu2  ;;  %v1689_v57 = vpop.f32.mrf.mxu0 }
 0x288   : > { %v1785_v58 = vadd.f32 %v1784_v17, %v6802_v38  ;;  %v1690_v27 = vadd.f32 %v1689_v57, %v6803_v18  ;;  %v1738_v29 = vpop.f32.mrf.mxu1  ;;  %v6809_v17 = vld [vmem:[#allocation35_spill] sm:$0xff] }
 0x289   : > { %v1833_v15 = vpop.f32.mrf.mxu3  ;;  %v6812_v18 = vld [vmem:[#allocation83_spill] sm:$0xff] }
 0x28a   : > { %v5589_v9 = vadd.f32 %v1833_v15, %v1785_v58  ;;  %v5591_v36 = vadd.f32 %v1738_v29, %v1690_v27  ;;  %1884 = vmatmul.bf16.gmra.mxu0 %v5583_v24  ;;  %v885_v27 = vsub.f32 %v6812_v18, %v853_v48  ;;  %v6813_v29 = vld [vmem:[#allocation85_spill] sm:$0xff] }
 0x28b   : > { %1933 = vmatmul.bf16.gmra.mxu1 %v5585_v3 }
 0x28c   : > { %6804 = vst [vmem:[#allocation90_spill] sm:$0xff] %v5589_v9  ;;  %1982 = vmatmul.bf16.gmra.mxu2 %v5583_v24  ;;  %v6814_v9 = vld [vmem:[#allocation84_spill] sm:$0xff] }
 0x28d   : > { %6805 = vst [vmem:[#allocation106_spill] sm:$0xff] %v5591_v36  ;;  %v887_v36 = vsub.f32 %v6813_v29, %v855_v23  ;;  %v886_v40 = vsub.f32 %v6814_v9, %v854_v31  ;;  %v6821_v9 = vld [vmem:[#allocation101_spill] sm:$0xff] }
 0x28e   : > { %2031 = vmatmul.bf16.gmra.mxu3 %v5585_v3  ;;  %v860_v18 = vunpack.c.h.bf16 %v6821_v9 }
 0x28f   : > { %v1787_v43 = vpop.f32.mrf.mxu2  ;;  %v1691_v12 = vpop.f32.mrf.mxu0  ;;  %v5611_v39 = vpack.c.bf16 %v887_v36, %v885_v27  ;;  %v859_v36 = vunpack.c.l.bf16 %v6821_v9  ;;  %v6822_v27 = vld [vmem:[#allocation22_spill] sm:$0xff] }
 0x290   : > { %v1788_v44 = vadd.f32 %v1787_v43, %v6808_v60  ;;  %v1692_v57 = vadd.f32 %v1691_v12, %v6809_v17  ;;  %v1740_v38 = vpop.f32.mrf.mxu1  ;;  %v5613_v60 = vpack.c.bf16 %v888_v28, %v886_v40  ;;  %v6816_v12 = vld [vmem:[#allocation20_spill] sm:$0xff]  ;;  %v857_v40 = vunpack.c.l.bf16 %v6820_v1 }
 0x291   : > { %v1836_v34 = vpop.f32.mrf.mxu3  ;;  %v892_v1 = vsub.f32 %v6829_v30, %v860_v18  ;;  %v6834_v30 = vld [vmem:[#allocation112_spill] sm:$0xff] }
 0x292   : > { %v5603_v58 = vadd.f32 %v1836_v34, %v1788_v44  ;;  %v5605_v15 = vadd.f32 %v1740_v38, %v1692_v57  ;;  %v6817_v34 = vld [vmem:[#allocation21_spill] sm:$0xff]  ;;  %v862_v18 = vunpack.c.h.bf16 %v6834_v30 }
 0x294   : > { %6810 = vst [vmem:[#allocation107_spill] sm:$0xff] %v5603_v58 }
 0x295   : > { %6811 = vst [vmem:[#allocation102_spill] sm:$0xff] %v5605_v15 }
 0x297   : > { %v1789_v22 = vpop.f32.mrf.mxu2  ;;  %v1694_v43 = vpop.f32.mrf.mxu0 }
 0x298   : > { %v1790_v17 = vadd.f32 %v1789_v22, %v6816_v12  ;;  %v1695_v57 = vadd.f32 %v1694_v43, %v6817_v34  ;;  %v1743_v38 = vpop.f32.mrf.mxu1  ;;  %v6823_v22 = vld [vmem:[#allocation51_spill] sm:$0xff]  ;;  %v6826_v34 = vld [vmem:[#allocation96_spill] sm:$0xff] }
 0x299   : > { %v1838_v44 = vpop.f32.mrf.mxu3 }
 0x29a   : > { %v5617_v15 = vadd.f32 %v1838_v44, %v1790_v17  ;;  %v5619_v48 = vadd.f32 %v1743_v38, %v1695_v57  ;;  %1889 = vmatmul.bf16.gmra.mxu0 %v5611_v39  ;;  %v889_v57 = vsub.f32 %v6826_v34, %v857_v40  ;;  %v6827_v38 = vld [vmem:[#allocation98_spill] sm:$0xff] }
 0x29b   : > { %1938 = vmatmul.bf16.gmra.mxu1 %v5613_v60 }
 0x29c   : > { %6818 = vst [vmem:[#allocation103_spill] sm:$0xff] %v5617_v15  ;;  %1987 = vmatmul.bf16.gmra.mxu2 %v5611_v39  ;;  %v6828_v15 = vld [vmem:[#allocation97_spill] sm:$0xff] }
 0x29d   : > { %6819 = vst [vmem:[#allocation116_spill] sm:$0xff] %v5619_v48  ;;  %v891_v48 = vsub.f32 %v6827_v38, %v859_v36  ;;  %v890_v58 = vsub.f32 %v6828_v15, %v858_v4  ;;  %v6835_v15 = vld [vmem:[#allocation113_spill] sm:$0xff] }
 0x29e   : > { %2036 = vmatmul.bf16.gmra.mxu3 %v5613_v60  ;;  %v864_v34 = vunpack.c.h.bf16 %v6835_v15 }
 0x29f   : > { %v1792_v23 = vpop.f32.mrf.mxu2  ;;  %v1696_v31 = vpop.f32.mrf.mxu0  ;;  %v5639_v42 = vpack.c.bf16 %v891_v48, %v889_v57  ;;  %v863_v48 = vunpack.c.l.bf16 %v6835_v15  ;;  %v6836_v57 = vld [vmem:[#allocation38_spill] sm:$0xff] }
 0x2a0   : > { %v1793_v29 = vadd.f32 %v1792_v23, %v6822_v27  ;;  %v1697_v43 = vadd.f32 %v1696_v31, %v6823_v22  ;;  %v1745_v12 = vpop.f32.mrf.mxu1  ;;  %v5641_v27 = vpack.c.bf16 %v892_v1, %v890_v58  ;;  %v6830_v31 = vld [vmem:[#allocation52_spill] sm:$0xff]  ;;  %v861_v58 = vunpack.c.l.bf16 %v6834_v30 }
 0x2a1   : > { %v1841_v28 = vpop.f32.mrf.mxu3  ;;  %v896_v30 = vsub.f32 %v6843_v32, %v864_v34  ;;  %v6849_v32 = vld [vmem:[#allocation11_spill] sm:$0xff] }
 0x2a2   : > { %v5631_v17 = vadd.f32 %v1841_v28, %v1793_v29  ;;  %v5633_v44 = vadd.f32 %v1745_v12, %v1697_v43  ;;  %v6831_v28 = vld [vmem:[#allocation37_spill] sm:$0xff]  ;;  %v866_v34 = vunpack.c.h.bf16 %v6849_v32 }
 0x2a4   : > { %6824 = vst [vmem:[#allocation16_spill] sm:$0xff] %v5631_v17 }
 0x2a5   : > { %6825 = vst [vmem:[#allocation13_spill] sm:$0xff] %v5633_v44 }
 0x2a7   : > { %v1794_v9 = vpop.f32.mrf.mxu2  ;;  %v1699_v23 = vpop.f32.mrf.mxu0 }
 0x2a8   : > { %v1795_v22 = vadd.f32 %v1794_v9, %v6830_v31  ;;  %v1700_v43 = vadd.f32 %v1699_v23, %v6831_v28  ;;  %v1748_v12 = vpop.f32.mrf.mxu1  ;;  %v6837_v9 = vld [vmem:[#allocation68_spill] sm:$0xff] }
 0x2a9   : > { %v1843_v29 = vpop.f32.mrf.mxu3  ;;  %v6840_v28 = vld [vmem:[#allocation108_spill] sm:$0xff] }
 0x2aa   : > { %v5645_v44 = vadd.f32 %v1843_v29, %v1795_v22  ;;  %v5647_v40 = vadd.f32 %v1748_v12, %v1700_v43  ;;  %1894 = vmatmul.bf16.gmra.mxu0 %v5639_v42  ;;  %v893_v43 = vsub.f32 %v6840_v28, %v861_v58  ;;  %v6841_v12 = vld [vmem:[#allocation110_spill] sm:$0xff] }
 0x2ab   : > { %1943 = vmatmul.bf16.gmra.mxu1 %v5641_v27 }
 0x2ac   : > { %6832 = vst [vmem:[#allocation117_spill] sm:$0xff] %v5645_v44  ;;  %1992 = vmatmul.bf16.gmra.mxu2 %v5639_v42  ;;  %v6842_v44 = vld [vmem:[#allocation109_spill] sm:$0xff] }
 0x2ad   : > { %6833 = vst [vmem:[#allocation114_spill] sm:$0xff] %v5647_v40  ;;  %v895_v40 = vsub.f32 %v6841_v12, %v863_v48  ;;  %v894_v17 = vsub.f32 %v6842_v44, %v862_v18  ;;  %v6850_v44 = vld [vmem:[#allocation12_spill] sm:$0xff] }
 0x2ae   : > { %2041 = vmatmul.bf16.gmra.mxu3 %v5641_v27  ;;  %v868_v28 = vunpack.c.h.bf16 %v6850_v44 }
 0x2af   : > { %v1797_v36 = vpop.f32.mrf.mxu2  ;;  %v1701_v4 = vpop.f32.mrf.mxu0  ;;  %v5667_v37 = vpack.c.bf16 %v895_v40, %v893_v43  ;;  %v867_v40 = vunpack.c.l.bf16 %v6850_v44 }
 0x2b0   : > { %v1798_v38 = vadd.f32 %v1797_v36, %v6836_v57  ;;  %v1702_v23 = vadd.f32 %v1701_v4, %v6837_v9  ;;  %v1750_v31 = vpop.f32.mrf.mxu1  ;;  %v5669_v57 = vpack.c.bf16 %v896_v30, %v894_v17  ;;  %v6845_v4 = vld [vmem:[#allocation69_spill] sm:$0xff]  ;;  %v865_v17 = vunpack.c.l.bf16 %v6849_v32  ;;  %v6851_v30 = vld [vmem:[#allocation80_spill] sm:$0xff] }
 0x2b1   : > { %v1846_v1 = vpop.f32.mrf.mxu3 }
 0x2b2   : > { %v5659_v22 = vadd.f32 %v1846_v1, %v1798_v38  ;;  %v5661_v29 = vadd.f32 %v1750_v31, %v1702_v23  ;;  %6844 = vst [vmem:[#allocation17_spill] sm:$0xff] %v5669_v57  ;;  %v6846_v1 = vld [vmem:[#allocation79_spill] sm:$0xff] }
 0x2b4   : > { %6838 = vst [vmem:[#allocation115_spill] sm:$0xff] %v5659_v22  ;;  %v6856_v22 = vld [vmem:[#allocation123_spill] sm:$0xff] }
 0x2b5   : > { %6839 = vst [vmem:[#allocation14_spill] sm:$0xff] %v5661_v29  ;;  %v900_v32 = vsub.f32 %v6856_v22, %v868_v28 }
 0x2b7   : > { %v1799_v15 = vpop.f32.mrf.mxu2  ;;  %v1704_v36 = vpop.f32.mrf.mxu0 }
 0x2b8   : > { %v1800_v9 = vadd.f32 %v1799_v15, %v6845_v4  ;;  %v1705_v23 = vadd.f32 %v1704_v36, %v6846_v1  ;;  %v1753_v31 = vpop.f32.mrf.mxu1 }
 0x2b9   : > { %v1848_v38 = vpop.f32.mrf.mxu3 }
 0x2ba   : > { %v5673_v29 = vadd.f32 %v1848_v38, %v1800_v9  ;;  %v5675_v58 = vadd.f32 %v1753_v31, %v1705_v23  ;;  %1899 = vmatmul.bf16.gmra.mxu0 %v5667_v37  ;;  %v6853_v38 = vld [vmem:[#allocation120_spill] sm:$0xff]  ;;  %v6854_v23 = vld [vmem:[#allocation122_spill] sm:$0xff] }
 0x2bb   : > { %1948 = vmatmul.bf16.gmra.mxu1 %v5669_v57  ;;  %v897_v1 = vsub.f32 %v6853_v38, %v865_v17  ;;  %v899_v31 = vsub.f32 %v6854_v23, %v867_v40 }
 0x2bc   : > { %6847 = vst [vmem:[#allocation29_spill] sm:$0xff] %v5673_v29  ;;  %1997 = vmatmul.bf16.gmra.mxu2 %v5667_v37 }
 0x2bd   : > { %6848 = vst [vmem:[#allocation32_spill] sm:$0xff] %v5675_v58  ;;  %v6855_v58 = vld [vmem:[#allocation121_spill] sm:$0xff] }
 0x2be   : > { %2046 = vmatmul.bf16.gmra.mxu3 %v5669_v57  ;;  %v898_v29 = vsub.f32 %v6855_v58, %v866_v34  ;;  %v5695_v57 = vpack.c.bf16 %v899_v31, %v897_v1 }
 0x2bf   : > { %v1802_v48 = vpop.f32.mrf.mxu2  ;;  %v1706_v18 = vpop.f32.mrf.mxu0 }
 0x2c0   : > { %v1803_v43 = vadd.f32 %v1802_v48, %v5244_v41  ;;  %v1707_v15 = vadd.f32 %v1706_v18, %v6851_v30  ;;  %v1755_v36 = vpop.f32.mrf.mxu1  ;;  %v5697_v48 = vpack.c.bf16 %v900_v32, %v898_v29  ;;  %v6857_v18 = vld [vmem:[#allocation91_spill] sm:$0xff] }
 0x2c1   : > { %v1851_v12 = vpop.f32.mrf.mxu3 }
 0x2c2   : > { %v5687_v4 = vadd.f32 %v1851_v12, %v1803_v43  ;;  %v5689_v9 = vadd.f32 %v1755_v36, %v1707_v15  ;;  %v6858_v12 = vld [vmem:[#allocation92_spill] sm:$0xff] }
 0x2c4   : > { %6852 = vst [vmem:[#allocation23_spill] sm:$0xff] %v5689_v9 }
 0x2c7   : > { %v1804_v44 = vpop.f32.mrf.mxu2  ;;  %v1709_v41 = vpop.f32.mrf.mxu0 }
 0x2c8   : > { %v1805_v30 = vadd.f32 %v1804_v44, %v6857_v18  ;;  %v1710_v15 = vadd.f32 %v1709_v41, %v6858_v12  ;;  %v1758_v36 = vpop.f32.mrf.mxu1 }
 0x2c9   : > { %v1853_v43 = vpop.f32.mrf.mxu3 }
 0x2ca   : > { %v5701_v9 = vadd.f32 %v1853_v43, %v1805_v30  ;;  %v5703_v17 = vadd.f32 %v1758_v36, %v1710_v15  ;;  %1904 = vmatmul.bf16.gmra.mxu0 %v5695_v57 }
 0x2cb   : > { %1953 = vmatmul.bf16.gmra.mxu1 %v5697_v48 }
 0x2cc   : > { %2002 = vmatmul.bf16.gmra.mxu2 %v5695_v57 }
 0x2ce   : > { %2051 = vmatmul.bf16.gmra.mxu3 %v5697_v48 }
 0x2cf   : > { %v1807_v22 = vpop.f32.mrf.mxu2  ;;  %v1711_v29 = vpop.f32.mrf.mxu0 }
 0x2d0   : > { %v1808_v58 = vadd.f32 %v1807_v22, %v5264_v45  ;;  %v1712_v34 = vadd.f32 %v1711_v29, %v5266_v55  ;;  %v1760_v28 = vpop.f32.mrf.mxu1 }
 0x2d1   : > { %v1856_v40 = vpop.f32.mrf.mxu3 }
 0x2d2   : > { %v5711_v38 = vadd.f32 %v1856_v40, %v1808_v58  ;;  %v5713_v1 = vadd.f32 %v1760_v28, %v1712_v34 }
 0x2d7   : > { %v1809_v23 = vpop.f32.mrf.mxu2  ;;  %v1870_v31 = vpop.f32.mrf.mxu0 }
 0x2d8   : > { %v1810_v32 = vadd.f32 %v1809_v23, %v5269_v62  ;;  %v1919_v41 = vpop.f32.mrf.mxu1 }
 0x2d9   : > { %v1858_v44 = vpop.f32.mrf.mxu3  ;;  %v1920_v18 = vadd.f32 %v1919_v41, %v1870_v31 }
 0x2da   : > { %v5717_v30 = vadd.f32 %v1858_v44, %v1810_v32  ;;  %2065 = vmatmul.bf16.vlgmr.msrb.gmra.mxu0 %v5499_v20 }
 0x2db   : > { %v2253_v45 = vadd.f32 %v1920_v18, %v5271_v59  ;;  %2114 = vmatmul.bf16.vlgmr.msrb.gmra.mxu1 %v5501_v54 }
 0x2dc   : > { %2163 = vmatmul.bf16.vlgmr.msrb.gmra.mxu2 %v5499_v20 }
 0x2dd   : > { %2317 = vst [vmem:[%s5723_s15] sm:$0xff] %v2253_v45 }
 0x2de   : > { %2212 = vmatmul.bf16.vlgmr.msrb.gmra.mxu3 %v5501_v54 }
 0x2df   : > { %v1968_v62 = vpop.f32.mrf.mxu2  ;;  %v1872_v55 = vpop.f32.mrf.mxu0 }
 0x2e0   : > { %v1921_v12 = vpop.f32.mrf.mxu1 }
 0x2e1   : > { %v2017_v43 = vpop.f32.mrf.mxu3  ;;  %v1922_v36 = vadd.f32 %v1921_v12, %v1872_v55 }
 0x2e2   : > { %v2018_v15 = vadd.f32 %v2017_v43, %v1968_v62 }
 0x2e3   : > { %v2257_v22 = vadd.f32 %v1922_v36, %v5302_v46 }
 0x2e4   : > { %v2254_v59 = vadd.f32 %v2018_v15, %v5300_v35 }
 0x2e5   : > { %2321 = vst [vmem:[%s5723_s15 + $0x20] sm:$0xff] %v2257_v22 }
 0x2e6   : > { %2318 = vst [vmem:[%s5723_s15 + $0x8] sm:$0xff] %v2254_v59 }
 0x2e7   : > { %v1970_v20 = vpop.f32.mrf.mxu2  ;;  %v1875_v29 = vpop.f32.mrf.mxu0 }
 0x2e8   : > { %v1924_v40 = vpop.f32.mrf.mxu1 }
 0x2e9   : > { %v2019_v58 = vpop.f32.mrf.mxu3  ;;  %v1925_v54 = vadd.f32 %v1924_v40, %v1875_v29 }
 0x2ea   : > { %v2020_v34 = vadd.f32 %v2019_v58, %v1970_v20  ;;  %2070 = vmatmul.bf16.gmra.mxu0 %v5527_v6 }
 0x2eb   : > { %v2261_v23 = vadd.f32 %v1925_v54, %v5332_v52  ;;  %2119 = vmatmul.bf16.gmra.mxu1 %v5529_v19 }
 0x2ec   : > { %v2258_v28 = vadd.f32 %v2020_v34, %v5330_v7  ;;  %2168 = vmatmul.bf16.gmra.mxu2 %v5527_v6 }
 0x2ed   : > { %2325 = vst [vmem:[%s5723_s15 + $0x40] sm:$0xff] %v2261_v23 }
 0x2ee   : > { %2322 = vst [vmem:[%s5723_s15 + $0x28] sm:$0xff] %v2258_v28  ;;  %2217 = vmatmul.bf16.gmra.mxu3 %v5529_v19 }
 0x2ef   : > { %v1973_v35 = vpop.f32.mrf.mxu2  ;;  %v1877_v46 = vpop.f32.mrf.mxu0 }
 0x2f0   : > { %v1926_v32 = vpop.f32.mrf.mxu1 }
 0x2f1   : > { %v2022_v31 = vpop.f32.mrf.mxu3  ;;  %v1927_v41 = vadd.f32 %v1926_v32, %v1877_v46 }
 0x2f2   : > { %v2023_v44 = vadd.f32 %v2022_v31, %v1973_v35 }
 0x2f3   : > { %v2265_v18 = vadd.f32 %v1927_v41, %v5366_v26 }
 0x2f4   : > { %v2262_v7 = vadd.f32 %v2023_v44, %v5364_v33 }
 0x2f5   : > { %2329 = vst [vmem:[%s5723_s15 + $0x60] sm:$0xff] %v2265_v18 }
 0x2f6   : > { %2326 = vst [vmem:[%s5723_s15 + $0x48] sm:$0xff] %v2262_v7 }
 0x2f7   : > { %v1975_v52 = vpop.f32.mrf.mxu2  ;;  %v1880_v6 = vpop.f32.mrf.mxu0 }
 0x2f8   : > { %v1929_v62 = vpop.f32.mrf.mxu1 }
 0x2f9   : > { %v2024_v45 = vpop.f32.mrf.mxu3  ;;  %v1930_v55 = vadd.f32 %v1929_v62, %v1880_v6 }
 0x2fa   : > { %v2025_v19 = vadd.f32 %v2024_v45, %v1975_v52  ;;  %2075 = vmatmul.bf16.gmra.mxu0 %v5555_v53 }
 0x2fb   : > { %v2269_v12 = vadd.f32 %v1930_v55, %v5396_v5  ;;  %2124 = vmatmul.bf16.gmra.mxu1 %v5557_v10 }
 0x2fc   : > { %v2266_v43 = vadd.f32 %v2025_v19, %v5394_v2  ;;  %2173 = vmatmul.bf16.gmra.mxu2 %v5555_v53 }
 0x2fd   : > { %2333 = vst [vmem:[%s5723_s15 + $0x80] sm:$0xff] %v2269_v12 }
 0x2fe   : > { %2330 = vst [vmem:[%s5723_s15 + $0x68] sm:$0xff] %v2266_v43  ;;  %2222 = vmatmul.bf16.gmra.mxu3 %v5557_v10 }
 0x2ff   : > { %v1978_v33 = vpop.f32.mrf.mxu2  ;;  %v1882_v26 = vpop.f32.mrf.mxu0 }
 0x300   : > { %v1931_v36 = vpop.f32.mrf.mxu1 }
 0x301   : > { %v2027_v15 = vpop.f32.mrf.mxu3  ;;  %v1932_v22 = vadd.f32 %v1931_v36, %v1882_v26 }
 0x302   : > { %v2028_v59 = vadd.f32 %v2027_v15, %v1978_v33 }
 0x303   : > { %v2273_v20 = vadd.f32 %v1932_v22, %v5409_v11 }
 0x304   : > { %v2270_v2 = vadd.f32 %v2028_v59, %v5407_v51 }
 0x305   : > { %2337 = vst [vmem:[%s5723_s15 + $0xa0] sm:$0xff] %v2273_v20 }
 0x306   : > { %2334 = vst [vmem:[%s5723_s15 + $0x88] sm:$0xff] %v2270_v2 }
 0x307   : > { %v1980_v5 = vpop.f32.mrf.mxu2  ;;  %v1885_v53 = vpop.f32.mrf.mxu0 }
 0x308   : > { %v1934_v58 = vpop.f32.mrf.mxu1 }
 0x309   : > { %v2029_v29 = vpop.f32.mrf.mxu3  ;;  %v1935_v40 = vadd.f32 %v1934_v58, %v1885_v53  ;;  %v6859_v58 = vld [vmem:[#allocation104_spill] sm:$0xff] }
 0x30a   : > { %v2030_v10 = vadd.f32 %v2029_v29, %v1980_v5  ;;  %2080 = vmatmul.bf16.gmra.mxu0 %v5583_v24 }
 0x30b   : > { %v2277_v54 = vadd.f32 %v1935_v40, %v5415_v14  ;;  %2129 = vmatmul.bf16.gmra.mxu1 %v5585_v3 }
 0x30c   : > { %v2274_v34 = vadd.f32 %v2030_v10, %v5413_v13  ;;  %2178 = vmatmul.bf16.gmra.mxu2 %v5583_v24 }
 0x30d   : > { %2341 = vst [vmem:[%s5723_s15 + $0xc0] sm:$0xff] %v2277_v54 }
 0x30e   : > { %2338 = vst [vmem:[%s5723_s15 + $0xa8] sm:$0xff] %v2274_v34  ;;  %2227 = vmatmul.bf16.gmra.mxu3 %v5585_v3 }
 0x30f   : > { %v1983_v51 = vpop.f32.mrf.mxu2  ;;  %v1887_v11 = vpop.f32.mrf.mxu0 }
 0x310   : > { %v1936_v23 = vpop.f32.mrf.mxu1 }
 0x311   : > { %v2032_v28 = vpop.f32.mrf.mxu3  ;;  %v1937_v46 = vadd.f32 %v1936_v23, %v1887_v11  ;;  %v6862_v23 = vld [vmem:[#allocation118_spill] sm:$0xff] }
 0x312   : > { %v2033_v35 = vadd.f32 %v2032_v28, %v1983_v51  ;;  %v6861_v28 = vld [vmem:[#allocation105_spill] sm:$0xff] }
 0x313   : > { %v2281_v31 = vadd.f32 %v1937_v46, %v5425_v47 }
 0x314   : > { %v2278_v13 = vadd.f32 %v2033_v35, %v5423_v61 }
 0x315   : > { %2345 = vst [vmem:[%s5723_s15 + $0xe0] sm:$0xff] %v2281_v31 }
 0x316   : > { %2342 = vst [vmem:[%s5723_s15 + $0xc8] sm:$0xff] %v2278_v13 }
 0x317   : > { %v1985_v14 = vpop.f32.mrf.mxu2  ;;  %v1890_v24 = vpop.f32.mrf.mxu0 }
 0x318   : > { %v1939_v44 = vpop.f32.mrf.mxu1 }
 0x319   : > { %v2034_v32 = vpop.f32.mrf.mxu3  ;;  %v1940_v41 = vadd.f32 %v1939_v44, %v1890_v24 }
 0x31a   : > { %v2035_v3 = vadd.f32 %v2034_v32, %v1985_v14  ;;  %2085 = vmatmul.bf16.gmra.mxu0 %v5611_v39  ;;  %v6863_v32 = vld [vmem:[#allocation119_spill] sm:$0xff] }
 0x31b   : > { %v2285_v18 = vadd.f32 %v1940_v41, %v5431_v56  ;;  %2134 = vmatmul.bf16.gmra.mxu1 %v5613_v60 }
 0x31c   : > { %v2282_v7 = vadd.f32 %v2035_v3, %v5429_v8  ;;  %2183 = vmatmul.bf16.gmra.mxu2 %v5611_v39  ;;  %v6864_v3 = vld [vmem:[#allocation15_spill] sm:$0xff] }
 0x31d   : > { %2349 = vst [vmem:[%s5723_s15 + $0x100] sm:$0xff] %v2285_v18 }
 0x31e   : > { %2346 = vst [vmem:[%s5723_s15 + $0xe8] sm:$0xff] %v2282_v7  ;;  %2232 = vmatmul.bf16.gmra.mxu3 %v5613_v60 }
 0x31f   : > { %v1988_v61 = vpop.f32.mrf.mxu2  ;;  %v1892_v47 = vpop.f32.mrf.mxu0 }
 0x320   : > { %v1941_v6 = vpop.f32.mrf.mxu1 }
 0x321   : > { %v2037_v52 = vpop.f32.mrf.mxu3  ;;  %v1942_v62 = vadd.f32 %v1941_v6, %v1892_v47 }
 0x322   : > { %v2038_v45 = vadd.f32 %v2037_v52, %v1988_v61 }
 0x323   : > { %v2289_v19 = vadd.f32 %v1942_v62, %v5441_v50 }
 0x324   : > { %v2286_v8 = vadd.f32 %v2038_v45, %v5439_v16  ;;  %v6865_v45 = vld [vmem:[#allocation45_spill] sm:$0xff] }
 0x325   : > { %2353 = vst [vmem:[%s5723_s15 + $0x120] sm:$0xff] %v2289_v19 }
 0x326   : > { %2350 = vst [vmem:[%s5723_s15 + $0x108] sm:$0xff] %v2286_v8  ;;  %v6866_v8 = vld [vmem:[#allocation46_spill] sm:$0xff] }
 0x327   : > { %v1990_v56 = vpop.f32.mrf.mxu2  ;;  %v1895_v39 = vpop.f32.mrf.mxu0 }
 0x328   : > { %v1944_v43 = vpop.f32.mrf.mxu1 }
 0x329   : > { %v2039_v55 = vpop.f32.mrf.mxu3  ;;  %v1945_v12 = vadd.f32 %v1944_v43, %v1895_v39 }
 0x32a   : > { %v2040_v60 = vadd.f32 %v2039_v55, %v1990_v56  ;;  %2090 = vmatmul.bf16.gmra.mxu0 %v5639_v42 }
 0x32b   : > { %v2293_v26 = vadd.f32 %v1945_v12, %v5447_v49  ;;  %2139 = vmatmul.bf16.gmra.mxu1 %v5641_v27 }
 0x32c   : > { %v2290_v33 = vadd.f32 %v2040_v60, %v5445_v25  ;;  %2188 = vmatmul.bf16.gmra.mxu2 %v5639_v42  ;;  %v6867_v60 = vld [vmem:[#allocation40_spill] sm:$0xff] }
 0x32d   : > { %2357 = vst [vmem:[%s5723_s15 + $0x140] sm:$0xff] %v2293_v26 }
 0x32e   : > { %2354 = vst [vmem:[%s5723_s15 + $0x128] sm:$0xff] %v2290_v33  ;;  %2237 = vmatmul.bf16.gmra.mxu3 %v5641_v27  ;;  %v6868_v33 = vld [vmem:[#allocation44_spill] sm:$0xff] }
 0x32f   : > { %v1993_v16 = vpop.f32.mrf.mxu2  ;;  %v1897_v50 = vpop.f32.mrf.mxu0 }
 0x330   : > { %v1946_v36 = vpop.f32.mrf.mxu1 }
 0x331   : > { %v2042_v15 = vpop.f32.mrf.mxu3  ;;  %v1947_v22 = vadd.f32 %v1946_v36, %v1897_v50 }
 0x332   : > { %v2043_v59 = vadd.f32 %v2042_v15, %v1993_v16 }
 0x333   : > { %v2297_v2 = vadd.f32 %v1947_v22, %v5457_v0 }
 0x334   : > { %v2294_v25 = vadd.f32 %v2043_v59, %v5455_v21  ;;  %v6860_v21 = vld [vmem:[#allocation17_spill] sm:$0xff] }
 0x335   : > { %2361 = vst [vmem:[%s5723_s15 + $0x160] sm:$0xff] %v2297_v2 }
 0x336   : > { %2358 = vst [vmem:[%s5723_s15 + $0x148] sm:$0xff] %v2294_v25  ;;  %v6869_v25 = vld [vmem:[#allocation53_spill] sm:$0xff] }
 0x337   : > { %v1995_v49 = vpop.f32.mrf.mxu2  ;;  %v1900_v42 = vpop.f32.mrf.mxu0 }
 0x338   : > { %v1949_v5 = vpop.f32.mrf.mxu1 }
 0x339   : > { %v2044_v20 = vpop.f32.mrf.mxu3  ;;  %v1950_v53 = vadd.f32 %v1949_v5, %v1900_v42 }
 0x33a   : > { %v2045_v27 = vadd.f32 %v2044_v20, %v1995_v49  ;;  %2095 = vmatmul.bf16.gmra.mxu0 %v5667_v37  ;;  %v6870_v49 = vld [vmem:[#allocation49_spill] sm:$0xff] }
 0x33b   : > { %v2301_v10 = vadd.f32 %v1950_v53, %v6859_v58  ;;  %2144 = vmatmul.bf16.gmra.mxu1 %v6860_v21 }
 0x33c   : > { %v2298_v29 = vadd.f32 %v2045_v27, %v5461_v63  ;;  %2193 = vmatmul.bf16.gmra.mxu2 %v5667_v37 }
 0x33d   : > { %2365 = vst [vmem:[%s5723_s15 + $0x180] sm:$0xff] %v2301_v10  ;;  %v6871_v10 = vld [vmem:[#allocation50_spill] sm:$0xff] }
 0x33e   : > { %2362 = vst [vmem:[%s5723_s15 + $0x168] sm:$0xff] %v2298_v29  ;;  %2242 = vmatmul.bf16.gmra.mxu3 %v6860_v21 }
 0x33f   : > { %v1998_v0 = vpop.f32.mrf.mxu2  ;;  %v1902_v40 = vpop.f32.mrf.mxu0 }
 0x340   : > { %v1951_v54 = vpop.f32.mrf.mxu1 }
 0x341   : > { %v2047_v34 = vpop.f32.mrf.mxu3  ;;  %v1952_v11 = vadd.f32 %v1951_v54, %v1902_v40 }
 0x342   : > { %v2048_v51 = vadd.f32 %v2047_v34, %v1998_v0  ;;  %v6872_v0 = vld [vmem:[#allocation56_spill] sm:$0xff] }
 0x343   : > { %v2305_v35 = vadd.f32 %v1952_v11, %v6862_v23  ;;  %v6873_v23 = vld [vmem:[#allocation57_spill] sm:$0xff] }
 0x344   : > { %v2302_v63 = vadd.f32 %v2048_v51, %v6861_v28 }
 0x345   : > { %2369 = vst [vmem:[%s5723_s15 + $0x1a0] sm:$0xff] %v2305_v35 }
 0x346   : > { %2366 = vst [vmem:[%s5723_s15 + $0x188] sm:$0xff] %v2302_v63 }
 0x347   : > { %v2000_v46 = vpop.f32.mrf.mxu2  ;;  %v1905_v37 = vpop.f32.mrf.mxu0 }
 0x348   : > { %v1954_v31 = vpop.f32.mrf.mxu1 }
 0x349   : > { %v2049_v13 = vpop.f32.mrf.mxu3  ;;  %v1955_v24 = vadd.f32 %v1954_v31, %v1905_v37 }
 0x34a   : > { %v2050_v14 = vadd.f32 %v2049_v13, %v2000_v46  ;;  %2100 = vmatmul.bf16.gmra.mxu0 %v5695_v57  ;;  %v6874_v46 = vld [vmem:[#allocation54_spill] sm:$0xff] }
 0x34b   : > { %v2309_v41 = vadd.f32 %v1955_v24, %v6864_v3  ;;  %2149 = vmatmul.bf16.gmra.mxu1 %v5697_v48  ;;  %v6875_v3 = vld [vmem:[#allocation55_spill] sm:$0xff] }
 0x34c   : > { %v2306_v44 = vadd.f32 %v2050_v14, %v6863_v32  ;;  %2198 = vmatmul.bf16.gmra.mxu2 %v5695_v57 }
 0x34d   : > { %2373 = vst [vmem:[%s5723_s15 + $0x1c0] sm:$0xff] %v2309_v41 }
 0x34e   : > { %2370 = vst [vmem:[%s5723_s15 + $0x1a8] sm:$0xff] %v2306_v44  ;;  %2247 = vmatmul.bf16.gmra.mxu3 %v5697_v48 }
 0x34f   : > { %v2003_v7 = vpop.f32.mrf.mxu2  ;;  %v1907_v18 = vpop.f32.mrf.mxu0 }
 0x350   : > { %v1956_v47 = vpop.f32.mrf.mxu1 }
 0x351   : > { %v2052_v61 = vpop.f32.mrf.mxu3  ;;  %v1957_v6 = vadd.f32 %v1956_v47, %v1907_v18 }
 0x352   : > { %v2053_v52 = vadd.f32 %v2052_v61, %v2003_v7  ;;  %v6876_v7 = vld [vmem:[#allocation70_spill] sm:$0xff] }
 0x353   : > { %v2313_v19 = vadd.f32 %v1957_v6, %v6866_v8  ;;  %v6877_v8 = vld [vmem:[#allocation93_spill] sm:$0xff] }
 0x354   : > { %v2310_v62 = vadd.f32 %v2053_v52, %v6865_v45 }
 0x355   : > { %2377 = vst [vmem:[%s5723_s15 + $0x1e0] sm:$0xff] %v2313_v19 }
 0x356   : > { %2374 = vst [vmem:[%s5723_s15 + $0x1c8] sm:$0xff] %v2310_v62 }
 0x357   : > { %v2005_v56 = vpop.f32.mrf.mxu2  ;;  %v2066_v57 = vpop.f32.mrf.mxu0 }
 0x358   : > { %v2115_v48 = vpop.f32.mrf.mxu1 }
 0x359   : > { %v2054_v39 = vpop.f32.mrf.mxu3  ;;  %v2116_v43 = vadd.f32 %v2115_v48, %v2066_v57 }
 0x35a   : > { %v2055_v55 = vadd.f32 %v2054_v39, %v2005_v56  ;;  %v6878_v56 = vld [vmem:[#allocation89_spill] sm:$0xff] }
 0x35b   : > { %v2255_v26 = vadd.f32 %v2116_v43, %v6868_v33  ;;  %v6879_v33 = vld [vmem:[#allocation90_spill] sm:$0xff] }
 0x35c   : > { %v2314_v12 = vadd.f32 %v2055_v55, %v6867_v60 }
 0x35d   : > { %2319 = vst [vmem:[%s5723_s15 + $0x10] sm:$0xff] %v2255_v26 }
 0x35e   : > { %2378 = vst [vmem:[%s5723_s15 + $0x1e8] sm:$0xff] %v2314_v12 }
 0x35f   : > { %v2164_v16 = vpop.f32.mrf.mxu2  ;;  %v2068_v50 = vpop.f32.mrf.mxu0 }
 0x360   : > { %v2117_v36 = vpop.f32.mrf.mxu1 }
 0x361   : > { %v2213_v15 = vpop.f32.mrf.mxu3  ;;  %v2118_v22 = vadd.f32 %v2117_v36, %v2068_v50 }
 0x362   : > { %v2214_v59 = vadd.f32 %v2213_v15, %v2164_v16  ;;  %v6880_v16 = vld [vmem:[#allocation106_spill] sm:$0xff] }
 0x363   : > { %v2259_v42 = vadd.f32 %v2118_v22, %v6870_v49  ;;  %v6881_v49 = vld [vmem:[#allocation107_spill] sm:$0xff] }
 0x364   : > { %v2256_v2 = vadd.f32 %v2214_v59, %v6869_v25 }
 0x365   : > { %2323 = vst [vmem:[%s5723_s15 + $0x30] sm:$0xff] %v2259_v42 }
 0x366   : > { %2320 = vst [vmem:[%s5723_s15 + $0x18] sm:$0xff] %v2256_v2 }
 0x367   : > { %v2166_v20 = vpop.f32.mrf.mxu2  ;;  %v2071_v5 = vpop.f32.mrf.mxu0 }
 0x368   : > { %v2120_v53 = vpop.f32.mrf.mxu1 }
 0x369   : > { %v2215_v27 = vpop.f32.mrf.mxu3  ;;  %v2121_v58 = vadd.f32 %v2120_v53, %v2071_v5 }
 0x36a   : > { %v2216_v29 = vadd.f32 %v2215_v27, %v2166_v20  ;;  %v6882_v20 = vld [vmem:[#allocation102_spill] sm:$0xff] }
 0x36b   : > { %v2263_v40 = vadd.f32 %v2121_v58, %v6872_v0  ;;  %v6883_v0 = vld [vmem:[#allocation103_spill] sm:$0xff] }
 0x36c   : > { %v2260_v21 = vadd.f32 %v2216_v29, %v6871_v10 }
 0x36d   : > { %2327 = vst [vmem:[%s5723_s15 + $0x50] sm:$0xff] %v2263_v40 }
 0x36e   : > { %2324 = vst [vmem:[%s5723_s15 + $0x38] sm:$0xff] %v2260_v21 }
 0x36f   : > { %v2169_v34 = vpop.f32.mrf.mxu2  ;;  %v2073_v54 = vpop.f32.mrf.mxu0 }
 0x370   : > { %v2122_v11 = vpop.f32.mrf.mxu1 }
 0x371   : > { %v2218_v51 = vpop.f32.mrf.mxu3  ;;  %v2123_v63 = vadd.f32 %v2122_v11, %v2073_v54 }
 0x372   : > { %v2219_v28 = vadd.f32 %v2218_v51, %v2169_v34  ;;  %v6884_v34 = vld [vmem:[#allocation116_spill] sm:$0xff] }
 0x373   : > { %v2267_v37 = vadd.f32 %v2123_v63, %v6874_v46  ;;  %v6885_v46 = vld [vmem:[#allocation16_spill] sm:$0xff] }
 0x374   : > { %v2264_v35 = vadd.f32 %v2219_v28, %v6873_v23 }
 0x375   : > { %2331 = vst [vmem:[%s5723_s15 + $0x70] sm:$0xff] %v2267_v37 }
 0x376   : > { %2328 = vst [vmem:[%s5723_s15 + $0x58] sm:$0xff] %v2264_v35 }
 0x377   : > { %v2171_v13 = vpop.f32.mrf.mxu2  ;;  %v2076_v31 = vpop.f32.mrf.mxu0 }
 0x378   : > { %v2125_v24 = vpop.f32.mrf.mxu1 }
 0x379   : > { %v2220_v14 = vpop.f32.mrf.mxu3  ;;  %v2126_v44 = vadd.f32 %v2125_v24, %v2076_v31 }
 0x37a   : > { %v2221_v32 = vadd.f32 %v2220_v14, %v2171_v13  ;;  %v6886_v13 = vld [vmem:[#allocation13_spill] sm:$0xff] }
 0x37b   : > { %v2271_v18 = vadd.f32 %v2126_v44, %v6876_v7  ;;  %v6887_v7 = vld [vmem:[#allocation117_spill] sm:$0xff] }
 0x37c   : > { %v2268_v41 = vadd.f32 %v2221_v32, %v6875_v3 }
 0x37d   : > { %2335 = vst [vmem:[%s5723_s15 + $0x90] sm:$0xff] %v2271_v18 }
 0x37e   : > { %2332 = vst [vmem:[%s5723_s15 + $0x78] sm:$0xff] %v2268_v41 }
 0x37f   : > { %v2174_v61 = vpop.f32.mrf.mxu2  ;;  %v2078_v47 = vpop.f32.mrf.mxu0 }
 0x380   : > { %v2127_v6 = vpop.f32.mrf.mxu1 }
 0x381   : > { %v2223_v52 = vpop.f32.mrf.mxu3  ;;  %v2128_v62 = vadd.f32 %v2127_v6, %v2078_v47 }
 0x382   : > { %v2224_v45 = vadd.f32 %v2223_v52, %v2174_v61  ;;  %v6888_v61 = vld [vmem:[#allocation114_spill] sm:$0xff] }
 0x383   : > { %v2275_v57 = vadd.f32 %v2128_v62, %v6878_v56  ;;  %v6889_v56 = vld [vmem:[#allocation115_spill] sm:$0xff] }
 0x384   : > { %v2272_v19 = vadd.f32 %v2224_v45, %v6877_v8 }
 0x385   : > { %2339 = vst [vmem:[%s5723_s15 + $0xb0] sm:$0xff] %v2275_v57 }
 0x386   : > { %2336 = vst [vmem:[%s5723_s15 + $0x98] sm:$0xff] %v2272_v19 }
 0x387   : > { %v2176_v39 = vpop.f32.mrf.mxu2  ;;  %v2081_v48 = vpop.f32.mrf.mxu0 }
 0x388   : > { %v2130_v43 = vpop.f32.mrf.mxu1 }
 0x389   : > { %v2225_v55 = vpop.f32.mrf.mxu3  ;;  %v2131_v12 = vadd.f32 %v2130_v43, %v2081_v48 }
 0x38a   : > { %v2226_v60 = vadd.f32 %v2225_v55, %v2176_v39  ;;  %v6890_v39 = vld [vmem:[#allocation14_spill] sm:$0xff] }
 0x38b   : > { %v2279_v50 = vadd.f32 %v2131_v12, %v6880_v16  ;;  %v6891_v16 = vld [vmem:[#allocation29_spill] sm:$0xff] }
 0x38c   : > { %v2276_v26 = vadd.f32 %v2226_v60, %v6879_v33 }
 0x38d   : > { %2343 = vst [vmem:[%s5723_s15 + $0xd0] sm:$0xff] %v2279_v50 }
 0x38e   : > { %2340 = vst [vmem:[%s5723_s15 + $0xb8] sm:$0xff] %v2276_v26 }
 0x38f   : > { %v2179_v15 = vpop.f32.mrf.mxu2  ;;  %v2083_v36 = vpop.f32.mrf.mxu0 }
 0x390   : > { %v2132_v22 = vpop.f32.mrf.mxu1 }
 0x391   : > { %v2228_v59 = vpop.f32.mrf.mxu3  ;;  %v2133_v2 = vadd.f32 %v2132_v22, %v2083_v36 }
 0x392   : > { %v2229_v25 = vadd.f32 %v2228_v59, %v2179_v15  ;;  %v6892_v15 = vld [vmem:[#allocation32_spill] sm:$0xff] }
 0x393   : > { %v2283_v5 = vadd.f32 %v2133_v2, %v6882_v20 }
 0x394   : > { %v2280_v42 = vadd.f32 %v2229_v25, %v6881_v49 }
 0x395   : > { %2347 = vst [vmem:[%s5723_s15 + $0xf0] sm:$0xff] %v2283_v5  ;;  %v6893_v5 = vld [vmem:[#allocation23_spill] sm:$0xff] }
 0x396   : > { %2344 = vst [vmem:[%s5723_s15 + $0xd8] sm:$0xff] %v2280_v42 }
 0x397   : > { %v2181_v27 = vpop.f32.mrf.mxu2  ;;  %v2086_v53 = vpop.f32.mrf.mxu0 }
 0x398   : > { %v2135_v58 = vpop.f32.mrf.mxu1 }
 0x399   : > { %v2230_v29 = vpop.f32.mrf.mxu3  ;;  %v2136_v21 = vadd.f32 %v2135_v58, %v2086_v53 }
 0x39a   : > { %v2231_v10 = vadd.f32 %v2230_v29, %v2181_v27 }
 0x39b   : > { %v2287_v54 = vadd.f32 %v2136_v21, %v6884_v34 }
 0x39c   : > { %v2284_v40 = vadd.f32 %v2231_v10, %v6883_v0 }
 0x39d   : > { %2351 = vst [vmem:[%s5723_s15 + $0x110] sm:$0xff] %v2287_v54 }
 0x39e   : > { %2348 = vst [vmem:[%s5723_s15 + $0xf8] sm:$0xff] %v2284_v40 }
 0x39f   : > { %v2184_v51 = vpop.f32.mrf.mxu2  ;;  %v2088_v11 = vpop.f32.mrf.mxu0 }
 0x3a0   : > { %v2137_v63 = vpop.f32.mrf.mxu1 }
 0x3a1   : > { %v2233_v28 = vpop.f32.mrf.mxu3  ;;  %v2138_v35 = vadd.f32 %v2137_v63, %v2088_v11 }
 0x3a2   : > { %v2234_v23 = vadd.f32 %v2233_v28, %v2184_v51 }
 0x3a3   : > { %v2291_v31 = vadd.f32 %v2138_v35, %v6886_v13 }
 0x3a4   : > { %v2288_v37 = vadd.f32 %v2234_v23, %v6885_v46 }
 0x3a5   : > { %2355 = vst [vmem:[%s5723_s15 + $0x130] sm:$0xff] %v2291_v31 }
 0x3a6   : > { %2352 = vst [vmem:[%s5723_s15 + $0x118] sm:$0xff] %v2288_v37 }
 0x3a7   : > { %v2186_v14 = vpop.f32.mrf.mxu2  ;;  %v2091_v24 = vpop.f32.mrf.mxu0 }
 0x3a8   : > { %v2140_v44 = vpop.f32.mrf.mxu1 }
 0x3a9   : > { %v2235_v32 = vpop.f32.mrf.mxu3  ;;  %v2141_v41 = vadd.f32 %v2140_v44, %v2091_v24 }
 0x3aa   : > { %v2236_v3 = vadd.f32 %v2235_v32, %v2186_v14 }
 0x3ab   : > { %v2295_v47 = vadd.f32 %v2141_v41, %v6888_v61 }
 0x3ac   : > { %v2292_v18 = vadd.f32 %v2236_v3, %v6887_v7 }
 0x3ad   : > { %2359 = vst [vmem:[%s5723_s15 + $0x150] sm:$0xff] %v2295_v47 }
 0x3ae   : > { %2356 = vst [vmem:[%s5723_s15 + $0x138] sm:$0xff] %v2292_v18 }
 0x3af   : > { %v2189_v52 = vpop.f32.mrf.mxu2  ;;  %v2093_v6 = vpop.f32.mrf.mxu0 }
 0x3b0   : > { %v2142_v62 = vpop.f32.mrf.mxu1 }
 0x3b1   : > { %v2238_v45 = vpop.f32.mrf.mxu3  ;;  %v2143_v19 = vadd.f32 %v2142_v62, %v2093_v6 }
 0x3b2   : > { %v2239_v8 = vadd.f32 %v2238_v45, %v2189_v52 }
 0x3b3   : > { %v2299_v48 = vadd.f32 %v2143_v19, %v6890_v39 }
 0x3b4   : > { %v2296_v57 = vadd.f32 %v2239_v8, %v6889_v56 }
 0x3b5   : > { %2363 = vst [vmem:[%s5723_s15 + $0x170] sm:$0xff] %v2299_v48 }
 0x3b6   : > { %2360 = vst [vmem:[%s5723_s15 + $0x158] sm:$0xff] %v2296_v57 }
 0x3b7   : > { %v2191_v55 = vpop.f32.mrf.mxu2  ;;  %v2096_v43 = vpop.f32.mrf.mxu0 }
 0x3b8   : > { %v2145_v12 = vpop.f32.mrf.mxu1 }
 0x3b9   : > { %v2240_v60 = vpop.f32.mrf.mxu3  ;;  %v2146_v26 = vadd.f32 %v2145_v12, %v2096_v43 }
 0x3ba   : > { %v2241_v33 = vadd.f32 %v2240_v60, %v2191_v55 }
 0x3bb   : > { %v2303_v36 = vadd.f32 %v2146_v26, %v6892_v15 }
 0x3bc   : > { %v2300_v50 = vadd.f32 %v2241_v33, %v6891_v16 }
 0x3bd   : > { %2367 = vst [vmem:[%s5723_s15 + $0x190] sm:$0xff] %v2303_v36 }
 0x3be   : > { %2364 = vst [vmem:[%s5723_s15 + $0x178] sm:$0xff] %v2300_v50 }
 0x3bf   : > { %v2194_v59 = vpop.f32.mrf.mxu2  ;;  %v2098_v22 = vpop.f32.mrf.mxu0 }
 0x3c0   : > { %v2147_v2 = vpop.f32.mrf.mxu1 }
 0x3c1   : > { %v2243_v25 = vpop.f32.mrf.mxu3  ;;  %v2148_v42 = vadd.f32 %v2147_v2, %v2098_v22 }
 0x3c2   : > { %v2244_v49 = vadd.f32 %v2243_v25, %v2194_v59 }
 0x3c3   : > { %v2307_v27 = vadd.f32 %v2148_v42, %v6893_v5 }
 0x3c4   : > { %v2304_v20 = vadd.f32 %v2244_v49, %v5687_v4 }
 0x3c5   : > { %2371 = vst [vmem:[%s5723_s15 + $0x1b0] sm:$0xff] %v2307_v27 }
 0x3c6   : > { %2368 = vst [vmem:[%s5723_s15 + $0x198] sm:$0xff] %v2304_v20 }
 0x3c7   : > { %v2196_v53 = vpop.f32.mrf.mxu2  ;;  %v2101_v29 = vpop.f32.mrf.mxu0 }
 0x3c8   : > { %v2150_v10 = vpop.f32.mrf.mxu1 }
 0x3c9   : > { %v2245_v58 = vpop.f32.mrf.mxu3  ;;  %v2151_v0 = vadd.f32 %v2150_v10, %v2101_v29 }
 0x3ca   : > { %v2246_v21 = vadd.f32 %v2245_v58, %v2196_v53 }
 0x3cb   : > { %v2311_v34 = vadd.f32 %v2151_v0, %v5703_v17 }
 0x3cc   : > { %v2308_v40 = vadd.f32 %v2246_v21, %v5701_v9 }
 0x3cd   : > { %2375 = vst [vmem:[%s5723_s15 + $0x1d0] sm:$0xff] %v2311_v34 }
 0x3ce   : > { %2372 = vst [vmem:[%s5723_s15 + $0x1b8] sm:$0xff] %v2308_v40 }
 0x3cf   : > { %v2199_v4 = vpop.f32.mrf.mxu2  ;;  %v2103_v54 = vpop.f32.mrf.mxu0 }
 0x3d0   : > { %v2152_v11 = vpop.f32.mrf.mxu1 }
 0x3d1   : > { %v2248_v51 = vpop.f32.mrf.mxu3  ;;  %v2153_v63 = vadd.f32 %v2152_v11, %v2103_v54 }
 0x3d2   : > { %v2249_v28 = vadd.f32 %v2248_v51, %v2199_v4 }
 0x3d3   : > { %v2315_v35 = vadd.f32 %v2153_v63, %v5713_v1 }
 0x3d4   : > { %v2312_v23 = vadd.f32 %v2249_v28, %v5711_v38 }
 0x3d5   : > { %2379 = vst [vmem:[%s5723_s15 + $0x1f0] sm:$0xff] %v2315_v35 }
 0x3d6   : > { %2376 = vst [vmem:[%s5723_s15 + $0x1d8] sm:$0xff] %v2312_v23 }
 0x3d7   : > { %v2201_v9 = vpop.f32.mrf.mxu2 }
 0x3d9   : > { %v2250_v17 = vpop.f32.mrf.mxu3 }
 0x3da   : > { %v2251_v46 = vadd.f32 %v2250_v17, %v2201_v9 }
 0x3dc   : > { %v2316_v37 = vadd.f32 %v2251_v46, %v5717_v30 }
 0x3de   : > { %2380 = vst [vmem:[%s5723_s15 + $0x1f8] sm:$0xff] %v2316_v37 }
 0x3df   : > { %3199 = shalt.err (!%p3196_p13)
}
 0x3e0   : > { %s3263_s3 = smov 512   ;;  %s3264_s6 = smov 32  }
 0x3e1   : > { %3044 = dma.vmem_to_hbm [thread:$0]  (%p3331_p9), %s2397_s19, 8192, %s2399_s27, %s2382_s12, %s3263_s3, %s3263_s3, %s3264_s6  }
 0x3e2 PF: > { %s2413_s8 = sand.u32 1, %s3238_s9   ;;  %p3054_p0 = pnand %p2511_p12, %p3338_p11 }
 0x3e3   : > { %s2414_s21 = scalar_lea.sflag [#allocation4], %s2413_s8 }
 0x3e4   : > { %p3055_p1 = pneg %p3054_p0 }
 0x3e6   : > { %3233 = dma.done.wait (%p3055_p1), %s2414_s21, 8192  }
 0x3e7   : > { %3235 = vsyncadd (%p3055_p1), %s2414_s21, 4294959104  ;;  %s21_s14 = sadd.s32 1, %s3258_s14   ;;  %s6894_s9 = smov %s3242_s10 }
 0x3e8   : > { %p18_p2 = scmp.ge.s32.totalorder %s21_s14, 4   ;;  %s6895_s10 = smov %s3246_s11 }
 0x3e9   : > { %s6896_s11 = smov %s3336_s23  ;;  %s6897_s12 = smov %s3254_s13 }
 0x3ea   : > { %s6898_s13 = smov %s6900_s17  ;;  %20 = sbr.rel (!%p18_p2) target bundleno = 8 (0x8), region = 86 }
 0x3ef   :  { %2420 = vsyncpa [#allocation3], 1 }
 0x3f0   :  { %2422 = vsyncpa [#allocation3 + $0x1], 1 }
 0x3f1   :  { %2423 = vsyncpa [#allocation6], 1 }
 0x3f2   :  { %2425 = vsyncpa [#allocation6 + $0x1], 1 }
 0x3f3   :  { %2426 = vsyncpa [#allocation4], 1 }
 0x3f4   :  { %2428 = vsyncpa [#allocation4 + $0x1], 1 }

</bundles_post_ra>
